<compile_context>
chip_gen: v7x
topology: tpu7x:2x2x1
jax: 0.10.0
libtpu: 0.0.40
codegen_flags: <defaults>
</compile_context>

<pallas_src>
import jax
import jax.numpy as jnp
from jax import lax
from jax.experimental import pallas as pl
from jax.experimental.pallas import tpu as pltpu


# ----------------------------------------------------------------------------
# helpers
# ----------------------------------------------------------------------------

def _vmem_spec():
    # whole-array block resident in VMEM (used for the small, gridless calls)
    return pl.BlockSpec(memory_space=pltpu.MemorySpace.VMEM)


def _row_tile(n, max_tile=512):
    """Row tile for the gridded matmul kernels: whole array if small, else the
    largest divisor <= max_tile that is a multiple of 8 (sublane aligned)."""
    if n <= max_tile:
        return n
    for d in range(max_tile, 0, -1):
        if n % d == 0 and d % 8 == 0:
            return d
    return n


# ----------------------------------------------------------------------------
# Pallas kernels
# ----------------------------------------------------------------------------

def input_gates_kernel(emb_ref, w_enc_ref, b_enc_ref, w_dec_ref, b_dec_ref,
                       gi_enc_ref, gi_dec_ref):
    """gi = emb @ W_ih^T + b_ih for the encoder AND decoder GRU in one pass.

    emb_ref  : (tile, E)  bf16   flattened time-major embeddings (rows = S*B)
    w_*_ref  : (E, 3H)    bf16   pre-transposed W_ih (gate order r, z, n)
    b_*_ref  : (1, 3H)    f32
    gi_*_ref : (tile, 3H) f32
    """
    x = emb_ref[...]
    gi_enc_ref[...] = (jnp.dot(x, w_enc_ref[...],
                               preferred_element_type=jnp.float32) + b_enc_ref[...])
    gi_dec_ref[...] = (jnp.dot(x, w_dec_ref[...],
                               preferred_element_type=jnp.float32) + b_dec_ref[...])


def _gru_recurrence(gi_ref, len_ref, h0_ref, w_hh_ref, b_hh_ref,
                    hlast_ref, outs_ref):
    """Sequential GRU over precomputed input gates.

    gi_ref   : (S, B, 3H) f32  precomputed x@W_ih^T + b_ih (time-major)
    len_ref  : (B, 1)     i32  valid lengths
    h0_ref   : (B, H)     f32  initial hidden
    w_hh_ref : (H, 3H)    f32  pre-transposed W_hh
    b_hh_ref : (1, 3H)    f32
    hlast_ref: (B, H)          hidden at the last valid step (packed final h)
    outs_ref : (S, B, H) or None; per-step outputs, zero for t >= length
    """
    S = gi_ref.shape[0]
    H = h0_ref.shape[1]
    w_hh = w_hh_ref[...]
    b_hh = b_hh_ref[...]
    lens = len_ref[...]                       # (B, 1) int32

    def step(t, h):
        gi = gi_ref[t]                        # (B, 3H)
        gh = jnp.dot(h, w_hh, preferred_element_type=jnp.float32) + b_hh
        r = jax.nn.sigmoid(gi[:, :H] + gh[:, :H])
        zg = jax.nn.sigmoid(gi[:, H:2 * H] + gh[:, H:2 * H])
        n = jnp.tanh(gi[:, 2 * H:] + r * gh[:, 2 * H:])
        h_new = (1.0 - zg) * n + zg * h
        valid = t < lens                      # (B, 1) -> broadcasts over H
        if outs_ref is not None:
            outs_ref[t] = jnp.where(valid, h_new, jnp.zeros_like(h_new))
        return jnp.where(valid, h_new, h)

    if S <= 32:
        # Static unroll: every step's hidden matmul is visible to the LLO
        # scheduler, so step t+1's MXU push overlaps step t's VPU gate math.
        h = h0_ref[...]
        for t in range(S):
            h = step(t, h)
        hlast_ref[...] = h
    else:
        # TODO(synk): for long sequences, grid/pipeline gi over time instead of
        # holding the whole (S,B,3H) block in VMEM.
        hlast_ref[...] = lax.fori_loop(0, S, step, h0_ref[...])


def gru_last_kernel(gi_ref, len_ref, h0_ref, w_hh_ref, b_hh_ref, hlast_ref):
    # encoder variant: final hidden only, no per-step output stores
    _gru_recurrence(gi_ref, len_ref, h0_ref, w_hh_ref, b_hh_ref, hlast_ref, None)


def gru_seq_kernel(gi_ref, len_ref, h0_ref, w_hh_ref, b_hh_ref, hlast_ref, outs_ref):
    # decoder variant: also writes the (S, B, H) output sequence
    _gru_recurrence(gi_ref, len_ref, h0_ref, w_hh_ref, b_hh_ref, hlast_ref, outs_ref)


def latent_kernel(h_ref, wm_ref, bm_ref, wv_ref, bv_ref, wl_ref, bl_ref, eps_ref,
                  mean_ref, logv_ref, z_ref, dech_ref):
    """Fused hidden2mean + hidden2logv + reparameterization + latent2hidden."""
    h = h_ref[...]
    mean = jnp.dot(h, wm_ref[...], preferred_element_type=jnp.float32) + bm_ref[...]
    logv = jnp.dot(h, wv_ref[...], preferred_element_type=jnp.float32) + bv_ref[...]
    z = eps_ref[...] * jnp.exp(0.5 * logv) + mean
    mean_ref[...] = mean
    logv_ref[...] = logv
    z_ref[...] = z
    dech_ref[...] = jnp.dot(z, wl_ref[...], preferred_element_type=jnp.float32) + bl_ref[...]


def proj_logsoftmax_kernel(x_ref, w_ref, b_ref, o_ref):
    """outputs2vocab (bf16 MXU, f32 accumulate) + stable log_softmax over vocab."""
    logits = (jnp.dot(x_ref[...], w_ref[...],
                      preferred_element_type=jnp.float32) + b_ref[...])
    m = jnp.max(logits, axis=-1, keepdims=True)
    lse = jnp.log(jnp.sum(jnp.exp(logits - m), axis=-1, keepdims=True)) + m
    o_ref[...] = logits - lse


# ----------------------------------------------------------------------------
# pallas_call wrappers
# ----------------------------------------------------------------------------

def run_input_gates(emb_flat, w_enc_t, b_enc, w_dec_t, b_dec):
    N, E = emb_flat.shape
    H3 = w_enc_t.shape[1]
    tile = _row_tile(N)
    const = lambda i: (0, 0)
    return pl.pallas_call(
        input_gates_kernel,
        out_shape=(jax.ShapeDtypeStruct((N, H3), jnp.float32),
                   jax.ShapeDtypeStruct((N, H3), jnp.float32)),
        grid=(N // tile,),
        in_specs=[pl.BlockSpec((tile, E), lambda i: (i, 0)),
                  pl.BlockSpec((E, H3), const),
                  pl.BlockSpec((1, H3), const),
                  pl.BlockSpec((E, H3), const),
                  pl.BlockSpec((1, H3), const)],
        out_specs=(pl.BlockSpec((tile, H3), lambda i: (i, 0)),
                   pl.BlockSpec((tile, H3), lambda i: (i, 0))),
        compiler_params=pltpu.CompilerParams(dimension_semantics=("parallel",)),
    )(emb_flat, w_enc_t, b_enc, w_dec_t, b_dec)


def run_gru(gi_tm, lens, h0, w_hh_t, b_hh, *, collect_outputs):
    S, B, _ = gi_tm.shape
    H = h0.shape[1]
    if collect_outputs:
        return pl.pallas_call(
            gru_seq_kernel,
            out_shape=(jax.ShapeDtypeStruct((B, H), jnp.float32),
                       jax.ShapeDtypeStruct((S, B, H), jnp.float32)),
            in_specs=[_vmem_spec()] * 5,
            out_specs=(_vmem_spec(), _vmem_spec()),
        )(gi_tm, lens, h0, w_hh_t, b_hh)
    return pl.pallas_call(
        gru_last_kernel,
        out_shape=jax.ShapeDtypeStruct((B, H), jnp.float32),
        in_specs=[_vmem_spec()] * 5,
        out_specs=_vmem_spec(),
    )(gi_tm, lens, h0, w_hh_t, b_hh)


def run_latent_and_decoder_init(hidden, wm_t, bm, wv_t, bv, wl_t, bl, eps):
    B, H = hidden.shape
    L = wm_t.shape[1]
    return pl.pallas_call(
        latent_kernel,
        out_shape=(jax.ShapeDtypeStruct((B, L), jnp.float32),
                   jax.ShapeDtypeStruct((B, L), jnp.float32),
                   jax.ShapeDtypeStruct((B, L), jnp.float32),
                   jax.ShapeDtypeStruct((B, H), jnp.float32)),
        in_specs=[_vmem_spec()] * 8,
        out_specs=(_vmem_spec(),) * 4,
    )(hidden, wm_t, bm, wv_t, bv, wl_t, bl, eps)


def run_proj_logsoftmax(x, w_t, b):
    # Row-tiled grid ("parallel" -> megacore / 2 TCs on v7x); full-vocab block
    # per row tile with lane-dense V output stores.
    # TODO(synk): for very large vocabularies also tile V with an online
    # (running max / running sum) log-softmax so (tile, V) logits never
    # materialize fully in VMEM (needed to fit v7x's 64 MiB VMEM).
    N, H = x.shape
    V = w_t.shape[1]
    tile = _row_tile(N)
    const = lambda i: (0, 0)
    return pl.pallas_call(
        proj_logsoftmax_kernel,
        out_shape=jax.ShapeDtypeStruct((N, V), jnp.float32),
        grid=(N // tile,),
        in_specs=[pl.BlockSpec((tile, H), lambda i: (i, 0)),
                  pl.BlockSpec((H, V), const),
                  pl.BlockSpec((1, V), const)],
        out_specs=pl.BlockSpec((tile, V), lambda i: (i, 0)),
        compiler_params=pltpu.CompilerParams(dimension_semantics=("parallel",)),
    )(x, w_t, b)


# ----------------------------------------------------------------------------
# Parameter init (deterministic, PyTorch-like uniform(-1/sqrt(fan_in), ...))
# ----------------------------------------------------------------------------

def init_params(key, vocab_size, embedding_size, hidden_size, latent_size):
    H, E, V, L = hidden_size, embedding_size, vocab_size, latent_size
    keys = iter(jax.random.split(key, 24))   # more than needed -> no StopIteration

    def uni(shape, fan_in):
        bound = 1.0 / (float(fan_in) ** 0.5)
        return jax.random.uniform(next(keys), shape, jnp.float32, -bound, bound)

    # PyTorch-layout weights (out_features, in_features), GRU gate order (r, z, n)
    raw = {
        "embedding": jax.random.normal(next(keys), (V, E), jnp.float32),
        "enc_w_ih": uni((3 * H, E), H), "enc_w_hh": uni((3 * H, H), H),
        "enc_b_ih": uni((1, 3 * H), H), "enc_b_hh": uni((1, 3 * H), H),
        "dec_w_ih": uni((3 * H, E), H), "dec_w_hh": uni((3 * H, H), H),
        "dec_b_ih": uni((1, 3 * H), H), "dec_b_hh": uni((1, 3 * H), H),
        "h2m_w": uni((L, H), H), "h2m_b": uni((1, L), H),
        "h2v_w": uni((L, H), H), "h2v_b": uni((1, L), H),
        "l2h_w": uni((H, L), L), "l2h_b": uni((1, H), L),
        "o2v_w": uni((V, H), H), "o2v_b": uni((1, V), H),
    }
    # Runtime layout: pre-transposed to (in, out) so no in-kernel transposes;
    # MXU-heavy operands stored in bf16 (f32 accumulation inside the kernels).
    return {
        "embedding": raw["embedding"],
        "enc_w_ih_t": raw["enc_w_ih"].T.astype(jnp.bfloat16),
        "enc_w_hh_t": raw["enc_w_hh"].T,
        "enc_b_ih": raw["enc_b_ih"], "enc_b_hh": raw["enc_b_hh"],
        "dec_w_ih_t": raw["dec_w_ih"].T.astype(jnp.bfloat16),
        "dec_w_hh_t": raw["dec_w_hh"].T,
        "dec_b_ih": raw["dec_b_ih"], "dec_b_hh": raw["dec_b_hh"],
        "h2m_w_t": raw["h2m_w"].T, "h2m_b": raw["h2m_b"],
        "h2v_w_t": raw["h2v_w"].T, "h2v_b": raw["h2v_b"],
        "l2h_w_t": raw["l2h_w"].T, "l2h_b": raw["l2h_b"],
        "o2v_w_t": raw["o2v_w"].T.astype(jnp.bfloat16), "o2v_b": raw["o2v_b"],
    }


# ----------------------------------------------------------------------------
# Forward pass (mirrors SentenceVAE.forward for the non-conditional case)
# ----------------------------------------------------------------------------

@jax.jit
def sentence_vae_forward(params, input_sequence, input_length, z_eps):
    """input_sequence: (B,S) int32, input_length: (B,) int32,
    z_eps: (B, latent) f32 standard-normal noise (replaces torch.randn)."""
    B, S = input_sequence.shape
    H = params["enc_w_hh_t"].shape[0]
    V, E = params["embedding"].shape

    # embedding gather straight into time-major layout (transpose the int ids,
    # not the embedded sequence tensor)
    emb_tm = jnp.take(params["embedding"], input_sequence.T, axis=0)     # (S, B, E)
    emb_flat = emb_tm.reshape(S * B, E).astype(jnp.bfloat16)
    lens = input_length.astype(jnp.int32).reshape(B, 1)

    # --- shared input-gate precompute (one big MXU matmul per GRU) -----------
    gi_enc_flat, gi_dec_flat = run_input_gates(
        emb_flat, params["enc_w_ih_t"], params["enc_b_ih"],
        params["dec_w_ih_t"], params["dec_b_ih"])
    gi_enc = gi_enc_flat.reshape(S, B, 3 * H)
    gi_dec = gi_dec_flat.reshape(S, B, 3 * H)

    # --- encode(): hidden-only GRU -------------------------------------------
    h0 = jnp.zeros((B, H), jnp.float32)
    hidden = run_gru(gi_enc, lens, h0, params["enc_w_hh_t"], params["enc_b_hh"],
                     collect_outputs=False)                              # (B, H)

    # --- hidden2latent() + latent2hidden() fused ------------------------------
    mean, logv, z, dec_h0 = run_latent_and_decoder_init(
        hidden, params["h2m_w_t"], params["h2m_b"],
        params["h2v_w_t"], params["h2v_b"],
        params["l2h_w_t"], params["l2h_b"], z_eps)
    dec_input = z                                                        # non-conditional

    # --- decode_batch(): GRU with per-step (masked) outputs -------------------
    # word_dropout_rate = 0 and eval-mode embedding_dropout -> identity; the
    # decoder embedding is shared with the encoder, so gi_dec reuses it.
    _, outs_tm = run_gru(gi_dec, lens, dec_h0, params["dec_w_hh_t"],
                         params["dec_b_hh"], collect_outputs=True)       # (S, B, H)

    # batch-major rows for the vocab projection (transpose the (S,B,H) outputs,
    # NOT the much larger (B,S,V) logp tensor); bf16 operand halves DMA.
    outs_bm = jnp.transpose(outs_tm, (1, 0, 2)).reshape(B * S, H).astype(jnp.bfloat16)
    logp = run_proj_logsoftmax(outs_bm, params["o2v_w_t"], params["o2v_b"])
    logp = logp.reshape(B, S, V)
    # (pad_packed_sequence would trim to max(input_length); caller slices.)

    return {"logp": logp, "mean": mean, "logv": logv, "z": z,
            "dec_input": dec_input}


# ----------------------------------------------------------------------------
# Pure-jnp reference (same bf16/f32 math) for a correctness check
# ----------------------------------------------------------------------------

def reference_forward(params, input_sequence, input_length, z_eps):
    B, S = input_sequence.shape
    V, E = params["embedding"].shape
    H = params["enc_w_hh_t"].shape[0]
    hp = jax.lax.Precision.HIGHEST

    emb_tm = jnp.take(params["embedding"], input_sequence.T, axis=0)
    emb_flat = emb_tm.reshape(S * B, E).astype(jnp.bfloat16)
    lens = input_length.astype(jnp.int32)[:, None]

    def input_gates(w_t, b):
        gi = jnp.dot(emb_flat, w_t, preferred_element_type=jnp.float32) + b
        return gi.reshape(S, B, 3 * H)

    def gru(gi_tm, w_hh_t, b_hh, h0):
        def step(h, inp):
            gi, t = inp
            gh = jnp.dot(h, w_hh_t, preferred_element_type=jnp.float32,
                         precision=hp) + b_hh
            r = jax.nn.sigmoid(gi[:, :H] + gh[:, :H])
            zg = jax.nn.sigmoid(gi[:, H:2 * H] + gh[:, H:2 * H])
            n = jnp.tanh(gi[:, 2 * H:] + r * gh[:, 2 * H:])
            h_new = (1.0 - zg) * n + zg * h
            valid = t < lens
            return jnp.where(valid, h_new, h), jnp.where(valid, h_new, 0.0)
        return lax.scan(step, h0, (gi_tm, jnp.arange(S)))

    gi_enc = input_gates(params["enc_w_ih_t"], params["enc_b_ih"])
    gi_dec = input_gates(params["dec_w_ih_t"], params["dec_b_ih"])

    hidden, _ = gru(gi_enc, params["enc_w_hh_t"], params["enc_b_hh"],
                    jnp.zeros((B, H), jnp.float32))
    mean = jnp.dot(hidden, params["h2m_w_t"], precision=hp) + params["h2m_b"]
    logv = jnp.dot(hidden, params["h2v_w_t"], precision=hp) + params["h2v_b"]
    z = z_eps * jnp.exp(0.5 * logv) + mean
    dec_h0 = jnp.dot(z, params["l2h_w_t"], precision=hp) + params["l2h_b"]

    _, outs_tm = gru(gi_dec, params["dec_w_hh_t"], params["dec_b_hh"], dec_h0)
    outs_bm = jnp.transpose(outs_tm, (1, 0, 2)).reshape(B * S, H).astype(jnp.bfloat16)
    logits = jnp.dot(outs_bm, params["o2v_w_t"],
                     preferred_element_type=jnp.float32) + params["o2v_b"]
    logp = jax.nn.log_softmax(logits, axis=-1).reshape(B, S, V)
    return {"logp": logp, "mean": mean, "logv": logv, "z": z, "dec_input": z}


# ----------------------------------------------------------------------------
if __name__ == "__main__":
    # Small but hardware-friendly shapes: B multiple of 8 (sublanes), H and V
    # multiples of 128 (lanes) so every block is unmasked / lane-dense.
    vocab_size = 256
    embedding_size = 32
    hidden_size = 128
    latent_size = 32
    batch = 8
    seq = 8
    pad_idx = 0

    root = jax.random.PRNGKey(0)
    k_param, k_tok, k_eps = jax.random.split(root, 3)

    params = init_params(k_param, vocab_size, embedding_size,
                         hidden_size, latent_size)

    input_sequence = jax.random.randint(k_tok, (batch, seq), 4, vocab_size,
                                        dtype=jnp.int32)
    input_length = jnp.array([seq, 5, 7, 3, seq, 2, 6, 4], dtype=jnp.int32)
    pos = jnp.arange(seq)[None, :]
    input_sequence = jnp.where(pos < input_length[:, None], input_sequence, pad_idx)
    z_eps = jax.random.normal(k_eps, (batch, latent_size), jnp.float32)

    out = sentence_vae_forward(params, input_sequence, input_length, z_eps)
    out = jax.block_until_ready(out)

    assert out["logp"].shape == (batch, seq, vocab_size)
    assert out["mean"].shape == (batch, latent_size)
    assert out["logv"].shape == (batch, latent_size)
    assert out["z"].shape == (batch, latent_size)
    assert out["dec_input"].shape == (batch, latent_size)
    assert bool(jnp.all(jnp.isfinite(out["logp"])))
    # log_softmax rows must sum to ~1 in prob space
    assert bool(jnp.allclose(jnp.exp(out["logp"]).sum(-1), 1.0, atol=1e-4))

    # correctness vs. a pure-jnp reference using identical bf16/f32 math
    ref = reference_forward(params, input_sequence, input_length, z_eps)
    for name in ("mean", "logv", "z", "logp"):
        assert bool(jnp.allclose(out[name], ref[name], atol=2e-2, rtol=2e-2)), name

    print("KERNEL_OK")
</pallas_src>

<mosaic_0001>
module attributes {stable_mosaic.version = 11 : i64} {
  func.func @input_gates_kernel(%arg0: i32, %arg1: memref<64x32xbf16, #tpu.memory_space<vmem>>, %arg2: memref<32x384xbf16, #tpu.memory_space<vmem>>, %arg3: memref<1x384xf32, #tpu.memory_space<vmem>>, %arg4: memref<32x384xbf16, #tpu.memory_space<vmem>>, %arg5: memref<1x384xf32, #tpu.memory_space<vmem>>, %arg6: memref<64x384xf32, #tpu.memory_space<vmem>>, %arg7: memref<64x384xf32, #tpu.memory_space<vmem>>) attributes {dimension_semantics = [#tpu.dimension_semantics<parallel>], iteration_bounds = array<i64: 1>, scalar_prefetch = 0 : i64, scratch_operands = 0 : i64, tpu.core_type = #tpu.core_type<tc>, window_params = [{transform_indices = @transform_0, window_bounds = array<i64: 64, 32>}, {pipeline_mode = #tpu.pipeline_mode<synchronous>, transform_indices = @transform_1, window_bounds = array<i64: 32, 384>}, {pipeline_mode = #tpu.pipeline_mode<synchronous>, transform_indices = @transform_2, window_bounds = array<i64: 1, 384>}, {pipeline_mode = #tpu.pipeline_mode<synchronous>, transform_indices = @transform_3, window_bounds = array<i64: 32, 384>}, {pipeline_mode = #tpu.pipeline_mode<synchronous>, transform_indices = @transform_4, window_bounds = array<i64: 1, 384>}, {transform_indices = @transform_5, window_bounds = array<i64: 64, 384>}, {transform_indices = @transform_6, window_bounds = array<i64: 64, 384>}]} {
    %c0 = arith.constant 0 : index
    %c0_0 = arith.constant 0 : index
    %0 = vector.load %arg1[%c0, %c0_0] : memref<64x32xbf16, #tpu.memory_space<vmem>>, vector<64x32xbf16>
    %c0_1 = arith.constant 0 : index
    %c0_2 = arith.constant 0 : index
    %1 = vector.load %arg2[%c0_1, %c0_2] : memref<32x384xbf16, #tpu.memory_space<vmem>>, vector<32x384xbf16>
    %cst = arith.constant dense<0.000000e+00> : vector<64x384xf32>
    %2 = tpu.matmul %0, %1, %cst {dimension_numbers = #tpu.dot_dimension_numbers<[1], [0], [0], [1], [0, 0, 1, 1], [], []>} : vector<64x32xbf16>, vector<32x384xbf16>, vector<64x384xf32> -> vector<64x384xf32>
    %c0_3 = arith.constant 0 : index
    %c0_4 = arith.constant 0 : index
    %3 = vector.load %arg3[%c0_3, %c0_4] : memref<1x384xf32, #tpu.memory_space<vmem>>, vector<1x384xf32>
    %4 = vector.broadcast %3 : vector<1x384xf32> to vector<64x384xf32>
    %5 = arith.addf %2, %4 : vector<64x384xf32>
    %c0_5 = arith.constant 0 : index
    %c0_6 = arith.constant 0 : index
    %6 = vector.load %arg6[%c0_5, %c0_6] : memref<64x384xf32, #tpu.memory_space<vmem>>, vector<64x384xf32>
    tpu.vector_store %arg6[%c0_5, %c0_6], %5 {strides = array<i32>} : memref<64x384xf32, #tpu.memory_space<vmem>>, vector<64x384xf32>,
    %c0_7 = arith.constant 0 : index
    %c0_8 = arith.constant 0 : index
    %7 = vector.load %arg4[%c0_7, %c0_8] : memref<32x384xbf16, #tpu.memory_space<vmem>>, vector<32x384xbf16>
    %cst_9 = arith.constant dense<0.000000e+00> : vector<64x384xf32>
    %8 = tpu.matmul %0, %7, %cst_9 {dimension_numbers = #tpu.dot_dimension_numbers<[1], [0], [0], [1], [0, 0, 1, 1], [], []>} : vector<64x32xbf16>, vector<32x384xbf16>, vector<64x384xf32> -> vector<64x384xf32>
    %c0_10 = arith.constant 0 : index
    %c0_11 = arith.constant 0 : index
    %9 = vector.load %arg5[%c0_10, %c0_11] : memref<1x384xf32, #tpu.memory_space<vmem>>, vector<1x384xf32>
    %10 = vector.broadcast %9 : vector<1x384xf32> to vector<64x384xf32>
    %11 = arith.addf %8, %10 : vector<64x384xf32>
    %c0_12 = arith.constant 0 : index
    %c0_13 = arith.constant 0 : index
    %12 = vector.load %arg7[%c0_12, %c0_13] : memref<64x384xf32, #tpu.memory_space<vmem>>, vector<64x384xf32>
    tpu.vector_store %arg7[%c0_12, %c0_13], %11 {strides = array<i32>} : memref<64x384xf32, #tpu.memory_space<vmem>>, vector<64x384xf32>,
    return
  }
  func.func @transform_0(%arg0: i32) -> (i32, i32) {
    %c0_i32 = arith.constant 0 : i32
    %c0_i32_0 = arith.constant 0 : i32
    return %arg0, %c0_i32 : i32, i32
  }
  func.func @transform_1(%arg0: i32) -> (i32, i32) {
    %c0_i32 = arith.constant 0 : i32
    %c0_i32_0 = arith.constant 0 : i32
    %c0_i32_1 = arith.constant 0 : i32
    return %c0_i32, %c0_i32_0 : i32, i32
  }
  func.func @transform_2(%arg0: i32) -> (i32, i32) {
    %c0_i32 = arith.constant 0 : i32
    %c0_i32_0 = arith.constant 0 : i32
    %c0_i32_1 = arith.constant 0 : i32
    return %c0_i32, %c0_i32_0 : i32, i32
  }
  func.func @transform_3(%arg0: i32) -> (i32, i32) {
    %c0_i32 = arith.constant 0 : i32
    %c0_i32_0 = arith.constant 0 : i32
    %c0_i32_1 = arith.constant 0 : i32
    return %c0_i32, %c0_i32_0 : i32, i32
  }
  func.func @transform_4(%arg0: i32) -> (i32, i32) {
    %c0_i32 = arith.constant 0 : i32
    %c0_i32_0 = arith.constant 0 : i32
    %c0_i32_1 = arith.constant 0 : i32
    return %c0_i32, %c0_i32_0 : i32, i32
  }
  func.func @transform_5(%arg0: i32) -> (i32, i32) {
    %c0_i32 = arith.constant 0 : i32
    %c0_i32_0 = arith.constant 0 : i32
    return %arg0, %c0_i32 : i32, i32
  }
  func.func @transform_6(%arg0: i32) -> (i32, i32) {
    %c0_i32 = arith.constant 0 : i32
    %c0_i32_0 = arith.constant 0 : i32
    return %arg0, %c0_i32 : i32, i32
  }
}

module attributes {stable_mosaic.version = 11 : i64} {
  func.func @gru_last_kernel(%arg0: memref<8x8x384xf32, #tpu.memory_space<vmem>>, %arg1: memref<8x1xi32, #tpu.memory_space<vmem>>, %arg2: memref<8x128xf32, #tpu.memory_space<vmem>>, %arg3: memref<128x384xf32, #tpu.memory_space<vmem>>, %arg4: memref<1x384xf32, #tpu.memory_space<vmem>>, %arg5: memref<8x128xf32, #tpu.memory_space<vmem>>) attributes {dimension_semantics = [], scalar_prefetch = 0 : i64, scratch_operands = 0 : i64, tpu.core_type = #tpu.core_type<tc>} {
    %c0 = arith.constant 0 : index
    %c0_0 = arith.constant 0 : index
    %0 = vector.load %arg3[%c0, %c0_0] : memref<128x384xf32, #tpu.memory_space<vmem>>, vector<128x384xf32>
    %c0_1 = arith.constant 0 : index
    %c0_2 = arith.constant 0 : index
    %1 = vector.load %arg4[%c0_1, %c0_2] : memref<1x384xf32, #tpu.memory_space<vmem>>, vector<1x384xf32>
    %c0_3 = arith.constant 0 : index
    %c0_4 = arith.constant 0 : index
    %2 = vector.load %arg1[%c0_3, %c0_4] : memref<8x1xi32, #tpu.memory_space<vmem>>, vector<8x1xi32>
    %c0_5 = arith.constant 0 : index
    %c0_6 = arith.constant 0 : index
    %3 = vector.load %arg2[%c0_5, %c0_6] : memref<8x128xf32, #tpu.memory_space<vmem>>, vector<8x128xf32>
    %c0_7 = arith.constant 0 : index
    %c0_8 = arith.constant 0 : index
    %c0_9 = arith.constant 0 : index
    %4 = vector.load %arg0[%c0_7, %c0_8, %c0_9] : memref<8x8x384xf32, #tpu.memory_space<vmem>>, vector<1x8x384xf32>
    %5 = vector.shape_cast %4 : vector<1x8x384xf32> to vector<8x384xf32>
    %cst = arith.constant dense<0.000000e+00> : vector<8x384xf32>
    %6 = tpu.matmul %3, %0, %cst {dimension_numbers = #tpu.dot_dimension_numbers<[1], [0], [0], [1], [0, 0, 1, 1], [], []>} : vector<8x128xf32>, vector<128x384xf32>, vector<8x384xf32> -> vector<8x384xf32>
    %7 = vector.broadcast %1 : vector<1x384xf32> to vector<8x384xf32>
    %8 = arith.addf %6, %7 : vector<8x384xf32>
    %9 = vector.extract_strided_slice %5 {offsets = [0, 0], sizes = [8, 128], strides = [1, 1]} : vector<8x384xf32> to vector<8x128xf32>
    %10 = vector.extract_strided_slice %8 {offsets = [0, 0], sizes = [8, 128], strides = [1, 1]} : vector<8x384xf32> to vector<8x128xf32>
    %11 = arith.addf %9, %10 : vector<8x128xf32>
    %12 = arith.negf %11 : vector<8x128xf32>
    %13 = math.exp %12 : vector<8x128xf32>
    %cst_10 = arith.constant 1.000000e+00 : f32
    %14 = vector.broadcast %cst_10 : f32 to vector<8x128xf32>
    %15 = arith.addf %14, %13 : vector<8x128xf32>
    %16 = arith.divf %14, %15 : vector<8x128xf32>
    %17 = vector.extract_strided_slice %5 {offsets = [0, 128], sizes = [8, 128], strides = [1, 1]} : vector<8x384xf32> to vector<8x128xf32>
    %18 = vector.extract_strided_slice %8 {offsets = [0, 128], sizes = [8, 128], strides = [1, 1]} : vector<8x384xf32> to vector<8x128xf32>
    %19 = arith.addf %17, %18 : vector<8x128xf32>
    %20 = arith.negf %19 : vector<8x128xf32>
    %21 = math.exp %20 : vector<8x128xf32>
    %cst_11 = arith.constant 1.000000e+00 : f32
    %22 = vector.broadcast %cst_11 : f32 to vector<8x128xf32>
    %23 = arith.addf %22, %21 : vector<8x128xf32>
    %24 = arith.divf %22, %23 : vector<8x128xf32>
    %25 = vector.extract_strided_slice %5 {offsets = [0, 256], sizes = [8, 128], strides = [1, 1]} : vector<8x384xf32> to vector<8x128xf32>
    %26 = vector.extract_strided_slice %8 {offsets = [0, 256], sizes = [8, 128], strides = [1, 1]} : vector<8x384xf32> to vector<8x128xf32>
    %27 = arith.mulf %16, %26 : vector<8x128xf32>
    %28 = arith.addf %25, %27 : vector<8x128xf32>
    %29 = math.tanh %28 : vector<8x128xf32>
    %cst_12 = arith.constant 1.000000e+00 : f32
    %30 = vector.broadcast %cst_12 : f32 to vector<8x128xf32>
    %31 = arith.subf %30, %24 : vector<8x128xf32>
    %32 = arith.mulf %31, %29 : vector<8x128xf32>
    %33 = arith.mulf %24, %3 : vector<8x128xf32>
    %34 = arith.addf %32, %33 : vector<8x128xf32>
    %c0_i32 = arith.constant 0 : i32
    %35 = vector.broadcast %c0_i32 : i32 to vector<8x1xi32>
    %36 = arith.cmpi sgt, %2, %35 : vector<8x1xi32>
    %37 = vector.shape_cast %36 : vector<8x1xi1> to vector<8x1xi1>
    %38 = vector.broadcast %37 : vector<8x1xi1> to vector<8x128xi1>
    %39 = arith.select %38, %34, %3 : vector<8x128xi1>, vector<8x128xf32>
    %c1 = arith.constant 1 : index
    %c0_13 = arith.constant 0 : index
    %c0_14 = arith.constant 0 : index
    %40 = vector.load %arg0[%c1, %c0_13, %c0_14] : memref<8x8x384xf32, #tpu.memory_space<vmem>>, vector<1x8x384xf32>
    %41 = vector.shape_cast %40 : vector<1x8x384xf32> to vector<8x384xf32>
    %cst_15 = arith.constant dense<0.000000e+00> : vector<8x384xf32>
    %42 = tpu.matmul %39, %0, %cst_15 {dimension_numbers = #tpu.dot_dimension_numbers<[1], [0], [0], [1], [0, 0, 1, 1], [], []>} : vector<8x128xf32>, vector<128x384xf32>, vector<8x384xf32> -> vector<8x384xf32>
    %43 = vector.broadcast %1 : vector<1x384xf32> to vector<8x384xf32>
    %44 = arith.addf %42, %43 : vector<8x384xf32>
    %45 = vector.extract_strided_slice %41 {offsets = [0, 0], sizes = [8, 128], strides = [1, 1]} : vector<8x384xf32> to vector<8x128xf32>
    %46 = vector.extract_strided_slice %44 {offsets = [0, 0], sizes = [8, 128], strides = [1, 1]} : vector<8x384xf32> to vector<8x128xf32>
    %47 = arith.addf %45, %46 : vector<8x128xf32>
    %48 = arith.negf %47 : vector<8x128xf32>
    %49 = math.exp %48 : vector<8x128xf32>
    %cst_16 = arith.constant 1.000000e+00 : f32
    %50 = vector.broadcast %cst_16 : f32 to vector<8x128xf32>
    %51 = arith.addf %50, %49 : vector<8x128xf32>
    %52 = arith.divf %50, %51 : vector<8x128xf32>
    %53 = vector.extract_strided_slice %41 {offsets = [0, 128], sizes = [8, 128], strides = [1, 1]} : vector<8x384xf32> to vector<8x128xf32>
    %54 = vector.extract_strided_slice %44 {offsets = [0, 128], sizes = [8, 128], strides = [1, 1]} : vector<8x384xf32> to vector<8x128xf32>
    %55 = arith.addf %53, %54 : vector<8x128xf32>
    %56 = arith.negf %55 : vector<8x128xf32>
    %57 = math.exp %56 : vector<8x128xf32>
    %cst_17 = arith.constant 1.000000e+00 : f32
    %58 = vector.broadcast %cst_17 : f32 to vector<8x128xf32>
    %59 = arith.addf %58, %57 : vector<8x128xf32>
    %60 = arith.divf %58, %59 : vector<8x128xf32>
    %61 = vector.extract_strided_slice %41 {offsets = [0, 256], sizes = [8, 128], strides = [1, 1]} : vector<8x384xf32> to vector<8x128xf32>
    %62 = vector.extract_strided_slice %44 {offsets = [0, 256], sizes = [8, 128], strides = [1, 1]} : vector<8x384xf32> to vector<8x128xf32>
    %63 = arith.mulf %52, %62 : vector<8x128xf32>
    %64 = arith.addf %61, %63 : vector<8x128xf32>
    %65 = math.tanh %64 : vector<8x128xf32>
    %cst_18 = arith.constant 1.000000e+00 : f32
    %66 = vector.broadcast %cst_18 : f32 to vector<8x128xf32>
    %67 = arith.subf %66, %60 : vector<8x128xf32>
    %68 = arith.mulf %67, %65 : vector<8x128xf32>
    %69 = arith.mulf %60, %39 : vector<8x128xf32>
    %70 = arith.addf %68, %69 : vector<8x128xf32>
    %c1_i32 = arith.constant 1 : i32
    %71 = vector.broadcast %c1_i32 : i32 to vector<8x1xi32>
    %72 = arith.cmpi sgt, %2, %71 : vector<8x1xi32>
    %73 = vector.shape_cast %72 : vector<8x1xi1> to vector<8x1xi1>
    %74 = vector.broadcast %73 : vector<8x1xi1> to vector<8x128xi1>
    %75 = arith.select %74, %70, %39 : vector<8x128xi1>, vector<8x128xf32>
    %c2 = arith.constant 2 : index
    %c0_19 = arith.constant 0 : index
    %c0_20 = arith.constant 0 : index
    %76 = vector.load %arg0[%c2, %c0_19, %c0_20] : memref<8x8x384xf32, #tpu.memory_space<vmem>>, vector<1x8x384xf32>
    %77 = vector.shape_cast %76 : vector<1x8x384xf32> to vector<8x384xf32>
    %cst_21 = arith.constant dense<0.000000e+00> : vector<8x384xf32>
    %78 = tpu.matmul %75, %0, %cst_21 {dimension_numbers = #tpu.dot_dimension_numbers<[1], [0], [0], [1], [0, 0, 1, 1], [], []>} : vector<8x128xf32>, vector<128x384xf32>, vector<8x384xf32> -> vector<8x384xf32>
    %79 = vector.broadcast %1 : vector<1x384xf32> to vector<8x384xf32>
    %80 = arith.addf %78, %79 : vector<8x384xf32>
    %81 = vector.extract_strided_slice %77 {offsets = [0, 0], sizes = [8, 128], strides = [1, 1]} : vector<8x384xf32> to vector<8x128xf32>
    %82 = vector.extract_strided_slice %80 {offsets = [0, 0], sizes = [8, 128], strides = [1, 1]} : vector<8x384xf32> to vector<8x128xf32>
    %83 = arith.addf %81, %82 : vector<8x128xf32>
    %84 = arith.negf %83 : vector<8x128xf32>
    %85 = math.exp %84 : vector<8x128xf32>
    %cst_22 = arith.constant 1.000000e+00 : f32
    %86 = vector.broadcast %cst_22 : f32 to vector<8x128xf32>
    %87 = arith.addf %86, %85 : vector<8x128xf32>
    %88 = arith.divf %86, %87 : vector<8x128xf32>
    %89 = vector.extract_strided_slice %77 {offsets = [0, 128], sizes = [8, 128], strides = [1, 1]} : vector<8x384xf32> to vector<8x128xf32>
    %90 = vector.extract_strided_slice %80 {offsets = [0, 128], sizes = [8, 128], strides = [1, 1]} : vector<8x384xf32> to vector<8x128xf32>
    %91 = arith.addf %89, %90 : vector<8x128xf32>
    %92 = arith.negf %91 : vector<8x128xf32>
    %93 = math.exp %92 : vector<8x128xf32>
    %cst_23 = arith.constant 1.000000e+00 : f32
    %94 = vector.broadcast %cst_23 : f32 to vector<8x128xf32>
    %95 = arith.addf %94, %93 : vector<8x128xf32>
    %96 = arith.divf %94, %95 : vector<8x128xf32>
    %97 = vector.extract_strided_slice %77 {offsets = [0, 256], sizes = [8, 128], strides = [1, 1]} : vector<8x384xf32> to vector<8x128xf32>
    %98 = vector.extract_strided_slice %80 {offsets = [0, 256], sizes = [8, 128], strides = [1, 1]} : vector<8x384xf32> to vector<8x128xf32>
    %99 = arith.mulf %88, %98 : vector<8x128xf32>
    %100 = arith.addf %97, %99 : vector<8x128xf32>
    %101 = math.tanh %100 : vector<8x128xf32>
    %cst_24 = arith.constant 1.000000e+00 : f32
    %102 = vector.broadcast %cst_24 : f32 to vector<8x128xf32>
    %103 = arith.subf %102, %96 : vector<8x128xf32>
    %104 = arith.mulf %103, %101 : vector<8x128xf32>
    %105 = arith.mulf %96, %75 : vector<8x128xf32>
    %106 = arith.addf %104, %105 : vector<8x128xf32>
    %c2_i32 = arith.constant 2 : i32
    %107 = vector.broadcast %c2_i32 : i32 to vector<8x1xi32>
    %108 = arith.cmpi sgt, %2, %107 : vector<8x1xi32>
    %109 = vector.shape_cast %108 : vector<8x1xi1> to vector<8x1xi1>
    %110 = vector.broadcast %109 : vector<8x1xi1> to vector<8x128xi1>
    %111 = arith.select %110, %106, %75 : vector<8x128xi1>, vector<8x128xf32>
    %c3 = arith.constant 3 : index
    %c0_25 = arith.constant 0 : index
    %c0_26 = arith.constant 0 : index
    %112 = vector.load %arg0[%c3, %c0_25, %c0_26] : memref<8x8x384xf32, #tpu.memory_space<vmem>>, vector<1x8x384xf32>
    %113 = vector.shape_cast %112 : vector<1x8x384xf32> to vector<8x384xf32>
    %cst_27 = arith.constant dense<0.000000e+00> : vector<8x384xf32>
    %114 = tpu.matmul %111, %0, %cst_27 {dimension_numbers = #tpu.dot_dimension_numbers<[1], [0], [0], [1], [0, 0, 1, 1], [], []>} : vector<8x128xf32>, vector<128x384xf32>, vector<8x384xf32> -> vector<8x384xf32>
    %115 = vector.broadcast %1 : vector<1x384xf32> to vector<8x384xf32>
    %116 = arith.addf %114, %115 : vector<8x384xf32>
    %117 = vector.extract_strided_slice %113 {offsets = [0, 0], sizes = [8, 128], strides = [1, 1]} : vector<8x384xf32> to vector<8x128xf32>
    %118 = vector.extract_strided_slice %116 {offsets = [0, 0], sizes = [8, 128], strides = [1, 1]} : vector<8x384xf32> to vector<8x128xf32>
    %119 = arith.addf %117, %118 : vector<8x128xf32>
    %120 = arith.negf %119 : vector<8x128xf32>
    %121 = math.exp %120 : vector<8x128xf32>
    %cst_28 = arith.constant 1.000000e+00 : f32
    %122 = vector.broadcast %cst_28 : f32 to vector<8x128xf32>
    %123 = arith.addf %122, %121 : vector<8x128xf32>
    %124 = arith.divf %122, %123 : vector<8x128xf32>
    %125 = vector.extract_strided_slice %113 {offsets = [0, 128], sizes = [8, 128], strides = [1, 1]} : vector<8x384xf32> to vector<8x128xf32>
    %126 = vector.extract_strided_slice %116 {offsets = [0, 128], sizes = [8, 128], strides = [1, 1]} : vector<8x384xf32> to vector<8x128xf32>
    %127 = arith.addf %125, %126 : vector<8x128xf32>
    %128 = arith.negf %127 : vector<8x128xf32>
    %129 = math.exp %128 : vector<8x128xf32>
    %cst_29 = arith.constant 1.000000e+00 : f32
    %130 = vector.broadcast %cst_29 : f32 to vector<8x128xf32>
    %131 = arith.addf %130, %129 : vector<8x128xf32>
    %132 = arith.divf %130, %131 : vector<8x128xf32>
    %133 = vector.extract_strided_slice %113 {offsets = [0, 256], sizes = [8, 128], strides = [1, 1]} : vector<8x384xf32> to vector<8x128xf32>
    %134 = vector.extract_strided_slice %116 {offsets = [0, 256], sizes = [8, 128], strides = [1, 1]} : vector<8x384xf32> to vector<8x128xf32>
    %135 = arith.mulf %124, %134 : vector<8x128xf32>
    %136 = arith.addf %133, %135 : vector<8x128xf32>
    %137 = math.tanh %136 : vector<8x128xf32>
    %cst_30 = arith.constant 1.000000e+00 : f32
    %138 = vector.broadcast %cst_30 : f32 to vector<8x128xf32>
    %139 = arith.subf %138, %132 : vector<8x128xf32>
    %140 = arith.mulf %139, %137 : vector<8x128xf32>
    %141 = arith.mulf %132, %111 : vector<8x128xf32>
    %142 = arith.addf %140, %141 : vector<8x128xf32>
    %c3_i32 = arith.constant 3 : i32
    %143 = vector.broadcast %c3_i32 : i32 to vector<8x1xi32>
    %144 = arith.cmpi sgt, %2, %143 : vector<8x1xi32>
    %145 = vector.shape_cast %144 : vector<8x1xi1> to vector<8x1xi1>
    %146 = vector.broadcast %145 : vector<8x1xi1> to vector<8x128xi1>
    %147 = arith.select %146, %142, %111 : vector<8x128xi1>, vector<8x128xf32>
    %c4 = arith.constant 4 : index
    %c0_31 = arith.constant 0 : index
    %c0_32 = arith.constant 0 : index
    %148 = vector.load %arg0[%c4, %c0_31, %c0_32] : memref<8x8x384xf32, #tpu.memory_space<vmem>>, vector<1x8x384xf32>
    %149 = vector.shape_cast %148 : vector<1x8x384xf32> to vector<8x384xf32>
    %cst_33 = arith.constant dense<0.000000e+00> : vector<8x384xf32>
    %150 = tpu.matmul %147, %0, %cst_33 {dimension_numbers = #tpu.dot_dimension_numbers<[1], [0], [0], [1], [0, 0, 1, 1], [], []>} : vector<8x128xf32>, vector<128x384xf32>, vector<8x384xf32> -> vector<8x384xf32>
    %151 = vector.broadcast %1 : vector<1x384xf32> to vector<8x384xf32>
    %152 = arith.addf %150, %151 : vector<8x384xf32>
    %153 = vector.extract_strided_slice %149 {offsets = [0, 0], sizes = [8, 128], strides = [1, 1]} : vector<8x384xf32> to vector<8x128xf32>
    %154 = vector.extract_strided_slice %152 {offsets = [0, 0], sizes = [8, 128], strides = [1, 1]} : vector<8x384xf32> to vector<8x128xf32>
    %155 = arith.addf %153, %154 : vector<8x128xf32>
    %156 = arith.negf %155 : vector<8x128xf32>
    %157 = math.exp %156 : vector<8x128xf32>
    %cst_34 = arith.constant 1.000000e+00 : f32
    %158 = vector.broadcast %cst_34 : f32 to vector<8x128xf32>
    %159 = arith.addf %158, %157 : vector<8x128xf32>
    %160 = arith.divf %158, %159 : vector<8x128xf32>
    %161 = vector.extract_strided_slice %149 {offsets = [0, 128], sizes = [8, 128], strides = [1, 1]} : vector<8x384xf32> to vector<8x128xf32>
    %162 = vector.extract_strided_slice %152 {offsets = [0, 128], sizes = [8, 128], strides = [1, 1]} : vector<8x384xf32> to vector<8x128xf32>
    %163 = arith.addf %161, %162 : vector<8x128xf32>
    %164 = arith.negf %163 : vector<8x128xf32>
    %165 = math.exp %164 : vector<8x128xf32>
    %cst_35 = arith.constant 1.000000e+00 : f32
    %166 = vector.broadcast %cst_35 : f32 to vector<8x128xf32>
    %167 = arith.addf %166, %165 : vector<8x128xf32>
    %168 = arith.divf %166, %167 : vector<8x128xf32>
    %169 = vector.extract_strided_slice %149 {offsets = [0, 256], sizes = [8, 128], strides = [1, 1]} : vector<8x384xf32> to vector<8x128xf32>
    %170 = vector.extract_strided_slice %152 {offsets = [0, 256], sizes = [8, 128], strides = [1, 1]} : vector<8x384xf32> to vector<8x128xf32>
    %171 = arith.mulf %160, %170 : vector<8x128xf32>
    %172 = arith.addf %169, %171 : vector<8x128xf32>
    %173 = math.tanh %172 : vector<8x128xf32>
    %cst_36 = arith.constant 1.000000e+00 : f32
    %174 = vector.broadcast %cst_36 : f32 to vector<8x128xf32>
    %175 = arith.subf %174, %168 : vector<8x128xf32>
    %176 = arith.mulf %175, %173 : vector<8x128xf32>
    %177 = arith.mulf %168, %147 : vector<8x128xf32>
    %178 = arith.addf %176, %177 : vector<8x128xf32>
    %c4_i32 = arith.constant 4 : i32
    %179 = vector.broadcast %c4_i32 : i32 to vector<8x1xi32>
    %180 = arith.cmpi sgt, %2, %179 : vector<8x1xi32>
    %181 = vector.shape_cast %180 : vector<8x1xi1> to vector<8x1xi1>
    %182 = vector.broadcast %181 : vector<8x1xi1> to vector<8x128xi1>
    %183 = arith.select %182, %178, %147 : vector<8x128xi1>, vector<8x128xf32>
    %c5 = arith.constant 5 : index
    %c0_37 = arith.constant 0 : index
    %c0_38 = arith.constant 0 : index
    %184 = vector.load %arg0[%c5, %c0_37, %c0_38] : memref<8x8x384xf32, #tpu.memory_space<vmem>>, vector<1x8x384xf32>
    %185 = vector.shape_cast %184 : vector<1x8x384xf32> to vector<8x384xf32>
    %cst_39 = arith.constant dense<0.000000e+00> : vector<8x384xf32>
    %186 = tpu.matmul %183, %0, %cst_39 {dimension_numbers = #tpu.dot_dimension_numbers<[1], [0], [0], [1], [0, 0, 1, 1], [], []>} : vector<8x128xf32>, vector<128x384xf32>, vector<8x384xf32> -> vector<8x384xf32>
    %187 = vector.broadcast %1 : vector<1x384xf32> to vector<8x384xf32>
    %188 = arith.addf %186, %187 : vector<8x384xf32>
    %189 = vector.extract_strided_slice %185 {offsets = [0, 0], sizes = [8, 128], strides = [1, 1]} : vector<8x384xf32> to vector<8x128xf32>
    %190 = vector.extract_strided_slice %188 {offsets = [0, 0], sizes = [8, 128], strides = [1, 1]} : vector<8x384xf32> to vector<8x128xf32>
    %191 = arith.addf %189, %190 : vector<8x128xf32>
    %192 = arith.negf %191 : vector<8x128xf32>
    %193 = math.exp %192 : vector<8x128xf32>
    %cst_40 = arith.constant 1.000000e+00 : f32
    %194 = vector.broadcast %cst_40 : f32 to vector<8x128xf32>
    %195 = arith.addf %194, %193 : vector<8x128xf32>
    %196 = arith.divf %194, %195 : vector<8x128xf32>
    %197 = vector.extract_strided_slice %185 {offsets = [0, 128], sizes = [8, 128], strides = [1, 1]} : vector<8x384xf32> to vector<8x128xf32>
    %198 = vector.extract_strided_slice %188 {offsets = [0, 128], sizes = [8, 128], strides = [1, 1]} : vector<8x384xf32> to vector<8x128xf32>
    %199 = arith.addf %197, %198 : vector<8x128xf32>
    %200 = arith.negf %199 : vector<8x128xf32>
    %201 = math.exp %200 : vector<8x128xf32>
    %cst_41 = arith.constant 1.000000e+00 : f32
    %202 = vector.broadcast %cst_41 : f32 to vector<8x128xf32>
    %203 = arith.addf %202, %201 : vector<8x128xf32>
    %204 = arith.divf %202, %203 : vector<8x128xf32>
    %205 = vector.extract_strided_slice %185 {offsets = [0, 256], sizes = [8, 128], strides = [1, 1]} : vector<8x384xf32> to vector<8x128xf32>
    %206 = vector.extract_strided_slice %188 {offsets = [0, 256], sizes = [8, 128], strides = [1, 1]} : vector<8x384xf32> to vector<8x128xf32>
    %207 = arith.mulf %196, %206 : vector<8x128xf32>
    %208 = arith.addf %205, %207 : vector<8x128xf32>
    %209 = math.tanh %208 : vector<8x128xf32>
    %cst_42 = arith.constant 1.000000e+00 : f32
    %210 = vector.broadcast %cst_42 : f32 to vector<8x128xf32>
    %211 = arith.subf %210, %204 : vector<8x128xf32>
    %212 = arith.mulf %211, %209 : vector<8x128xf32>
    %213 = arith.mulf %204, %183 : vector<8x128xf32>
    %214 = arith.addf %212, %213 : vector<8x128xf32>
    %c5_i32 = arith.constant 5 : i32
    %215 = vector.broadcast %c5_i32 : i32 to vector<8x1xi32>
    %216 = arith.cmpi sgt, %2, %215 : vector<8x1xi32>
    %217 = vector.shape_cast %216 : vector<8x1xi1> to vector<8x1xi1>
    %218 = vector.broadcast %217 : vector<8x1xi1> to vector<8x128xi1>
    %219 = arith.select %218, %214, %183 : vector<8x128xi1>, vector<8x128xf32>
    %c6 = arith.constant 6 : index
    %c0_43 = arith.constant 0 : index
    %c0_44 = arith.constant 0 : index
    %220 = vector.load %arg0[%c6, %c0_43, %c0_44] : memref<8x8x384xf32, #tpu.memory_space<vmem>>, vector<1x8x384xf32>
    %221 = vector.shape_cast %220 : vector<1x8x384xf32> to vector<8x384xf32>
    %cst_45 = arith.constant dense<0.000000e+00> : vector<8x384xf32>
    %222 = tpu.matmul %219, %0, %cst_45 {dimension_numbers = #tpu.dot_dimension_numbers<[1], [0], [0], [1], [0, 0, 1, 1], [], []>} : vector<8x128xf32>, vector<128x384xf32>, vector<8x384xf32> -> vector<8x384xf32>
    %223 = vector.broadcast %1 : vector<1x384xf32> to vector<8x384xf32>
    %224 = arith.addf %222, %223 : vector<8x384xf32>
    %225 = vector.extract_strided_slice %221 {offsets = [0, 0], sizes = [8, 128], strides = [1, 1]} : vector<8x384xf32> to vector<8x128xf32>
    %226 = vector.extract_strided_slice %224 {offsets = [0, 0], sizes = [8, 128], strides = [1, 1]} : vector<8x384xf32> to vector<8x128xf32>
    %227 = arith.addf %225, %226 : vector<8x128xf32>
    %228 = arith.negf %227 : vector<8x128xf32>
    %229 = math.exp %228 : vector<8x128xf32>
    %cst_46 = arith.constant 1.000000e+00 : f32
    %230 = vector.broadcast %cst_46 : f32 to vector<8x128xf32>
    %231 = arith.addf %230, %229 : vector<8x128xf32>
    %232 = arith.divf %230, %231 : vector<8x128xf32>
    %233 = vector.extract_strided_slice %221 {offsets = [0, 128], sizes = [8, 128], strides = [1, 1]} : vector<8x384xf32> to vector<8x128xf32>
    %234 = vector.extract_strided_slice %224 {offsets = [0, 128], sizes = [8, 128], strides = [1, 1]} : vector<8x384xf32> to vector<8x128xf32>
    %235 = arith.addf %233, %234 : vector<8x128xf32>
    %236 = arith.negf %235 : vector<8x128xf32>
    %237 = math.exp %236 : vector<8x128xf32>
    %cst_47 = arith.constant 1.000000e+00 : f32
    %238 = vector.broadcast %cst_47 : f32 to vector<8x128xf32>
    %239 = arith.addf %238, %237 : vector<8x128xf32>
    %240 = arith.divf %238, %239 : vector<8x128xf32>
    %241 = vector.extract_strided_slice %221 {offsets = [0, 256], sizes = [8, 128], strides = [1, 1]} : vector<8x384xf32> to vector<8x128xf32>
    %242 = vector.extract_strided_slice %224 {offsets = [0, 256], sizes = [8, 128], strides = [1, 1]} : vector<8x384xf32> to vector<8x128xf32>
    %243 = arith.mulf %232, %242 : vector<8x128xf32>
    %244 = arith.addf %241, %243 : vector<8x128xf32>
    %245 = math.tanh %244 : vector<8x128xf32>
    %cst_48 = arith.constant 1.000000e+00 : f32
    %246 = vector.broadcast %cst_48 : f32 to vector<8x128xf32>
    %247 = arith.subf %246, %240 : vector<8x128xf32>
    %248 = arith.mulf %247, %245 : vector<8x128xf32>
    %249 = arith.mulf %240, %219 : vector<8x128xf32>
    %250 = arith.addf %248, %249 : vector<8x128xf32>
    %c6_i32 = arith.constant 6 : i32
    %251 = vector.broadcast %c6_i32 : i32 to vector<8x1xi32>
    %252 = arith.cmpi sgt, %2, %251 : vector<8x1xi32>
    %253 = vector.shape_cast %252 : vector<8x1xi1> to vector<8x1xi1>
    %254 = vector.broadcast %253 : vector<8x1xi1> to vector<8x128xi1>
    %255 = arith.select %254, %250, %219 : vector<8x128xi1>, vector<8x128xf32>
    %c7 = arith.constant 7 : index
    %c0_49 = arith.constant 0 : index
    %c0_50 = arith.constant 0 : index
    %256 = vector.load %arg0[%c7, %c0_49, %c0_50] : memref<8x8x384xf32, #tpu.memory_space<vmem>>, vector<1x8x384xf32>
    %257 = vector.shape_cast %256 : vector<1x8x384xf32> to vector<8x384xf32>
    %cst_51 = arith.constant dense<0.000000e+00> : vector<8x384xf32>
    %258 = tpu.matmul %255, %0, %cst_51 {dimension_numbers = #tpu.dot_dimension_numbers<[1], [0], [0], [1], [0, 0, 1, 1], [], []>} : vector<8x128xf32>, vector<128x384xf32>, vector<8x384xf32> -> vector<8x384xf32>
    %259 = vector.broadcast %1 : vector<1x384xf32> to vector<8x384xf32>
    %260 = arith.addf %258, %259 : vector<8x384xf32>
    %261 = vector.extract_strided_slice %257 {offsets = [0, 0], sizes = [8, 128], strides = [1, 1]} : vector<8x384xf32> to vector<8x128xf32>
    %262 = vector.extract_strided_slice %260 {offsets = [0, 0], sizes = [8, 128], strides = [1, 1]} : vector<8x384xf32> to vector<8x128xf32>
    %263 = arith.addf %261, %262 : vector<8x128xf32>
    %264 = arith.negf %263 : vector<8x128xf32>
    %265 = math.exp %264 : vector<8x128xf32>
    %cst_52 = arith.constant 1.000000e+00 : f32
    %266 = vector.broadcast %cst_52 : f32 to vector<8x128xf32>
    %267 = arith.addf %266, %265 : vector<8x128xf32>
    %268 = arith.divf %266, %267 : vector<8x128xf32>
    %269 = vector.extract_strided_slice %257 {offsets = [0, 128], sizes = [8, 128], strides = [1, 1]} : vector<8x384xf32> to vector<8x128xf32>
    %270 = vector.extract_strided_slice %260 {offsets = [0, 128], sizes = [8, 128], strides = [1, 1]} : vector<8x384xf32> to vector<8x128xf32>
    %271 = arith.addf %269, %270 : vector<8x128xf32>
    %272 = arith.negf %271 : vector<8x128xf32>
    %273 = math.exp %272 : vector<8x128xf32>
    %cst_53 = arith.constant 1.000000e+00 : f32
    %274 = vector.broadcast %cst_53 : f32 to vector<8x128xf32>
    %275 = arith.addf %274, %273 : vector<8x128xf32>
    %276 = arith.divf %274, %275 : vector<8x128xf32>
    %277 = vector.extract_strided_slice %257 {offsets = [0, 256], sizes = [8, 128], strides = [1, 1]} : vector<8x384xf32> to vector<8x128xf32>
    %278 = vector.extract_strided_slice %260 {offsets = [0, 256], sizes = [8, 128], strides = [1, 1]} : vector<8x384xf32> to vector<8x128xf32>
    %279 = arith.mulf %268, %278 : vector<8x128xf32>
    %280 = arith.addf %277, %279 : vector<8x128xf32>
    %281 = math.tanh %280 : vector<8x128xf32>
    %cst_54 = arith.constant 1.000000e+00 : f32
    %282 = vector.broadcast %cst_54 : f32 to vector<8x128xf32>
    %283 = arith.subf %282, %276 : vector<8x128xf32>
    %284 = arith.mulf %283, %281 : vector<8x128xf32>
    %285 = arith.mulf %276, %255 : vector<8x128xf32>
    %286 = arith.addf %284, %285 : vector<8x128xf32>
    %c7_i32 = arith.constant 7 : i32
    %287 = vector.broadcast %c7_i32 : i32 to vector<8x1xi32>
    %288 = arith.cmpi sgt, %2, %287 : vector<8x1xi32>
    %289 = vector.shape_cast %288 : vector<8x1xi1> to vector<8x1xi1>
    %290 = vector.broadcast %289 : vector<8x1xi1> to vector<8x128xi1>
    %291 = arith.select %290, %286, %255 : vector<8x128xi1>, vector<8x128xf32>
    %c0_55 = arith.constant 0 : index
    %c0_56 = arith.constant 0 : index
    %292 = vector.load %arg5[%c0_55, %c0_56] : memref<8x128xf32, #tpu.memory_space<vmem>>, vector<8x128xf32>
    tpu.vector_store %arg5[%c0_55, %c0_56], %291 {strides = array<i32>} : memref<8x128xf32, #tpu.memory_space<vmem>>, vector<8x128xf32>,
    return
  }
}

module attributes {stable_mosaic.version = 11 : i64} {
  func.func @latent_kernel(%arg0: memref<8x128xf32, #tpu.memory_space<vmem>>, %arg1: memref<128x32xf32, #tpu.memory_space<vmem>>, %arg2: memref<1x32xf32, #tpu.memory_space<vmem>>, %arg3: memref<128x32xf32, #tpu.memory_space<vmem>>, %arg4: memref<1x32xf32, #tpu.memory_space<vmem>>, %arg5: memref<32x128xf32, #tpu.memory_space<vmem>>, %arg6: memref<1x128xf32, #tpu.memory_space<vmem>>, %arg7: memref<8x32xf32, #tpu.memory_space<vmem>>, %arg8: memref<8x32xf32, #tpu.memory_space<vmem>>, %arg9: memref<8x32xf32, #tpu.memory_space<vmem>>, %arg10: memref<8x32xf32, #tpu.memory_space<vmem>>, %arg11: memref<8x128xf32, #tpu.memory_space<vmem>>) attributes {dimension_semantics = [], scalar_prefetch = 0 : i64, scratch_operands = 0 : i64, tpu.core_type = #tpu.core_type<tc>} {
    %c0 = arith.constant 0 : index
    %c0_0 = arith.constant 0 : index
    %0 = vector.load %arg0[%c0, %c0_0] : memref<8x128xf32, #tpu.memory_space<vmem>>, vector<8x128xf32>
    %c0_1 = arith.constant 0 : index
    %c0_2 = arith.constant 0 : index
    %1 = vector.load %arg1[%c0_1, %c0_2] : memref<128x32xf32, #tpu.memory_space<vmem>>, vector<128x32xf32>
    %cst = arith.constant dense<0.000000e+00> : vector<8x32xf32>
    %2 = tpu.matmul %0, %1, %cst {dimension_numbers = #tpu.dot_dimension_numbers<[1], [0], [0], [1], [0, 0, 1, 1], [], []>} : vector<8x128xf32>, vector<128x32xf32>, vector<8x32xf32> -> vector<8x32xf32>
    %c0_3 = arith.constant 0 : index
    %c0_4 = arith.constant 0 : index
    %3 = vector.load %arg2[%c0_3, %c0_4] : memref<1x32xf32, #tpu.memory_space<vmem>>, vector<1x32xf32>
    %4 = vector.broadcast %3 : vector<1x32xf32> to vector<8x32xf32>
    %5 = arith.addf %2, %4 : vector<8x32xf32>
    %c0_5 = arith.constant 0 : index
    %c0_6 = arith.constant 0 : index
    %6 = vector.load %arg3[%c0_5, %c0_6] : memref<128x32xf32, #tpu.memory_space<vmem>>, vector<128x32xf32>
    %cst_7 = arith.constant dense<0.000000e+00> : vector<8x32xf32>
    %7 = tpu.matmul %0, %6, %cst_7 {dimension_numbers = #tpu.dot_dimension_numbers<[1], [0], [0], [1], [0, 0, 1, 1], [], []>} : vector<8x128xf32>, vector<128x32xf32>, vector<8x32xf32> -> vector<8x32xf32>
    %c0_8 = arith.constant 0 : index
    %c0_9 = arith.constant 0 : index
    %8 = vector.load %arg4[%c0_8, %c0_9] : memref<1x32xf32, #tpu.memory_space<vmem>>, vector<1x32xf32>
    %9 = vector.broadcast %8 : vector<1x32xf32> to vector<8x32xf32>
    %10 = arith.addf %7, %9 : vector<8x32xf32>
    %c0_10 = arith.constant 0 : index
    %c0_11 = arith.constant 0 : index
    %11 = vector.load %arg7[%c0_10, %c0_11] : memref<8x32xf32, #tpu.memory_space<vmem>>, vector<8x32xf32>
    %cst_12 = arith.constant 5.000000e-01 : f32
    %12 = vector.broadcast %cst_12 : f32 to vector<8x32xf32>
    %13 = arith.mulf %12, %10 : vector<8x32xf32>
    %14 = math.exp %13 : vector<8x32xf32>
    %15 = arith.mulf %11, %14 : vector<8x32xf32>
    %16 = arith.addf %15, %5 : vector<8x32xf32>
    %c0_13 = arith.constant 0 : index
    %c0_14 = arith.constant 0 : index
    %17 = vector.load %arg8[%c0_13, %c0_14] : memref<8x32xf32, #tpu.memory_space<vmem>>, vector<8x32xf32>
    tpu.vector_store %arg8[%c0_13, %c0_14], %5 {strides = array<i32>} : memref<8x32xf32, #tpu.memory_space<vmem>>, vector<8x32xf32>,
    %c0_15 = arith.constant 0 : index
    %c0_16 = arith.constant 0 : index
    %18 = vector.load %arg9[%c0_15, %c0_16] : memref<8x32xf32, #tpu.memory_space<vmem>>, vector<8x32xf32>
    tpu.vector_store %arg9[%c0_15, %c0_16], %10 {strides = array<i32>} : memref<8x32xf32, #tpu.memory_space<vmem>>, vector<8x32xf32>,
    %c0_17 = arith.constant 0 : index
    %c0_18 = arith.constant 0 : index
    %19 = vector.load %arg10[%c0_17, %c0_18] : memref<8x32xf32, #tpu.memory_space<vmem>>, vector<8x32xf32>
    tpu.vector_store %arg10[%c0_17, %c0_18], %16 {strides = array<i32>} : memref<8x32xf32, #tpu.memory_space<vmem>>, vector<8x32xf32>,
    %c0_19 = arith.constant 0 : index
    %c0_20 = arith.constant 0 : index
    %20 = vector.load %arg5[%c0_19, %c0_20] : memref<32x128xf32, #tpu.memory_space<vmem>>, vector<32x128xf32>
    %cst_21 = arith.constant dense<0.000000e+00> : vector<8x128xf32>
    %21 = tpu.matmul %16, %20, %cst_21 {dimension_numbers = #tpu.dot_dimension_numbers<[1], [0], [0], [1], [0, 0, 1, 1], [], []>} : vector<8x32xf32>, vector<32x128xf32>, vector<8x128xf32> -> vector<8x128xf32>
    %c0_22 = arith.constant 0 : index
    %c0_23 = arith.constant 0 : index
    %22 = vector.load %arg6[%c0_22, %c0_23] : memref<1x128xf32, #tpu.memory_space<vmem>>, vector<1x128xf32>
    %23 = vector.broadcast %22 : vector<1x128xf32> to vector<8x128xf32>
    %24 = arith.addf %21, %23 : vector<8x128xf32>
    %c0_24 = arith.constant 0 : index
    %c0_25 = arith.constant 0 : index
    %25 = vector.load %arg11[%c0_24, %c0_25] : memref<8x128xf32, #tpu.memory_space<vmem>>, vector<8x128xf32>
    tpu.vector_store %arg11[%c0_24, %c0_25], %24 {strides = array<i32>} : memref<8x128xf32, #tpu.memory_space<vmem>>, vector<8x128xf32>,
    return
  }
}

module attributes {stable_mosaic.version = 11 : i64} {
  func.func @gru_seq_kernel(%arg0: memref<8x8x384xf32, #tpu.memory_space<vmem>>, %arg1: memref<8x1xi32, #tpu.memory_space<vmem>>, %arg2: memref<8x128xf32, #tpu.memory_space<vmem>>, %arg3: memref<128x384xf32, #tpu.memory_space<vmem>>, %arg4: memref<1x384xf32, #tpu.memory_space<vmem>>, %arg5: memref<8x128xf32, #tpu.memory_space<vmem>>, %arg6: memref<8x8x128xf32, #tpu.memory_space<vmem>>) attributes {dimension_semantics = [], scalar_prefetch = 0 : i64, scratch_operands = 0 : i64, tpu.core_type = #tpu.core_type<tc>} {
    %c0 = arith.constant 0 : index
    %c0_0 = arith.constant 0 : index
    %0 = vector.load %arg3[%c0, %c0_0] : memref<128x384xf32, #tpu.memory_space<vmem>>, vector<128x384xf32>
    %c0_1 = arith.constant 0 : index
    %c0_2 = arith.constant 0 : index
    %1 = vector.load %arg4[%c0_1, %c0_2] : memref<1x384xf32, #tpu.memory_space<vmem>>, vector<1x384xf32>
    %c0_3 = arith.constant 0 : index
    %c0_4 = arith.constant 0 : index
    %2 = vector.load %arg1[%c0_3, %c0_4] : memref<8x1xi32, #tpu.memory_space<vmem>>, vector<8x1xi32>
    %c0_5 = arith.constant 0 : index
    %c0_6 = arith.constant 0 : index
    %3 = vector.load %arg2[%c0_5, %c0_6] : memref<8x128xf32, #tpu.memory_space<vmem>>, vector<8x128xf32>
    %c0_7 = arith.constant 0 : index
    %c0_8 = arith.constant 0 : index
    %c0_9 = arith.constant 0 : index
    %4 = vector.load %arg0[%c0_7, %c0_8, %c0_9] : memref<8x8x384xf32, #tpu.memory_space<vmem>>, vector<1x8x384xf32>
    %5 = vector.shape_cast %4 : vector<1x8x384xf32> to vector<8x384xf32>
    %cst = arith.constant dense<0.000000e+00> : vector<8x384xf32>
    %6 = tpu.matmul %3, %0, %cst {dimension_numbers = #tpu.dot_dimension_numbers<[1], [0], [0], [1], [0, 0, 1, 1], [], []>} : vector<8x128xf32>, vector<128x384xf32>, vector<8x384xf32> -> vector<8x384xf32>
    %7 = vector.broadcast %1 : vector<1x384xf32> to vector<8x384xf32>
    %8 = arith.addf %6, %7 : vector<8x384xf32>
    %9 = vector.extract_strided_slice %5 {offsets = [0, 0], sizes = [8, 128], strides = [1, 1]} : vector<8x384xf32> to vector<8x128xf32>
    %10 = vector.extract_strided_slice %8 {offsets = [0, 0], sizes = [8, 128], strides = [1, 1]} : vector<8x384xf32> to vector<8x128xf32>
    %11 = arith.addf %9, %10 : vector<8x128xf32>
    %12 = arith.negf %11 : vector<8x128xf32>
    %13 = math.exp %12 : vector<8x128xf32>
    %cst_10 = arith.constant 1.000000e+00 : f32
    %14 = vector.broadcast %cst_10 : f32 to vector<8x128xf32>
    %15 = arith.addf %14, %13 : vector<8x128xf32>
    %16 = arith.divf %14, %15 : vector<8x128xf32>
    %17 = vector.extract_strided_slice %5 {offsets = [0, 128], sizes = [8, 128], strides = [1, 1]} : vector<8x384xf32> to vector<8x128xf32>
    %18 = vector.extract_strided_slice %8 {offsets = [0, 128], sizes = [8, 128], strides = [1, 1]} : vector<8x384xf32> to vector<8x128xf32>
    %19 = arith.addf %17, %18 : vector<8x128xf32>
    %20 = arith.negf %19 : vector<8x128xf32>
    %21 = math.exp %20 : vector<8x128xf32>
    %cst_11 = arith.constant 1.000000e+00 : f32
    %22 = vector.broadcast %cst_11 : f32 to vector<8x128xf32>
    %23 = arith.addf %22, %21 : vector<8x128xf32>
    %24 = arith.divf %22, %23 : vector<8x128xf32>
    %25 = vector.extract_strided_slice %5 {offsets = [0, 256], sizes = [8, 128], strides = [1, 1]} : vector<8x384xf32> to vector<8x128xf32>
    %26 = vector.extract_strided_slice %8 {offsets = [0, 256], sizes = [8, 128], strides = [1, 1]} : vector<8x384xf32> to vector<8x128xf32>
    %27 = arith.mulf %16, %26 : vector<8x128xf32>
    %28 = arith.addf %25, %27 : vector<8x128xf32>
    %29 = math.tanh %28 : vector<8x128xf32>
    %cst_12 = arith.constant 1.000000e+00 : f32
    %30 = vector.broadcast %cst_12 : f32 to vector<8x128xf32>
    %31 = arith.subf %30, %24 : vector<8x128xf32>
    %32 = arith.mulf %31, %29 : vector<8x128xf32>
    %33 = arith.mulf %24, %3 : vector<8x128xf32>
    %34 = arith.addf %32, %33 : vector<8x128xf32>
    %c0_i32 = arith.constant 0 : i32
    %35 = vector.broadcast %c0_i32 : i32 to vector<8x1xi32>
    %36 = arith.cmpi sgt, %2, %35 : vector<8x1xi32>
    %cst_13 = arith.constant 0.000000e+00 : f32
    %37 = vector.broadcast %cst_13 : f32 to vector<8x128xf32>
    %38 = vector.shape_cast %36 : vector<8x1xi1> to vector<8x1xi1>
    %39 = vector.broadcast %38 : vector<8x1xi1> to vector<8x128xi1>
    %40 = arith.select %39, %34, %37 : vector<8x128xi1>, vector<8x128xf32>
    %c0_14 = arith.constant 0 : index
    %c0_15 = arith.constant 0 : index
    %c0_16 = arith.constant 0 : index
    %41 = vector.load %arg6[%c0_14, %c0_15, %c0_16] : memref<8x8x128xf32, #tpu.memory_space<vmem>>, vector<1x8x128xf32>
    %42 = vector.shape_cast %41 : vector<1x8x128xf32> to vector<8x128xf32>
    %43 = vector.shape_cast %40 : vector<8x128xf32> to vector<1x8x128xf32>
    tpu.vector_store %arg6[%c0_14, %c0_15, %c0_16], %43 {strides = array<i32>} : memref<8x8x128xf32, #tpu.memory_space<vmem>>, vector<1x8x128xf32>,
    %44 = vector.shape_cast %36 : vector<8x1xi1> to vector<8x1xi1>
    %45 = vector.broadcast %44 : vector<8x1xi1> to vector<8x128xi1>
    %46 = arith.select %45, %34, %3 : vector<8x128xi1>, vector<8x128xf32>
    %c1 = arith.constant 1 : index
    %c0_17 = arith.constant 0 : index
    %c0_18 = arith.constant 0 : index
    %47 = vector.load %arg0[%c1, %c0_17, %c0_18] : memref<8x8x384xf32, #tpu.memory_space<vmem>>, vector<1x8x384xf32>
    %48 = vector.shape_cast %47 : vector<1x8x384xf32> to vector<8x384xf32>
    %cst_19 = arith.constant dense<0.000000e+00> : vector<8x384xf32>
    %49 = tpu.matmul %46, %0, %cst_19 {dimension_numbers = #tpu.dot_dimension_numbers<[1], [0], [0], [1], [0, 0, 1, 1], [], []>} : vector<8x128xf32>, vector<128x384xf32>, vector<8x384xf32> -> vector<8x384xf32>
    %50 = vector.broadcast %1 : vector<1x384xf32> to vector<8x384xf32>
    %51 = arith.addf %49, %50 : vector<8x384xf32>
    %52 = vector.extract_strided_slice %48 {offsets = [0, 0], sizes = [8, 128], strides = [1, 1]} : vector<8x384xf32> to vector<8x128xf32>
    %53 = vector.extract_strided_slice %51 {offsets = [0, 0], sizes = [8, 128], strides = [1, 1]} : vector<8x384xf32> to vector<8x128xf32>
    %54 = arith.addf %52, %53 : vector<8x128xf32>
    %55 = arith.negf %54 : vector<8x128xf32>
    %56 = math.exp %55 : vector<8x128xf32>
    %cst_20 = arith.constant 1.000000e+00 : f32
    %57 = vector.broadcast %cst_20 : f32 to vector<8x128xf32>
    %58 = arith.addf %57, %56 : vector<8x128xf32>
    %59 = arith.divf %57, %58 : vector<8x128xf32>
    %60 = vector.extract_strided_slice %48 {offsets = [0, 128], sizes = [8, 128], strides = [1, 1]} : vector<8x384xf32> to vector<8x128xf32>
    %61 = vector.extract_strided_slice %51 {offsets = [0, 128], sizes = [8, 128], strides = [1, 1]} : vector<8x384xf32> to vector<8x128xf32>
    %62 = arith.addf %60, %61 : vector<8x128xf32>
    %63 = arith.negf %62 : vector<8x128xf32>
    %64 = math.exp %63 : vector<8x128xf32>
    %cst_21 = arith.constant 1.000000e+00 : f32
    %65 = vector.broadcast %cst_21 : f32 to vector<8x128xf32>
    %66 = arith.addf %65, %64 : vector<8x128xf32>
    %67 = arith.divf %65, %66 : vector<8x128xf32>
    %68 = vector.extract_strided_slice %48 {offsets = [0, 256], sizes = [8, 128], strides = [1, 1]} : vector<8x384xf32> to vector<8x128xf32>
    %69 = vector.extract_strided_slice %51 {offsets = [0, 256], sizes = [8, 128], strides = [1, 1]} : vector<8x384xf32> to vector<8x128xf32>
    %70 = arith.mulf %59, %69 : vector<8x128xf32>
    %71 = arith.addf %68, %70 : vector<8x128xf32>
    %72 = math.tanh %71 : vector<8x128xf32>
    %cst_22 = arith.constant 1.000000e+00 : f32
    %73 = vector.broadcast %cst_22 : f32 to vector<8x128xf32>
    %74 = arith.subf %73, %67 : vector<8x128xf32>
    %75 = arith.mulf %74, %72 : vector<8x128xf32>
    %76 = arith.mulf %67, %46 : vector<8x128xf32>
    %77 = arith.addf %75, %76 : vector<8x128xf32>
    %c1_i32 = arith.constant 1 : i32
    %78 = vector.broadcast %c1_i32 : i32 to vector<8x1xi32>
    %79 = arith.cmpi sgt, %2, %78 : vector<8x1xi32>
    %cst_23 = arith.constant 0.000000e+00 : f32
    %80 = vector.broadcast %cst_23 : f32 to vector<8x128xf32>
    %81 = vector.shape_cast %79 : vector<8x1xi1> to vector<8x1xi1>
    %82 = vector.broadcast %81 : vector<8x1xi1> to vector<8x128xi1>
    %83 = arith.select %82, %77, %80 : vector<8x128xi1>, vector<8x128xf32>
    %c1_24 = arith.constant 1 : index
    %c0_25 = arith.constant 0 : index
    %c0_26 = arith.constant 0 : index
    %84 = vector.load %arg6[%c1_24, %c0_25, %c0_26] : memref<8x8x128xf32, #tpu.memory_space<vmem>>, vector<1x8x128xf32>
    %85 = vector.shape_cast %84 : vector<1x8x128xf32> to vector<8x128xf32>
    %86 = vector.shape_cast %83 : vector<8x128xf32> to vector<1x8x128xf32>
    tpu.vector_store %arg6[%c1_24, %c0_25, %c0_26], %86 {strides = array<i32>} : memref<8x8x128xf32, #tpu.memory_space<vmem>>, vector<1x8x128xf32>,
    %87 = vector.shape_cast %79 : vector<8x1xi1> to vector<8x1xi1>
    %88 = vector.broadcast %87 : vector<8x1xi1> to vector<8x128xi1>
    %89 = arith.select %88, %77, %46 : vector<8x128xi1>, vector<8x128xf32>
    %c2 = arith.constant 2 : index
    %c0_27 = arith.constant 0 : index
    %c0_28 = arith.constant 0 : index
    %90 = vector.load %arg0[%c2, %c0_27, %c0_28] : memref<8x8x384xf32, #tpu.memory_space<vmem>>, vector<1x8x384xf32>
    %91 = vector.shape_cast %90 : vector<1x8x384xf32> to vector<8x384xf32>
    %cst_29 = arith.constant dense<0.000000e+00> : vector<8x384xf32>
    %92 = tpu.matmul %89, %0, %cst_29 {dimension_numbers = #tpu.dot_dimension_numbers<[1], [0], [0], [1], [0, 0, 1, 1], [], []>} : vector<8x128xf32>, vector<128x384xf32>, vector<8x384xf32> -> vector<8x384xf32>
    %93 = vector.broadcast %1 : vector<1x384xf32> to vector<8x384xf32>
    %94 = arith.addf %92, %93 : vector<8x384xf32>
    %95 = vector.extract_strided_slice %91 {offsets = [0, 0], sizes = [8, 128], strides = [1, 1]} : vector<8x384xf32> to vector<8x128xf32>
    %96 = vector.extract_strided_slice %94 {offsets = [0, 0], sizes = [8, 128], strides = [1, 1]} : vector<8x384xf32> to vector<8x128xf32>
    %97 = arith.addf %95, %96 : vector<8x128xf32>
    %98 = arith.negf %97 : vector<8x128xf32>
    %99 = math.exp %98 : vector<8x128xf32>
    %cst_30 = arith.constant 1.000000e+00 : f32
    %100 = vector.broadcast %cst_30 : f32 to vector<8x128xf32>
    %101 = arith.addf %100, %99 : vector<8x128xf32>
    %102 = arith.divf %100, %101 : vector<8x128xf32>
    %103 = vector.extract_strided_slice %91 {offsets = [0, 128], sizes = [8, 128], strides = [1, 1]} : vector<8x384xf32> to vector<8x128xf32>
    %104 = vector.extract_strided_slice %94 {offsets = [0, 128], sizes = [8, 128], strides = [1, 1]} : vector<8x384xf32> to vector<8x128xf32>
    %105 = arith.addf %103, %104 : vector<8x128xf32>
    %106 = arith.negf %105 : vector<8x128xf32>
    %107 = math.exp %106 : vector<8x128xf32>
    %cst_31 = arith.constant 1.000000e+00 : f32
    %108 = vector.broadcast %cst_31 : f32 to vector<8x128xf32>
    %109 = arith.addf %108, %107 : vector<8x128xf32>
    %110 = arith.divf %108, %109 : vector<8x128xf32>
    %111 = vector.extract_strided_slice %91 {offsets = [0, 256], sizes = [8, 128], strides = [1, 1]} : vector<8x384xf32> to vector<8x128xf32>
    %112 = vector.extract_strided_slice %94 {offsets = [0, 256], sizes = [8, 128], strides = [1, 1]} : vector<8x384xf32> to vector<8x128xf32>
    %113 = arith.mulf %102, %112 : vector<8x128xf32>
    %114 = arith.addf %111, %113 : vector<8x128xf32>
    %115 = math.tanh %114 : vector<8x128xf32>
    %cst_32 = arith.constant 1.000000e+00 : f32
    %116 = vector.broadcast %cst_32 : f32 to vector<8x128xf32>
    %117 = arith.subf %116, %110 : vector<8x128xf32>
    %118 = arith.mulf %117, %115 : vector<8x128xf32>
    %119 = arith.mulf %110, %89 : vector<8x128xf32>
    %120 = arith.addf %118, %119 : vector<8x128xf32>
    %c2_i32 = arith.constant 2 : i32
    %121 = vector.broadcast %c2_i32 : i32 to vector<8x1xi32>
    %122 = arith.cmpi sgt, %2, %121 : vector<8x1xi32>
    %cst_33 = arith.constant 0.000000e+00 : f32
    %123 = vector.broadcast %cst_33 : f32 to vector<8x128xf32>
    %124 = vector.shape_cast %122 : vector<8x1xi1> to vector<8x1xi1>
    %125 = vector.broadcast %124 : vector<8x1xi1> to vector<8x128xi1>
    %126 = arith.select %125, %120, %123 : vector<8x128xi1>, vector<8x128xf32>
    %c2_34 = arith.constant 2 : index
    %c0_35 = arith.constant 0 : index
    %c0_36 = arith.constant 0 : index
    %127 = vector.load %arg6[%c2_34, %c0_35, %c0_36] : memref<8x8x128xf32, #tpu.memory_space<vmem>>, vector<1x8x128xf32>
    %128 = vector.shape_cast %127 : vector<1x8x128xf32> to vector<8x128xf32>
    %129 = vector.shape_cast %126 : vector<8x128xf32> to vector<1x8x128xf32>
    tpu.vector_store %arg6[%c2_34, %c0_35, %c0_36], %129 {strides = array<i32>} : memref<8x8x128xf32, #tpu.memory_space<vmem>>, vector<1x8x128xf32>,
    %130 = vector.shape_cast %122 : vector<8x1xi1> to vector<8x1xi1>
    %131 = vector.broadcast %130 : vector<8x1xi1> to vector<8x128xi1>
    %132 = arith.select %131, %120, %89 : vector<8x128xi1>, vector<8x128xf32>
    %c3 = arith.constant 3 : index
    %c0_37 = arith.constant 0 : index
    %c0_38 = arith.constant 0 : index
    %133 = vector.load %arg0[%c3, %c0_37, %c0_38] : memref<8x8x384xf32, #tpu.memory_space<vmem>>, vector<1x8x384xf32>
    %134 = vector.shape_cast %133 : vector<1x8x384xf32> to vector<8x384xf32>
    %cst_39 = arith.constant dense<0.000000e+00> : vector<8x384xf32>
    %135 = tpu.matmul %132, %0, %cst_39 {dimension_numbers = #tpu.dot_dimension_numbers<[1], [0], [0], [1], [0, 0, 1, 1], [], []>} : vector<8x128xf32>, vector<128x384xf32>, vector<8x384xf32> -> vector<8x384xf32>
    %136 = vector.broadcast %1 : vector<1x384xf32> to vector<8x384xf32>
    %137 = arith.addf %135, %136 : vector<8x384xf32>
    %138 = vector.extract_strided_slice %134 {offsets = [0, 0], sizes = [8, 128], strides = [1, 1]} : vector<8x384xf32> to vector<8x128xf32>
    %139 = vector.extract_strided_slice %137 {offsets = [0, 0], sizes = [8, 128], strides = [1, 1]} : vector<8x384xf32> to vector<8x128xf32>
    %140 = arith.addf %138, %139 : vector<8x128xf32>
    %141 = arith.negf %140 : vector<8x128xf32>
    %142 = math.exp %141 : vector<8x128xf32>
    %cst_40 = arith.constant 1.000000e+00 : f32
    %143 = vector.broadcast %cst_40 : f32 to vector<8x128xf32>
    %144 = arith.addf %143, %142 : vector<8x128xf32>
    %145 = arith.divf %143, %144 : vector<8x128xf32>
    %146 = vector.extract_strided_slice %134 {offsets = [0, 128], sizes = [8, 128], strides = [1, 1]} : vector<8x384xf32> to vector<8x128xf32>
    %147 = vector.extract_strided_slice %137 {offsets = [0, 128], sizes = [8, 128], strides = [1, 1]} : vector<8x384xf32> to vector<8x128xf32>
    %148 = arith.addf %146, %147 : vector<8x128xf32>
    %149 = arith.negf %148 : vector<8x128xf32>
    %150 = math.exp %149 : vector<8x128xf32>
    %cst_41 = arith.constant 1.000000e+00 : f32
    %151 = vector.broadcast %cst_41 : f32 to vector<8x128xf32>
    %152 = arith.addf %151, %150 : vector<8x128xf32>
    %153 = arith.divf %151, %152 : vector<8x128xf32>
    %154 = vector.extract_strided_slice %134 {offsets = [0, 256], sizes = [8, 128], strides = [1, 1]} : vector<8x384xf32> to vector<8x128xf32>
    %155 = vector.extract_strided_slice %137 {offsets = [0, 256], sizes = [8, 128], strides = [1, 1]} : vector<8x384xf32> to vector<8x128xf32>
    %156 = arith.mulf %145, %155 : vector<8x128xf32>
    %157 = arith.addf %154, %156 : vector<8x128xf32>
    %158 = math.tanh %157 : vector<8x128xf32>
    %cst_42 = arith.constant 1.000000e+00 : f32
    %159 = vector.broadcast %cst_42 : f32 to vector<8x128xf32>
    %160 = arith.subf %159, %153 : vector<8x128xf32>
    %161 = arith.mulf %160, %158 : vector<8x128xf32>
    %162 = arith.mulf %153, %132 : vector<8x128xf32>
    %163 = arith.addf %161, %162 : vector<8x128xf32>
    %c3_i32 = arith.constant 3 : i32
    %164 = vector.broadcast %c3_i32 : i32 to vector<8x1xi32>
    %165 = arith.cmpi sgt, %2, %164 : vector<8x1xi32>
    %cst_43 = arith.constant 0.000000e+00 : f32
    %166 = vector.broadcast %cst_43 : f32 to vector<8x128xf32>
    %167 = vector.shape_cast %165 : vector<8x1xi1> to vector<8x1xi1>
    %168 = vector.broadcast %167 : vector<8x1xi1> to vector<8x128xi1>
    %169 = arith.select %168, %163, %166 : vector<8x128xi1>, vector<8x128xf32>
    %c3_44 = arith.constant 3 : index
    %c0_45 = arith.constant 0 : index
    %c0_46 = arith.constant 0 : index
    %170 = vector.load %arg6[%c3_44, %c0_45, %c0_46] : memref<8x8x128xf32, #tpu.memory_space<vmem>>, vector<1x8x128xf32>
    %171 = vector.shape_cast %170 : vector<1x8x128xf32> to vector<8x128xf32>
    %172 = vector.shape_cast %169 : vector<8x128xf32> to vector<1x8x128xf32>
    tpu.vector_store %arg6[%c3_44, %c0_45, %c0_46], %172 {strides = array<i32>} : memref<8x8x128xf32, #tpu.memory_space<vmem>>, vector<1x8x128xf32>,
    %173 = vector.shape_cast %165 : vector<8x1xi1> to vector<8x1xi1>
    %174 = vector.broadcast %173 : vector<8x1xi1> to vector<8x128xi1>
    %175 = arith.select %174, %163, %132 : vector<8x128xi1>, vector<8x128xf32>
    %c4 = arith.constant 4 : index
    %c0_47 = arith.constant 0 : index
    %c0_48 = arith.constant 0 : index
    %176 = vector.load %arg0[%c4, %c0_47, %c0_48] : memref<8x8x384xf32, #tpu.memory_space<vmem>>, vector<1x8x384xf32>
    %177 = vector.shape_cast %176 : vector<1x8x384xf32> to vector<8x384xf32>
    %cst_49 = arith.constant dense<0.000000e+00> : vector<8x384xf32>
    %178 = tpu.matmul %175, %0, %cst_49 {dimension_numbers = #tpu.dot_dimension_numbers<[1], [0], [0], [1], [0, 0, 1, 1], [], []>} : vector<8x128xf32>, vector<128x384xf32>, vector<8x384xf32> -> vector<8x384xf32>
    %179 = vector.broadcast %1 : vector<1x384xf32> to vector<8x384xf32>
    %180 = arith.addf %178, %179 : vector<8x384xf32>
    %181 = vector.extract_strided_slice %177 {offsets = [0, 0], sizes = [8, 128], strides = [1, 1]} : vector<8x384xf32> to vector<8x128xf32>
    %182 = vector.extract_strided_slice %180 {offsets = [0, 0], sizes = [8, 128], strides = [1, 1]} : vector<8x384xf32> to vector<8x128xf32>
    %183 = arith.addf %181, %182 : vector<8x128xf32>
    %184 = arith.negf %183 : vector<8x128xf32>
    %185 = math.exp %184 : vector<8x128xf32>
    %cst_50 = arith.constant 1.000000e+00 : f32
    %186 = vector.broadcast %cst_50 : f32 to vector<8x128xf32>
    %187 = arith.addf %186, %185 : vector<8x128xf32>
    %188 = arith.divf %186, %187 : vector<8x128xf32>
    %189 = vector.extract_strided_slice %177 {offsets = [0, 128], sizes = [8, 128], strides = [1, 1]} : vector<8x384xf32> to vector<8x128xf32>
    %190 = vector.extract_strided_slice %180 {offsets = [0, 128], sizes = [8, 128], strides = [1, 1]} : vector<8x384xf32> to vector<8x128xf32>
    %191 = arith.addf %189, %190 : vector<8x128xf32>
    %192 = arith.negf %191 : vector<8x128xf32>
    %193 = math.exp %192 : vector<8x128xf32>
    %cst_51 = arith.constant 1.000000e+00 : f32
    %194 = vector.broadcast %cst_51 : f32 to vector<8x128xf32>
    %195 = arith.addf %194, %193 : vector<8x128xf32>
    %196 = arith.divf %194, %195 : vector<8x128xf32>
    %197 = vector.extract_strided_slice %177 {offsets = [0, 256], sizes = [8, 128], strides = [1, 1]} : vector<8x384xf32> to vector<8x128xf32>
    %198 = vector.extract_strided_slice %180 {offsets = [0, 256], sizes = [8, 128], strides = [1, 1]} : vector<8x384xf32> to vector<8x128xf32>
    %199 = arith.mulf %188, %198 : vector<8x128xf32>
    %200 = arith.addf %197, %199 : vector<8x128xf32>
    %201 = math.tanh %200 : vector<8x128xf32>
    %cst_52 = arith.constant 1.000000e+00 : f32
    %202 = vector.broadcast %cst_52 : f32 to vector<8x128xf32>
    %203 = arith.subf %202, %196 : vector<8x128xf32>
    %204 = arith.mulf %203, %201 : vector<8x128xf32>
    %205 = arith.mulf %196, %175 : vector<8x128xf32>
    %206 = arith.addf %204, %205 : vector<8x128xf32>
    %c4_i32 = arith.constant 4 : i32
    %207 = vector.broadcast %c4_i32 : i32 to vector<8x1xi32>
    %208 = arith.cmpi sgt, %2, %207 : vector<8x1xi32>
    %cst_53 = arith.constant 0.000000e+00 : f32
    %209 = vector.broadcast %cst_53 : f32 to vector<8x128xf32>
    %210 = vector.shape_cast %208 : vector<8x1xi1> to vector<8x1xi1>
    %211 = vector.broadcast %210 : vector<8x1xi1> to vector<8x128xi1>
    %212 = arith.select %211, %206, %209 : vector<8x128xi1>, vector<8x128xf32>
    %c4_54 = arith.constant 4 : index
    %c0_55 = arith.constant 0 : index
    %c0_56 = arith.constant 0 : index
    %213 = vector.load %arg6[%c4_54, %c0_55, %c0_56] : memref<8x8x128xf32, #tpu.memory_space<vmem>>, vector<1x8x128xf32>
    %214 = vector.shape_cast %213 : vector<1x8x128xf32> to vector<8x128xf32>
    %215 = vector.shape_cast %212 : vector<8x128xf32> to vector<1x8x128xf32>
    tpu.vector_store %arg6[%c4_54, %c0_55, %c0_56], %215 {strides = array<i32>} : memref<8x8x128xf32, #tpu.memory_space<vmem>>, vector<1x8x128xf32>,
    %216 = vector.shape_cast %208 : vector<8x1xi1> to vector<8x1xi1>
    %217 = vector.broadcast %216 : vector<8x1xi1> to vector<8x128xi1>
    %218 = arith.select %217, %206, %175 : vector<8x128xi1>, vector<8x128xf32>
    %c5 = arith.constant 5 : index
    %c0_57 = arith.constant 0 : index
    %c0_58 = arith.constant 0 : index
    %219 = vector.load %arg0[%c5, %c0_57, %c0_58] : memref<8x8x384xf32, #tpu.memory_space<vmem>>, vector<1x8x384xf32>
    %220 = vector.shape_cast %219 : vector<1x8x384xf32> to vector<8x384xf32>
    %cst_59 = arith.constant dense<0.000000e+00> : vector<8x384xf32>
    %221 = tpu.matmul %218, %0, %cst_59 {dimension_numbers = #tpu.dot_dimension_numbers<[1], [0], [0], [1], [0, 0, 1, 1], [], []>} : vector<8x128xf32>, vector<128x384xf32>, vector<8x384xf32> -> vector<8x384xf32>
    %222 = vector.broadcast %1 : vector<1x384xf32> to vector<8x384xf32>
    %223 = arith.addf %221, %222 : vector<8x384xf32>
    %224 = vector.extract_strided_slice %220 {offsets = [0, 0], sizes = [8, 128], strides = [1, 1]} : vector<8x384xf32> to vector<8x128xf32>
    %225 = vector.extract_strided_slice %223 {offsets = [0, 0], sizes = [8, 128], strides = [1, 1]} : vector<8x384xf32> to vector<8x128xf32>
    %226 = arith.addf %224, %225 : vector<8x128xf32>
    %227 = arith.negf %226 : vector<8x128xf32>
    %228 = math.exp %227 : vector<8x128xf32>
    %cst_60 = arith.constant 1.000000e+00 : f32
    %229 = vector.broadcast %cst_60 : f32 to vector<8x128xf32>
    %230 = arith.addf %229, %228 : vector<8x128xf32>
    %231 = arith.divf %229, %230 : vector<8x128xf32>
    %232 = vector.extract_strided_slice %220 {offsets = [0, 128], sizes = [8, 128], strides = [1, 1]} : vector<8x384xf32> to vector<8x128xf32>
    %233 = vector.extract_strided_slice %223 {offsets = [0, 128], sizes = [8, 128], strides = [1, 1]} : vector<8x384xf32> to vector<8x128xf32>
    %234 = arith.addf %232, %233 : vector<8x128xf32>
    %235 = arith.negf %234 : vector<8x128xf32>
    %236 = math.exp %235 : vector<8x128xf32>
    %cst_61 = arith.constant 1.000000e+00 : f32
    %237 = vector.broadcast %cst_61 : f32 to vector<8x128xf32>
    %238 = arith.addf %237, %236 : vector<8x128xf32>
    %239 = arith.divf %237, %238 : vector<8x128xf32>
    %240 = vector.extract_strided_slice %220 {offsets = [0, 256], sizes = [8, 128], strides = [1, 1]} : vector<8x384xf32> to vector<8x128xf32>
    %241 = vector.extract_strided_slice %223 {offsets = [0, 256], sizes = [8, 128], strides = [1, 1]} : vector<8x384xf32> to vector<8x128xf32>
    %242 = arith.mulf %231, %241 : vector<8x128xf32>
    %243 = arith.addf %240, %242 : vector<8x128xf32>
    %244 = math.tanh %243 : vector<8x128xf32>
    %cst_62 = arith.constant 1.000000e+00 : f32
    %245 = vector.broadcast %cst_62 : f32 to vector<8x128xf32>
    %246 = arith.subf %245, %239 : vector<8x128xf32>
    %247 = arith.mulf %246, %244 : vector<8x128xf32>
    %248 = arith.mulf %239, %218 : vector<8x128xf32>
    %249 = arith.addf %247, %248 : vector<8x128xf32>
    %c5_i32 = arith.constant 5 : i32
    %250 = vector.broadcast %c5_i32 : i32 to vector<8x1xi32>
    %251 = arith.cmpi sgt, %2, %250 : vector<8x1xi32>
    %cst_63 = arith.constant 0.000000e+00 : f32
    %252 = vector.broadcast %cst_63 : f32 to vector<8x128xf32>
    %253 = vector.shape_cast %251 : vector<8x1xi1> to vector<8x1xi1>
    %254 = vector.broadcast %253 : vector<8x1xi1> to vector<8x128xi1>
    %255 = arith.select %254, %249, %252 : vector<8x128xi1>, vector<8x128xf32>
    %c5_64 = arith.constant 5 : index
    %c0_65 = arith.constant 0 : index
    %c0_66 = arith.constant 0 : index
    %256 = vector.load %arg6[%c5_64, %c0_65, %c0_66] : memref<8x8x128xf32, #tpu.memory_space<vmem>>, vector<1x8x128xf32>
    %257 = vector.shape_cast %256 : vector<1x8x128xf32> to vector<8x128xf32>
    %258 = vector.shape_cast %255 : vector<8x128xf32> to vector<1x8x128xf32>
    tpu.vector_store %arg6[%c5_64, %c0_65, %c0_66], %258 {strides = array<i32>} : memref<8x8x128xf32, #tpu.memory_space<vmem>>, vector<1x8x128xf32>,
    %259 = vector.shape_cast %251 : vector<8x1xi1> to vector<8x1xi1>
    %260 = vector.broadcast %259 : vector<8x1xi1> to vector<8x128xi1>
    %261 = arith.select %260, %249, %218 : vector<8x128xi1>, vector<8x128xf32>
    %c6 = arith.constant 6 : index
    %c0_67 = arith.constant 0 : index
    %c0_68 = arith.constant 0 : index
    %262 = vector.load %arg0[%c6, %c0_67, %c0_68] : memref<8x8x384xf32, #tpu.memory_space<vmem>>, vector<1x8x384xf32>
    %263 = vector.shape_cast %262 : vector<1x8x384xf32> to vector<8x384xf32>
    %cst_69 = arith.constant dense<0.000000e+00> : vector<8x384xf32>
    %264 = tpu.matmul %261, %0, %cst_69 {dimension_numbers = #tpu.dot_dimension_numbers<[1], [0], [0], [1], [0, 0, 1, 1], [], []>} : vector<8x128xf32>, vector<128x384xf32>, vector<8x384xf32> -> vector<8x384xf32>
    %265 = vector.broadcast %1 : vector<1x384xf32> to vector<8x384xf32>
    %266 = arith.addf %264, %265 : vector<8x384xf32>
    %267 = vector.extract_strided_slice %263 {offsets = [0, 0], sizes = [8, 128], strides = [1, 1]} : vector<8x384xf32> to vector<8x128xf32>
    %268 = vector.extract_strided_slice %266 {offsets = [0, 0], sizes = [8, 128], strides = [1, 1]} : vector<8x384xf32> to vector<8x128xf32>
    %269 = arith.addf %267, %268 : vector<8x128xf32>
    %270 = arith.negf %269 : vector<8x128xf32>
    %271 = math.exp %270 : vector<8x128xf32>
    %cst_70 = arith.constant 1.000000e+00 : f32
    %272 = vector.broadcast %cst_70 : f32 to vector<8x128xf32>
    %273 = arith.addf %272, %271 : vector<8x128xf32>
    %274 = arith.divf %272, %273 : vector<8x128xf32>
    %275 = vector.extract_strided_slice %263 {offsets = [0, 128], sizes = [8, 128], strides = [1, 1]} : vector<8x384xf32> to vector<8x128xf32>
    %276 = vector.extract_strided_slice %266 {offsets = [0, 128], sizes = [8, 128], strides = [1, 1]} : vector<8x384xf32> to vector<8x128xf32>
    %277 = arith.addf %275, %276 : vector<8x128xf32>
    %278 = arith.negf %277 : vector<8x128xf32>
    %279 = math.exp %278 : vector<8x128xf32>
    %cst_71 = arith.constant 1.000000e+00 : f32
    %280 = vector.broadcast %cst_71 : f32 to vector<8x128xf32>
    %281 = arith.addf %280, %279 : vector<8x128xf32>
    %282 = arith.divf %280, %281 : vector<8x128xf32>
    %283 = vector.extract_strided_slice %263 {offsets = [0, 256], sizes = [8, 128], strides = [1, 1]} : vector<8x384xf32> to vector<8x128xf32>
    %284 = vector.extract_strided_slice %266 {offsets = [0, 256], sizes = [8, 128], strides = [1, 1]} : vector<8x384xf32> to vector<8x128xf32>
    %285 = arith.mulf %274, %284 : vector<8x128xf32>
    %286 = arith.addf %283, %285 : vector<8x128xf32>
    %287 = math.tanh %286 : vector<8x128xf32>
    %cst_72 = arith.constant 1.000000e+00 : f32
    %288 = vector.broadcast %cst_72 : f32 to vector<8x128xf32>
    %289 = arith.subf %288, %282 : vector<8x128xf32>
    %290 = arith.mulf %289, %287 : vector<8x128xf32>
    %291 = arith.mulf %282, %261 : vector<8x128xf32>
    %292 = arith.addf %290, %291 : vector<8x128xf32>
    %c6_i32 = arith.constant 6 : i32
    %293 = vector.broadcast %c6_i32 : i32 to vector<8x1xi32>
    %294 = arith.cmpi sgt, %2, %293 : vector<8x1xi32>
    %cst_73 = arith.constant 0.000000e+00 : f32
    %295 = vector.broadcast %cst_73 : f32 to vector<8x128xf32>
    %296 = vector.shape_cast %294 : vector<8x1xi1> to vector<8x1xi1>
    %297 = vector.broadcast %296 : vector<8x1xi1> to vector<8x128xi1>
    %298 = arith.select %297, %292, %295 : vector<8x128xi1>, vector<8x128xf32>
    %c6_74 = arith.constant 6 : index
    %c0_75 = arith.constant 0 : index
    %c0_76 = arith.constant 0 : index
    %299 = vector.load %arg6[%c6_74, %c0_75, %c0_76] : memref<8x8x128xf32, #tpu.memory_space<vmem>>, vector<1x8x128xf32>
    %300 = vector.shape_cast %299 : vector<1x8x128xf32> to vector<8x128xf32>
    %301 = vector.shape_cast %298 : vector<8x128xf32> to vector<1x8x128xf32>
    tpu.vector_store %arg6[%c6_74, %c0_75, %c0_76], %301 {strides = array<i32>} : memref<8x8x128xf32, #tpu.memory_space<vmem>>, vector<1x8x128xf32>,
    %302 = vector.shape_cast %294 : vector<8x1xi1> to vector<8x1xi1>
    %303 = vector.broadcast %302 : vector<8x1xi1> to vector<8x128xi1>
    %304 = arith.select %303, %292, %261 : vector<8x128xi1>, vector<8x128xf32>
    %c7 = arith.constant 7 : index
    %c0_77 = arith.constant 0 : index
    %c0_78 = arith.constant 0 : index
    %305 = vector.load %arg0[%c7, %c0_77, %c0_78] : memref<8x8x384xf32, #tpu.memory_space<vmem>>, vector<1x8x384xf32>
    %306 = vector.shape_cast %305 : vector<1x8x384xf32> to vector<8x384xf32>
    %cst_79 = arith.constant dense<0.000000e+00> : vector<8x384xf32>
    %307 = tpu.matmul %304, %0, %cst_79 {dimension_numbers = #tpu.dot_dimension_numbers<[1], [0], [0], [1], [0, 0, 1, 1], [], []>} : vector<8x128xf32>, vector<128x384xf32>, vector<8x384xf32> -> vector<8x384xf32>
    %308 = vector.broadcast %1 : vector<1x384xf32> to vector<8x384xf32>
    %309 = arith.addf %307, %308 : vector<8x384xf32>
    %310 = vector.extract_strided_slice %306 {offsets = [0, 0], sizes = [8, 128], strides = [1, 1]} : vector<8x384xf32> to vector<8x128xf32>
    %311 = vector.extract_strided_slice %309 {offsets = [0, 0], sizes = [8, 128], strides = [1, 1]} : vector<8x384xf32> to vector<8x128xf32>
    %312 = arith.addf %310, %311 : vector<8x128xf32>
    %313 = arith.negf %312 : vector<8x128xf32>
    %314 = math.exp %313 : vector<8x128xf32>
    %cst_80 = arith.constant 1.000000e+00 : f32
    %315 = vector.broadcast %cst_80 : f32 to vector<8x128xf32>
    %316 = arith.addf %315, %314 : vector<8x128xf32>
    %317 = arith.divf %315, %316 : vector<8x128xf32>
    %318 = vector.extract_strided_slice %306 {offsets = [0, 128], sizes = [8, 128], strides = [1, 1]} : vector<8x384xf32> to vector<8x128xf32>
    %319 = vector.extract_strided_slice %309 {offsets = [0, 128], sizes = [8, 128], strides = [1, 1]} : vector<8x384xf32> to vector<8x128xf32>
    %320 = arith.addf %318, %319 : vector<8x128xf32>
    %321 = arith.negf %320 : vector<8x128xf32>
    %322 = math.exp %321 : vector<8x128xf32>
    %cst_81 = arith.constant 1.000000e+00 : f32
    %323 = vector.broadcast %cst_81 : f32 to vector<8x128xf32>
    %324 = arith.addf %323, %322 : vector<8x128xf32>
    %325 = arith.divf %323, %324 : vector<8x128xf32>
    %326 = vector.extract_strided_slice %306 {offsets = [0, 256], sizes = [8, 128], strides = [1, 1]} : vector<8x384xf32> to vector<8x128xf32>
    %327 = vector.extract_strided_slice %309 {offsets = [0, 256], sizes = [8, 128], strides = [1, 1]} : vector<8x384xf32> to vector<8x128xf32>
    %328 = arith.mulf %317, %327 : vector<8x128xf32>
    %329 = arith.addf %326, %328 : vector<8x128xf32>
    %330 = math.tanh %329 : vector<8x128xf32>
    %cst_82 = arith.constant 1.000000e+00 : f32
    %331 = vector.broadcast %cst_82 : f32 to vector<8x128xf32>
    %332 = arith.subf %331, %325 : vector<8x128xf32>
    %333 = arith.mulf %332, %330 : vector<8x128xf32>
    %334 = arith.mulf %325, %304 : vector<8x128xf32>
    %335 = arith.addf %333, %334 : vector<8x128xf32>
    %c7_i32 = arith.constant 7 : i32
    %336 = vector.broadcast %c7_i32 : i32 to vector<8x1xi32>
    %337 = arith.cmpi sgt, %2, %336 : vector<8x1xi32>
    %cst_83 = arith.constant 0.000000e+00 : f32
    %338 = vector.broadcast %cst_83 : f32 to vector<8x128xf32>
    %339 = vector.shape_cast %337 : vector<8x1xi1> to vector<8x1xi1>
    %340 = vector.broadcast %339 : vector<8x1xi1> to vector<8x128xi1>
    %341 = arith.select %340, %335, %338 : vector<8x128xi1>, vector<8x128xf32>
    %c7_84 = arith.constant 7 : index
    %c0_85 = arith.constant 0 : index
    %c0_86 = arith.constant 0 : index
    %342 = vector.load %arg6[%c7_84, %c0_85, %c0_86] : memref<8x8x128xf32, #tpu.memory_space<vmem>>, vector<1x8x128xf32>
    %343 = vector.shape_cast %342 : vector<1x8x128xf32> to vector<8x128xf32>
    %344 = vector.shape_cast %341 : vector<8x128xf32> to vector<1x8x128xf32>
    tpu.vector_store %arg6[%c7_84, %c0_85, %c0_86], %344 {strides = array<i32>} : memref<8x8x128xf32, #tpu.memory_space<vmem>>, vector<1x8x128xf32>,
    %345 = vector.shape_cast %337 : vector<8x1xi1> to vector<8x1xi1>
    %346 = vector.broadcast %345 : vector<8x1xi1> to vector<8x128xi1>
    %347 = arith.select %346, %335, %304 : vector<8x128xi1>, vector<8x128xf32>
    %c0_87 = arith.constant 0 : index
    %c0_88 = arith.constant 0 : index
    %348 = vector.load %arg5[%c0_87, %c0_88] : memref<8x128xf32, #tpu.memory_space<vmem>>, vector<8x128xf32>
    tpu.vector_store %arg5[%c0_87, %c0_88], %347 {strides = array<i32>} : memref<8x128xf32, #tpu.memory_space<vmem>>, vector<8x128xf32>,
    return
  }
}

module attributes {stable_mosaic.version = 11 : i64} {
  func.func @proj_logsoftmax_kernel(%arg0: i32, %arg1: memref<64x128xbf16, #tpu.memory_space<vmem>>, %arg2: memref<128x256xbf16, #tpu.memory_space<vmem>>, %arg3: memref<1x256xf32, #tpu.memory_space<vmem>>, %arg4: memref<64x256xf32, #tpu.memory_space<vmem>>) attributes {dimension_semantics = [#tpu.dimension_semantics<parallel>], iteration_bounds = array<i64: 1>, scalar_prefetch = 0 : i64, scratch_operands = 0 : i64, tpu.core_type = #tpu.core_type<tc>, window_params = [{transform_indices = @transform_0, window_bounds = array<i64: 64, 128>}, {pipeline_mode = #tpu.pipeline_mode<synchronous>, transform_indices = @transform_1, window_bounds = array<i64: 128, 256>}, {pipeline_mode = #tpu.pipeline_mode<synchronous>, transform_indices = @transform_2, window_bounds = array<i64: 1, 256>}, {transform_indices = @transform_3, window_bounds = array<i64: 64, 256>}]} {
    %c0 = arith.constant 0 : index
    %c0_0 = arith.constant 0 : index
    %0 = vector.load %arg1[%c0, %c0_0] : memref<64x128xbf16, #tpu.memory_space<vmem>>, vector<64x128xbf16>
    %c0_1 = arith.constant 0 : index
    %c0_2 = arith.constant 0 : index
    %1 = vector.load %arg2[%c0_1, %c0_2] : memref<128x256xbf16, #tpu.memory_space<vmem>>, vector<128x256xbf16>
    %cst = arith.constant dense<0.000000e+00> : vector<64x256xf32>
    %2 = tpu.matmul %0, %1, %cst {dimension_numbers = #tpu.dot_dimension_numbers<[1], [0], [0], [1], [0, 0, 1, 1], [], []>} : vector<64x128xbf16>, vector<128x256xbf16>, vector<64x256xf32> -> vector<64x256xf32>
    %c0_3 = arith.constant 0 : index
    %c0_4 = arith.constant 0 : index
    %3 = vector.load %arg3[%c0_3, %c0_4] : memref<1x256xf32, #tpu.memory_space<vmem>>, vector<1x256xf32>
    %4 = vector.broadcast %3 : vector<1x256xf32> to vector<64x256xf32>
    %5 = arith.addf %2, %4 : vector<64x256xf32>
    %cst_5 = arith.constant dense<0xFF800000> : vector<64xf32>
    %6 = vector.multi_reduction <maximumf>, %5, %cst_5 [1] : vector<64x256xf32> to vector<64xf32>
    %7 = vector.shape_cast %6 : vector<64xf32> to vector<64x1xf32>
    %8 = vector.broadcast %7 : vector<64x1xf32> to vector<64x256xf32>
    %9 = arith.subf %5, %8 : vector<64x256xf32>
    %10 = math.exp %9 : vector<64x256xf32>
    %cst_6 = arith.constant dense<0.000000e+00> : vector<64xf32>
    %11 = vector.multi_reduction <add>, %10, %cst_6 [1] : vector<64x256xf32> to vector<64xf32>
    %12 = vector.shape_cast %11 : vector<64xf32> to vector<64x1xf32>
    %13 = math.log %12 : vector<64x1xf32>
    %14 = arith.addf %13, %7 : vector<64x1xf32>
    %15 = vector.broadcast %14 : vector<64x1xf32> to vector<64x256xf32>
    %16 = arith.subf %5, %15 : vector<64x256xf32>
    %c0_7 = arith.constant 0 : index
    %c0_8 = arith.constant 0 : index
    %17 = vector.load %arg4[%c0_7, %c0_8] : memref<64x256xf32, #tpu.memory_space<vmem>>, vector<64x256xf32>
    tpu.vector_store %arg4[%c0_7, %c0_8], %16 {strides = array<i32>} : memref<64x256xf32, #tpu.memory_space<vmem>>, vector<64x256xf32>,
    return
  }
  func.func @transform_0(%arg0: i32) -> (i32, i32) {
    %c0_i32 = arith.constant 0 : i32
    %c0_i32_0 = arith.constant 0 : i32
    return %arg0, %c0_i32 : i32, i32
  }
  func.func @transform_1(%arg0: i32) -> (i32, i32) {
    %c0_i32 = arith.constant 0 : i32
    %c0_i32_0 = arith.constant 0 : i32
    %c0_i32_1 = arith.constant 0 : i32
    return %c0_i32, %c0_i32_0 : i32, i32
  }
  func.func @transform_2(%arg0: i32) -> (i32, i32) {
    %c0_i32 = arith.constant 0 : i32
    %c0_i32_0 = arith.constant 0 : i32
    %c0_i32_1 = arith.constant 0 : i32
    return %c0_i32, %c0_i32_0 : i32, i32
  }
  func.func @transform_3(%arg0: i32) -> (i32, i32) {
    %c0_i32 = arith.constant 0 : i32
    %c0_i32_0 = arith.constant 0 : i32
    return %arg0, %c0_i32 : i32, i32
  }
}

</mosaic_0001>

<bundles_post_ra>
// kernel: sentence_vae_forward.7
= control target key start
LH: loop header
LB: loop body
LE: loop exit
PB: predicated region body
PF: predicated region fallthrough
CT: control target
= control target key end

     0   :  { %17 = vsyncpa [#allocation3], 0  ;;  %v586_v3 = vmov 0.0|0.0   ;;  %vm587_vm0 = vmmov 0   ;;  %v588_v7 = vmov 0.0   ;;  %s832_s0 = inlined_call_operand.vmem [shape: f32[8,128], index: 0, kind: input, shape index: {}]   ;;  %s833_s1 = inlined_call_operand.vmem [shape: f32[128,32], index: 1, kind: input, shape index: {}]   ;;  %s834_s2 = inlined_call_operand.vmem [shape: f32[1,32], index: 2, kind: input, shape index: {}]   ;;  %s835_s3 = inlined_call_operand.vmem [shape: f32[128,32], index: 3, kind: input, shape index: {}]   ;;  %s836_s4 = inlined_call_operand.vmem [shape: f32[1,32], index: 4, kind: input, shape index: {}]   ;;  %s837_s5 = inlined_call_operand.vmem [shape: f32[32,128], index: 5, kind: input, shape index: {}]   ;;  %s838_s6 = inlined_call_operand.vmem [shape: f32[1,128], index: 6, kind: input, shape index: {}]   ;;  %s839_s7 = inlined_call_operand.vmem [shape: f32[8,32], index: 7, kind: input, shape index: {}]   ;;  %s840_s8 = inlined_call_operand.hbm [shape: f32[8,32], index: 8, kind: output, shape index: {0}]   ;;  %s841_s9 = inlined_call_operand.hbm [shape: f32[8,32], index: 9, kind: output, shape index: {1}]   ;;  %s842_s10 = inlined_call_operand.vmem [shape: f32[8,32], index: 10, kind: output, shape index: {2}]   ;;  %s843_s11 = inlined_call_operand.vmem [shape: f32[8,128], index: 11, kind: output, shape index: {3}]  }
   0x1   :  { %v129_v0 = vld [vmem:[%s835_s3] sm:$0xff]  ;;  %v130_v1 = vld [vmem:[%s835_s3 + $0x8] sm:$0xff]  ;;  %v131_v2 = vld [vmem:[%s835_s3 + $0x10] sm:$0xff]  ;;  %501 = vmatprep.subr.bf16.mxu1 %v586_v3  ;;  %477 = vmatprep.subr.bf16.mxu0 %v586_v3 }
   0x2   :  { %v502_v4 = vpack.c.bf16 %v130_v1, %v129_v0  ;;  %v132_v5 = vld [vmem:[%s835_s3 + $0x18] sm:$0xff]  ;;  %v36_v6 = vld [vmem:[%s833_s1] sm:$0xff]  ;;  %463 = vmatprep.mubr.msk.f32.mxu1 %vm587_vm0, %v588_v7  ;;  %428 = vmatprep.mubr.msk.f32.mxu0 %vm587_vm0, %v588_v7  ;;  %v37_v10 = vld [vmem:[%s833_s1 + $0x8] sm:$0xff] }
   0x3   :  { %v505_v8 = vpack.c.bf16 %v132_v5, %v131_v2  ;;  %v133_v9 = vld [vmem:[%s835_s3 + $0x20] sm:$0xff]  ;;  %v134_v11 = vld [vmem:[%s835_s3 + $0x28] sm:$0xff]  ;;  %v478_v12 = vpack.c.bf16 %v37_v10, %v36_v6  ;;  %v38_v13 = vld [vmem:[%s833_s1 + $0x10] sm:$0xff] }
   0x4   :  { %503 = vmatpush3.bf16.msra.mxu1 %v502_v4  ;;  %v39_v14 = vld [vmem:[%s833_s1 + $0x18] sm:$0xff]  ;;  %v508_v16 = vpack.c.bf16 %v134_v11, %v133_v9  ;;  %v40_v17 = vld [vmem:[%s833_s1 + $0x20] sm:$0xff]  ;;  %v41_v18 = vld [vmem:[%s833_s1 + $0x28] sm:$0xff] }
   0x5   :  { %504 = vmatprep.subr.bf16.mxu1 %v586_v3  ;;  %479 = vmatpush3.bf16.msra.mxu0 %v478_v12  ;;  %v481_v15 = vpack.c.bf16 %v39_v14, %v38_v13  ;;  %v135_v19 = vld [vmem:[%s835_s3 + $0x30] sm:$0xff]  ;;  %v136_v20 = vld [vmem:[%s835_s3 + $0x38] sm:$0xff]  ;;  %v484_v21 = vpack.c.bf16 %v41_v18, %v40_v17 }
   0x6   :  { %480 = vmatprep.subr.bf16.mxu0 %v586_v3  ;;  %v511_v22 = vpack.c.bf16 %v136_v20, %v135_v19  ;;  %v42_v23 = vld [vmem:[%s833_s1 + $0x30] sm:$0xff]  ;;  %v43_v24 = vld [vmem:[%s833_s1 + $0x38] sm:$0xff] }
   0x8   :  { %506 = vmatpush3.bf16.msra.mxu1 %v505_v8 }
   0x9   :  { %507 = vmatprep.subr.bf16.mxu1 %v586_v3  ;;  %482 = vmatpush3.bf16.msra.mxu0 %v481_v15 }
   0xa   :  { %483 = vmatprep.subr.bf16.mxu0 %v586_v3 }
   0xc   :  { %509 = vmatpush3.bf16.msra.mxu1 %v508_v16 }
   0xd   :  { %18 = vsyncpa [#allocation5], 0  ;;  %510 = vmatprep.subr.bf16.mxu1 %v586_v3  ;;  %v137_v25 = vld [vmem:[%s835_s3 + $0x40] sm:$0xff]  ;;  %v138_v26 = vld [vmem:[%s835_s3 + $0x48] sm:$0xff]  ;;  %485 = vmatpush3.bf16.msra.mxu0 %v484_v21  ;;  %v487_v27 = vpack.c.bf16 %v43_v24, %v42_v23  ;;  %vm228_vm1 = vcmask 261120   ;;  %s589_s17 = smov [#allocation2]  }
   0xe   :  { %v514_v28 = vpack.c.bf16 %v138_v26, %v137_v25  ;;  %486 = vmatprep.subr.bf16.mxu0 %v586_v3  ;;  %v44_v29 = vld [vmem:[%s833_s1 + $0x40] sm:$0xff]  ;;  %v45_v30 = vld [vmem:[%s833_s1 + $0x48] sm:$0xff]  ;;  %v139_v31 = vld [vmem:[%s835_s3 + $0x50] sm:$0xff]  ;;  %s323_s18 = sshll.u32 %s589_s17, 4  ;;  %s590_s19 = smov [#allocation4]   ;;  %s324_s18 = int_to_ptr.vmem [resolvable:$true] %s323_s18 }
   0xf   :  { %v140_v32 = vld [vmem:[%s835_s3 + $0x58] sm:$0xff]  ;;  %v490_v33 = vpack.c.bf16 %v45_v30, %v44_v29  ;;  %v46_v35 = vld [vmem:[%s833_s1 + $0x50] sm:$0xff]  ;;  %v141_v37 = vld [vmem:[%s835_s3 + $0x60] sm:$0xff]  ;;  %s333_s20 = sshll.u32 %s590_s19, 4  ;;  %s538_s21 = scalar_lea.vmem %s324_s18, 128  ;;  %s334_s20 = int_to_ptr.vmem [resolvable:$true] %s333_s20 }
  0x10   :  { %512 = vmatpush3.bf16.msra.mxu1 %v511_v22  ;;  %v517_v34 = vpack.c.bf16 %v140_v32, %v139_v31  ;;  %v47_v36 = vld [vmem:[%s833_s1 + $0x58] sm:$0xff]  ;;  %v142_v38 = vld [vmem:[%s835_s3 + $0x68] sm:$0xff]  ;;  %v48_v41 = vld [vmem:[%s833_s1 + $0x60] sm:$0xff]  ;;  %p539_p0 = scmp.ne.s32.totalorder %s324_s18, %s538_s21  ;;  %p543_p1 = scmp.lt.s32.totalorder %s324_s18, %s324_s18 }
  0x11   :  { %513 = vmatprep.subr.bf16.mxu1 %v586_v3  ;;  %488 = vmatpush3.bf16.msra.mxu0 %v487_v27  ;;  %v493_v39 = vpack.c.bf16 %v47_v36, %v46_v35  ;;  %v520_v40 = vpack.c.bf16 %v142_v38, %v141_v37  ;;  %v49_v42 = vld [vmem:[%s833_s1 + $0x68] sm:$0xff]  ;;  %v143_v43 = vld [vmem:[%s835_s3 + $0x70] sm:$0xff]  ;;  %v144_v44 = vld [vmem:[%s835_s3 + $0x78] sm:$0xff]  ;;  %p544_p2 = scmp.lt.s32.totalorder %s538_s21, %s538_s21 }
  0x12   :  { %489 = vmatprep.subr.bf16.mxu0 %v586_v3  ;;  %v496_v45 = vpack.c.bf16 %v49_v42, %v48_v41  ;;  %v523_v46 = vpack.c.bf16 %v144_v44, %v143_v43  ;;  %v50_v47 = vld [vmem:[%s833_s1 + $0x70] sm:$0xff]  ;;  %v51_v48 = vld [vmem:[%s833_s1 + $0x78] sm:$0xff]  ;;  %v35_v50 = vld [vmem:[%s832_s0] sm:$0xff] }
  0x13   :  { %v499_v49 = vpack.c.bf16 %v51_v48, %v50_v47  ;;  %v232_v51 = vld [vmem:[%s837_s5] sm:$0xff]  ;;  %v233_v52 = vld [vmem:[%s837_s5 + $0x8] sm:$0xff]  ;;  %v234_v54 = vld [vmem:[%s837_s5 + $0x10] sm:$0xff]  ;;  %p545_p3 = por %p544_p2, %p543_p1 }
  0x14   :  { %515 = vmatpush3.bf16.msra.mxu1 %v514_v28  ;;  %v526_v53 = vpack.c.bf16 %v233_v52, %v232_v51  ;;  %v235_v55 = vld [vmem:[%s837_s5 + $0x18] sm:$0xff]  ;;  %v354_v57 = vld [vmem:[%s836_s4] ss:$0 sm:$0xff] }
  0x15   :  { %516 = vmatprep.subr.bf16.mxu1 %v586_v3  ;;  %491 = vmatpush3.bf16.msra.mxu0 %v490_v33  ;;  %v529_v56 = vpack.c.bf16 %v235_v55, %v234_v54  ;;  %v353_v61 = vld [vmem:[%s834_s2] ss:$0 sm:$0xff]  ;;  %p546_p4 = pnand %p545_p3, %p539_p0 }
  0x16   :  { %492 = vmatprep.subr.bf16.mxu0 %v586_v3 }
  0x18   :  { %518 = vmatpush3.bf16.msra.mxu1 %v517_v34 }
  0x19   :  { %519 = vmatprep.subr.bf16.mxu1 %v586_v3  ;;  %494 = vmatpush3.bf16.msra.mxu0 %v493_v39 }
  0x1a   :  { %495 = vmatprep.subr.bf16.mxu0 %v586_v3 }
  0x1c   :  { %521 = vmatpush3.bf16.msra.mxu1 %v520_v40 }
  0x1d   :  { %522 = vmatprep.subr.bf16.mxu1 %v586_v3  ;;  %497 = vmatpush3.bf16.msra.mxu0 %v496_v45 }
  0x1e   :  { %498 = vmatprep.subr.bf16.mxu0 %v586_v3 }
  0x20   :  { %524 = vmatpush3.bf16.msra.mxu1 %v523_v46 }
  0x21   :  { %500 = vmatpush3.bf16.msra.mxu0 %v499_v49 }
  0x22   :  { %525 = vmatprep.subr.bf16.mxu0 %v586_v3 }
  0x23   :  { %464 = vmatmul.mubr.f32.vlgmr.msra.gmra.mrb[0].mxu1 %v35_v50 }
  0x24   :  { %429 = vmatmul.mubr.f32.vlgmr.msra.gmra.mrb[0].mxu0 %v35_v50 }
  0x25   :  { %474 = vmatprep.mubr.msk.f32.mxu0 %vm587_vm0, %v588_v7  ;;  %527 = vmatpush3.bf16.msra.mxu0 %v526_v53 }
  0x26   :  { %528 = vmatprep.subr.bf16.mxu0 %v586_v3  ;;  %v222_v3 = vld [vmem:[%s839_s7] sm:$0xff] }
  0x29   :  { %530 = vmatpush3.bf16.msra.mxu0 %v529_v56 }
  0xf6   :  { %v218_v58 = vpop.f32.mrb[0].mxu1 }
  0xf7   :  { %v219_v59 = vadd.f32 %v354_v57, %v218_v58  ;;  %v465_v60 = vpop.f32.mrb[1].mxu1  ;;  %v125_v63 = vpop.f32.mrb[0].mxu0 }
  0xf8   :  { %v126_v0 = vadd.f32 %v353_v61, %v125_v63  ;;  %v430_v1 = vpop.f32.mrb[1].mxu0 }
  0xf9   :  { %v223_v62 = vmul.f32 0.5, %v219_v59  ;;  %230 = vst.msk [vmem:[#allocation4] sm:$0xff] %vm228_vm1, %v219_v59 }
  0xfa   :  { %229 = vst.msk [vmem:[#allocation2] sm:$0xff] %vm228_vm1, %v126_v0 }
  0xfb   :  { %v224_v2 = vmul.f32 1.442695, %v223_v62 }
  0xfd   :  { %536 = vpow2.f32 %v224_v2 }
 0x107   :  { %v537_v4 = vpop.eup %536 }
 0x108   :  { %v226_v5 = vmul.f32 %v537_v4, %v222_v3 }
 0x10a   :  { %v227_v6 = vadd.f32 %v226_v5, %v126_v0 }
 0x10c   :  { %231 = vst.msk [vmem:[%s842_s10] sm:$0xff] %vm228_vm1, %v227_v6  ;;  %475 = vmatmul.mubr.msk.f32.vlgmr.msra.gmra.mrb[2].mxu0 %vm228_vm1, %v227_v6 }
 0x10d   :  { %549 = shalt.err (!%p546_p4)
}
 0x10e   :  { %s550_s23 = scalar_lea.hbm %s840_s8, 128 }
 0x10f   :  { %p551_p5 = scmp.ne.s32.totalorder %s840_s8, %s550_s23  ;;  %p554_p6 = scmp.lt.u32.totalorder %s550_s23, %s840_s8 }
 0x111   :  { %p556_p7 = pnand %p554_p6, %p551_p5 }
 0x113   :  { %559 = shalt.err (!%p556_p7)
}
 0x114   :  { %326 = dma.vmem_to_hbm [thread:$0]  %s324_s18, 128, %s840_s8, [#allocation3]  }
 0x115   :  { %s560_s27 = scalar_lea.vmem %s334_s20, 128  ;;  %p565_p9 = scmp.lt.s32.totalorder %s334_s20, %s334_s20 }
 0x116   :  { %p561_p8 = scmp.ne.s32.totalorder %s334_s20, %s560_s27  ;;  %p566_p10 = scmp.lt.s32.totalorder %s560_s27, %s560_s27 }
 0x118   :  { %p567_p11 = por %p566_p10, %p565_p9 }
 0x11a   :  { %p568_p12 = pnand %p567_p11, %p561_p8 }
 0x11c   :  { %571 = shalt.err (!%p568_p12)
}
 0x11d   :  { %s572_s29 = scalar_lea.hbm %s841_s9, 128 }
 0x11e   :  { %p573_p13 = scmp.ne.s32.totalorder %s841_s9, %s572_s29  ;;  %p576_p0 = scmp.lt.u32.totalorder %s572_s29, %s841_s9 }
 0x120   :  { %p578_p1 = pnand %p576_p0, %p573_p13 }
 0x122   :  { %581 = shalt.err (!%p578_p1)
}
 0x123   :  { %336 = dma.vmem_to_hbm [thread:$0]  %s334_s20, 128, %s841_s9, [#allocation5]   ;;  %v355_v7 = vld [vmem:[%s838_s6] ss:$0 sm:$0xff] }
 0x1df   :  { %v312_v8 = vpop.f32.mrb[2].mxu0 }
 0x1e0   :  { %v313_v9 = vadd.f32 %v355_v7, %v312_v8  ;;  %v476_v10 = vpop.f32.mrb[3].mxu0 }
 0x1e2   :  { %316 = vst [vmem:[%s843_s11] sm:$0xff] %v313_v9 }
 0x1e3   :  { %582 = dma.done.wait [#allocation3], 128  }
 0x1e4   :  { %583 = vsyncadd [#allocation3], 4294967168 }
 0x1e5   :  { %584 = dma.done.wait [#allocation5], 128  }
 0x1e6   :  { %585 = vsyncadd [#allocation5], 4294967168 }
 0x1e7   :  { %351 = vsyncpa [#allocation3], 1 }
 0x1e8   :  { %352 = vsyncpa [#allocation5], 1 }

// kernel: sentence_vae_forward.5
= control target key start
LH: loop header
LB: loop body
LE: loop exit
PB: predicated region body
PF: predicated region fallthrough
CT: control target
= control target key end

     0   :  { %v599_v1 = vmov 0   ;;  %vm108_vm0 = vcmask 261120   ;;  %v41_v17 = vlaneseq  ;;  %s903_s1 = inlined_call_operand.vmem [shape: bf16[32,384], index: 1, kind: input, shape index: {}]   ;;  %s904_s0 = inlined_call_operand.vmem [shape: bf16[64,32], index: 0, kind: input, shape index: {}]   ;;  %s905_s3 = inlined_call_operand.vmem [shape: bf16[32,384], index: 3, kind: input, shape index: {}]   ;;  %s906_s2 = inlined_call_operand.vmem [shape: f32[1,384], index: 2, kind: input, shape index: {}]   ;;  %s907_s5 = inlined_call_operand.vmem [shape: f32[64,384], index: 5, kind: output, shape index: {0}]   ;;  %s908_s4 = inlined_call_operand.vmem [shape: f32[1,384], index: 4, kind: input, shape index: {}]   ;;  %s909_s6 = inlined_call_operand.vmem [shape: f32[64,384], index: 6, kind: output, shape index: {1}]  }
   0x1   :  { %v579_v0 = vld [vmem:[%s903_s1 + $0x4] ss:$12 sps:$4 sm:$0xff]   ;;  %153 = vmatprep.mubr.bf16.mxu0 %v599_v1  ;;  %v581_v2 = vld [vmem:[%s903_s1 + $0x8] ss:$12 sps:$4 sm:$0xff]   ;;  %v582_v3 = vld [vmem:[%s903_s1] ss:$12 sps:$4 sm:$0xff]  }
   0x2   :  { %121 = vmatprep.subr.bf16.mxu0 %v579_v0  ;;  %554 = vmatprep.subr.bf16.mxu1 %v581_v2  ;;  %v583_v4 = vld [vmem:[%s903_s1 + $0x1c] ss:$12 sps:$4 sm:$0xff]   ;;  %v585_v5 = vld [vmem:[%s903_s1 + $0x20] ss:$12 sps:$4 sm:$0xff]   ;;  %v586_v6 = vld [vmem:[%s903_s1 + $0x18] ss:$12 sps:$4 sm:$0xff]  }
   0x3   :  { %122 = vmatpush1.bf16.msra.mxu0 %v582_v3  ;;  %555 = vmatpush3.bf16.msra.mxu1 %v581_v2  ;;  %v587_v7 = vld [vmem:[%s904_s0] sm:$0xff]   ;;  %v588_v8 = vld [vmem:[%s904_s0 + $0x8] sm:$0xff]   ;;  %v593_v12 = vld [vmem:[%s904_s0 + $0x10] sm:$0xff]   ;;  %v699_v18 = vshrl.u32 %v41_v17, 7 }
   0x4   :  { %123 = vmatprep.subr.bf16.mxu0 %v583_v4  ;;  %556 = vmatprep.subr.bf16.mxu1 %v585_v5  ;;  %v589_v9 = vld [vmem:[%s905_s3] ss:$12 sps:$4 sm:$0xff]   ;;  %v591_v10 = vld [vmem:[%s905_s3 + $0x4] ss:$12 sps:$4 sm:$0xff]   ;;  %v592_v11 = vld [vmem:[%s905_s3 + $0x8] ss:$12 sps:$4 sm:$0xff]  }
   0x5   :  { %558 = vmatprep.mubr.msk.bf16.mxu1 %vm108_vm0, %v587_v7  ;;  %v595_v13 = vld [vmem:[%s905_s3 + $0x18] ss:$12 sps:$4 sm:$0xff]   ;;  %v597_v14 = vld [vmem:[%s905_s3 + $0x1c] ss:$12 sps:$4 sm:$0xff]   ;;  %v598_v15 = vld [vmem:[%s905_s3 + $0x20] ss:$12 sps:$4 sm:$0xff]  }
   0x6   :  { %v594_v16 = vld [vmem:[%s904_s0 + $0x18] sm:$0xff]   ;;  %v43_v19 = vsub.s32 0, %v699_v18  ;;  %v51_v20 = vsub.s32 2, %v699_v18  ;;  %v39_v21 = vld [vmem:[%s906_s2] sm:$0x7]  ;;  %v47_v22 = vsub.s32 1, %v699_v18 }
   0x7   :  { %124 = vmatpush1.bf16.msra.mxu0 %v586_v6  ;;  %557 = vmatpush3.bf16.msra.mxu1 %v585_v5  ;;  %v746_v52 = vld [vmem:[%s908_s4] sm:$0x7] }
   0x8   :  { %340 = vmatprep.subr.bf16.mxu1 %v591_v10  ;;  %566 = vmatprep.subr.bf16.mxu0 %v592_v11  ;;  %v707_v23 = vrot.slane %v39_v21, %v43_v19  ;;  %v52_v24 = vrot.slane %v39_v21, %v51_v20  ;;  %v711_v25 = vrot.slane %v39_v21, %v47_v22 }
   0x9   :  { %v769_v59 = vrot.slane %v746_v52, %v43_v19  ;;  %v778_v60 = vrot.slane %v746_v52, %v47_v22 }
   0xa   :  { %520 = vmatmul.mubr.msk.bf16.vlgmr.msra.gmra.mrb[0].mxu0 %vm108_vm0, %v587_v7  ;;  %559 = vmatmul.mubr.msk.bf16.vlgmr.msra.gmra.mrb[0].mxu1 %vm108_vm0, %v588_v8 }
   0xb   :  { %341 = vmatpush1.bf16.msra.mxu1 %v589_v9  ;;  %567 = vmatpush3.bf16.msra.mxu0 %v592_v11 }
   0xc   :  { %163 = vmatprep.mubr.bf16.mxu0 %v599_v1  ;;  %562 = vmatprep.mubr.msk.bf16.mxu1 %vm108_vm0, %v593_v12 }
   0xd   :  { %342 = vmatprep.subr.bf16.mxu1 %v597_v14  ;;  %568 = vmatprep.subr.bf16.mxu0 %v598_v15 }
   0xf   :  { %343 = vmatpush1.bf16.msra.mxu1 %v595_v13  ;;  %569 = vmatpush3.bf16.msra.mxu0 %v598_v15 }
  0x12   :  { %521 = vmatmul.mubr.msk.bf16.gmra.mrb[4].mxu0 %vm108_vm0, %v588_v8  ;;  %563 = vmatmul.mubr.msk.bf16.gmra.mrb[4].mxu1 %vm108_vm0, %v594_v16 }
  0x13   :  { %173 = vmatprep.mubr.bf16.mxu0 %v599_v1  ;;  %372 = vmatprep.mubr.bf16.mxu1 %v599_v1 }
  0x1a   :  { %522 = vmatmul.mubr.msk.bf16.gmra.mrb[8].mxu0 %vm108_vm0, %v593_v12  ;;  %534 = vmatmul.mubr.msk.bf16.vlgmr.msra.gmra.mrb[8].mxu1 %vm108_vm0, %v587_v7 }
  0x1b   :  { %183 = vmatprep.mubr.bf16.mxu0 %v599_v1  ;;  %382 = vmatprep.mubr.bf16.mxu1 %v599_v1 }
  0x22   :  { %523 = vmatmul.mubr.msk.bf16.gmra.mrb[12].mxu0 %vm108_vm0, %v594_v16  ;;  %535 = vmatmul.mubr.msk.bf16.gmra.mrb[12].mxu1 %vm108_vm0, %v588_v8 }
  0x23   :  { %392 = vmatprep.mubr.bf16.mxu1 %v599_v1  ;;  %570 = vmatprep.mubr.msk.bf16.mxu0 %vm108_vm0, %v587_v7 }
  0x2a   :  { %536 = vmatmul.mubr.msk.bf16.gmra.mrb[16].mxu1 %vm108_vm0, %v593_v12  ;;  %571 = vmatmul.mubr.msk.bf16.vlgmr.msra.gmra.mrb[16].mxu0 %vm108_vm0, %v588_v8 }
  0x2b   :  { %402 = vmatprep.mubr.bf16.mxu1 %v599_v1  ;;  %574 = vmatprep.mubr.msk.bf16.mxu0 %vm108_vm0, %v593_v12 }
  0x32   :  { %537 = vmatmul.mubr.msk.bf16.gmra.mrb[20].mxu1 %vm108_vm0, %v594_v16  ;;  %575 = vmatmul.mubr.msk.bf16.gmra.mrb[20].mxu0 %vm108_vm0, %v594_v16 }
  0xdd   :  { %v155_v26 = vpop.f32.mrb[0].mxu0  ;;  %v560_v27 = vpop.f32.mrb[0].mxu1 }
  0xde   :  { %v156_v28 = vadd.f32 %v155_v26, %v707_v23  ;;  %v237_v29 = vadd.f32 %v560_v27, %v52_v24  ;;  %v157_v30 = vpop.f32.mrb[1].mxu0  ;;  %v228_v31 = vpop.f32.mrb[1].mxu1 }
  0xdf   :  { %v158_v32 = vadd.f32 %v157_v30, %v711_v25  ;;  %v229_v33 = vadd.f32 %v228_v31, %v52_v24  ;;  %v159_v34 = vpop.f32.mrb[2].mxu0  ;;  %v561_v35 = vpop.f32.mrb[2].mxu1 }
  0xe0   :  { %259 = vst [vmem:[%s907_s5] sm:$0xff] %v156_v28  ;;  %267 = vst [vmem:[%s907_s5 + $0x40] sm:$0xff] %v237_v29  ;;  %v160_v36 = vadd.f32 %v159_v34, %v707_v23  ;;  %v240_v37 = vadd.f32 %v561_v35, %v52_v24  ;;  %v161_v38 = vpop.f32.mrb[3].mxu0  ;;  %v231_v39 = vpop.f32.mrb[3].mxu1 }
  0xe1   :  { %260 = vst [vmem:[%s907_s5 + $0x8] sm:$0xff] %v158_v32  ;;  %261 = vst [vmem:[%s907_s5 + $0x10] sm:$0xff] %v229_v33  ;;  %v162_v40 = vadd.f32 %v161_v38, %v711_v25  ;;  %v232_v41 = vadd.f32 %v231_v39, %v52_v24 }
  0xe2   :  { %262 = vst [vmem:[%s907_s5 + $0x18] sm:$0xff] %v160_v36  ;;  %270 = vst [vmem:[%s907_s5 + $0x58] sm:$0xff] %v240_v37 }
  0xe3   :  { %263 = vst [vmem:[%s907_s5 + $0x20] sm:$0xff] %v162_v40  ;;  %264 = vst [vmem:[%s907_s5 + $0x28] sm:$0xff] %v232_v41 }
  0xe5   :  { %v165_v42 = vpop.f32.mrb[4].mxu0  ;;  %v564_v43 = vpop.f32.mrb[4].mxu1 }
  0xe6   :  { %v166_v44 = vadd.f32 %v165_v42, %v707_v23  ;;  %v253_v45 = vadd.f32 %v564_v43, %v52_v24  ;;  %v167_v46 = vpop.f32.mrb[5].mxu0  ;;  %v244_v47 = vpop.f32.mrb[5].mxu1 }
  0xe7   :  { %v168_v48 = vadd.f32 %v167_v46, %v711_v25  ;;  %v245_v49 = vadd.f32 %v244_v47, %v52_v24  ;;  %v169_v50 = vpop.f32.mrb[6].mxu0  ;;  %v565_v51 = vpop.f32.mrb[6].mxu1 }
  0xe8   :  { %265 = vst [vmem:[%s907_s5 + $0x30] sm:$0xff] %v166_v44  ;;  %279 = vst [vmem:[%s907_s5 + $0xa0] sm:$0xff] %v253_v45  ;;  %v170_v53 = vadd.f32 %v169_v50, %v707_v23  ;;  %v256_v54 = vadd.f32 %v565_v51, %v52_v24  ;;  %v171_v55 = vpop.f32.mrb[7].mxu0  ;;  %v247_v56 = vpop.f32.mrb[7].mxu1 }
  0xe9   :  { %266 = vst [vmem:[%s907_s5 + $0x38] sm:$0xff] %v168_v48  ;;  %273 = vst [vmem:[%s907_s5 + $0x70] sm:$0xff] %v245_v49  ;;  %v172_v57 = vadd.f32 %v171_v55, %v711_v25  ;;  %v248_v58 = vadd.f32 %v247_v56, %v52_v24 }
  0xea   :  { %268 = vst [vmem:[%s907_s5 + $0x48] sm:$0xff] %v170_v53  ;;  %282 = vst [vmem:[%s907_s5 + $0xb8] sm:$0xff] %v256_v54 }
  0xeb   :  { %269 = vst [vmem:[%s907_s5 + $0x50] sm:$0xff] %v172_v57  ;;  %276 = vst [vmem:[%s907_s5 + $0x88] sm:$0xff] %v248_v58 }
  0xed   :  { %v175_v61 = vpop.f32.mrb[8].mxu0  ;;  %v374_v62 = vpop.f32.mrb[8].mxu1 }
  0xee   :  { %v176_v63 = vadd.f32 %v175_v61, %v707_v23  ;;  %v375_v0 = vadd.f32 %v374_v62, %v769_v59  ;;  %v177_v1 = vpop.f32.mrb[9].mxu0  ;;  %v376_v2 = vpop.f32.mrb[9].mxu1 }
  0xef   :  { %v178_v3 = vadd.f32 %v177_v1, %v711_v25  ;;  %v377_v4 = vadd.f32 %v376_v2, %v778_v60  ;;  %v179_v5 = vpop.f32.mrb[10].mxu0  ;;  %v378_v6 = vpop.f32.mrb[10].mxu1 }
  0xf0   :  { %271 = vst [vmem:[%s907_s5 + $0x60] sm:$0xff] %v176_v63  ;;  %478 = vst [vmem:[%s909_s6] sm:$0xff] %v375_v0  ;;  %v180_v7 = vadd.f32 %v179_v5, %v707_v23  ;;  %v379_v8 = vadd.f32 %v378_v6, %v769_v59  ;;  %v181_v9 = vpop.f32.mrb[11].mxu0  ;;  %v380_v10 = vpop.f32.mrb[11].mxu1 }
  0xf1   :  { %272 = vst [vmem:[%s907_s5 + $0x68] sm:$0xff] %v178_v3  ;;  %479 = vst [vmem:[%s909_s6 + $0x8] sm:$0xff] %v377_v4  ;;  %v182_v11 = vadd.f32 %v181_v9, %v711_v25  ;;  %v381_v12 = vadd.f32 %v380_v10, %v778_v60 }
  0xf2   :  { %274 = vst [vmem:[%s907_s5 + $0x78] sm:$0xff] %v180_v7  ;;  %481 = vst [vmem:[%s909_s6 + $0x18] sm:$0xff] %v379_v8 }
  0xf3   :  { %275 = vst [vmem:[%s907_s5 + $0x80] sm:$0xff] %v182_v11  ;;  %482 = vst [vmem:[%s909_s6 + $0x20] sm:$0xff] %v381_v12 }
  0xf5   :  { %v185_v13 = vpop.f32.mrb[12].mxu0  ;;  %v384_v14 = vpop.f32.mrb[12].mxu1 }
  0xf6   :  { %v186_v15 = vadd.f32 %v185_v13, %v707_v23  ;;  %v385_v16 = vadd.f32 %v384_v14, %v769_v59  ;;  %v187_v17 = vpop.f32.mrb[13].mxu0  ;;  %v386_v19 = vpop.f32.mrb[13].mxu1 }
  0xf7   :  { %v188_v21 = vadd.f32 %v187_v17, %v711_v25  ;;  %v387_v22 = vadd.f32 %v386_v19, %v778_v60  ;;  %v189_v24 = vpop.f32.mrb[14].mxu0  ;;  %v388_v26 = vpop.f32.mrb[14].mxu1 }
  0xf8   :  { %277 = vst [vmem:[%s907_s5 + $0x90] sm:$0xff] %v186_v15  ;;  %484 = vst [vmem:[%s909_s6 + $0x30] sm:$0xff] %v385_v16  ;;  %v190_v27 = vadd.f32 %v189_v24, %v707_v23  ;;  %v389_v28 = vadd.f32 %v388_v26, %v769_v59  ;;  %v191_v29 = vpop.f32.mrb[15].mxu0  ;;  %v390_v30 = vpop.f32.mrb[15].mxu1  ;;  %v304_v23 = vrot.slane %v746_v52, %v51_v20 }
  0xf9   :  { %278 = vst [vmem:[%s907_s5 + $0x98] sm:$0xff] %v188_v21  ;;  %485 = vst [vmem:[%s909_s6 + $0x38] sm:$0xff] %v387_v22  ;;  %v192_v31 = vadd.f32 %v191_v29, %v711_v25  ;;  %v391_v32 = vadd.f32 %v390_v30, %v778_v60 }
  0xfa   :  { %280 = vst [vmem:[%s907_s5 + $0xa8] sm:$0xff] %v190_v27  ;;  %487 = vst [vmem:[%s909_s6 + $0x48] sm:$0xff] %v389_v28 }
  0xfb   :  { %281 = vst [vmem:[%s907_s5 + $0xb0] sm:$0xff] %v192_v31  ;;  %488 = vst [vmem:[%s909_s6 + $0x50] sm:$0xff] %v391_v32 }
  0xfd   :  { %v394_v25 = vpop.f32.mrb[16].mxu1  ;;  %v572_v33 = vpop.f32.mrb[16].mxu0 }
  0xfe   :  { %v395_v34 = vadd.f32 %v394_v25, %v769_v59  ;;  %v456_v35 = vadd.f32 %v572_v33, %v304_v23  ;;  %v396_v36 = vpop.f32.mrb[17].mxu1  ;;  %v447_v37 = vpop.f32.mrb[17].mxu0 }
  0xff   :  { %v397_v38 = vadd.f32 %v396_v36, %v778_v60  ;;  %v448_v18 = vadd.f32 %v447_v37, %v304_v23  ;;  %v398_v39 = vpop.f32.mrb[18].mxu1  ;;  %v573_v20 = vpop.f32.mrb[18].mxu0 }
 0x100   :  { %490 = vst [vmem:[%s909_s6 + $0x60] sm:$0xff] %v395_v34  ;;  %486 = vst [vmem:[%s909_s6 + $0x40] sm:$0xff] %v456_v35  ;;  %v399_v40 = vadd.f32 %v398_v39, %v769_v59  ;;  %v459_v41 = vadd.f32 %v573_v20, %v304_v23  ;;  %v400_v42 = vpop.f32.mrb[19].mxu1  ;;  %v450_v43 = vpop.f32.mrb[19].mxu0 }
 0x101   :  { %491 = vst [vmem:[%s909_s6 + $0x68] sm:$0xff] %v397_v38  ;;  %480 = vst [vmem:[%s909_s6 + $0x10] sm:$0xff] %v448_v18  ;;  %v401_v44 = vadd.f32 %v400_v42, %v778_v60  ;;  %v451_v45 = vadd.f32 %v450_v43, %v304_v23 }
 0x102   :  { %493 = vst [vmem:[%s909_s6 + $0x78] sm:$0xff] %v399_v40  ;;  %489 = vst [vmem:[%s909_s6 + $0x58] sm:$0xff] %v459_v41 }
 0x103   :  { %494 = vst [vmem:[%s909_s6 + $0x80] sm:$0xff] %v401_v44  ;;  %483 = vst [vmem:[%s909_s6 + $0x28] sm:$0xff] %v451_v45 }
 0x105   :  { %v404_v46 = vpop.f32.mrb[20].mxu1  ;;  %v576_v47 = vpop.f32.mrb[20].mxu0 }
 0x106   :  { %v405_v48 = vadd.f32 %v404_v46, %v769_v59  ;;  %v472_v49 = vadd.f32 %v576_v47, %v304_v23  ;;  %v406_v50 = vpop.f32.mrb[21].mxu1  ;;  %v463_v51 = vpop.f32.mrb[21].mxu0 }
 0x107   :  { %v407_v52 = vadd.f32 %v406_v50, %v778_v60  ;;  %v464_v53 = vadd.f32 %v463_v51, %v304_v23  ;;  %v408_v54 = vpop.f32.mrb[22].mxu1  ;;  %v577_v55 = vpop.f32.mrb[22].mxu0 }
 0x108   :  { %496 = vst [vmem:[%s909_s6 + $0x90] sm:$0xff] %v405_v48  ;;  %498 = vst [vmem:[%s909_s6 + $0xa0] sm:$0xff] %v472_v49  ;;  %v409_v56 = vadd.f32 %v408_v54, %v769_v59  ;;  %v475_v57 = vadd.f32 %v577_v55, %v304_v23  ;;  %v410_v58 = vpop.f32.mrb[23].mxu1  ;;  %v466_v61 = vpop.f32.mrb[23].mxu0 }
 0x109   :  { %497 = vst [vmem:[%s909_s6 + $0x98] sm:$0xff] %v407_v52  ;;  %492 = vst [vmem:[%s909_s6 + $0x70] sm:$0xff] %v464_v53  ;;  %v411_v62 = vadd.f32 %v410_v58, %v778_v60  ;;  %v467_v63 = vadd.f32 %v466_v61, %v304_v23 }
 0x10a   :  { %499 = vst [vmem:[%s909_s6 + $0xa8] sm:$0xff] %v409_v56  ;;  %501 = vst [vmem:[%s909_s6 + $0xb8] sm:$0xff] %v475_v57 }
 0x10b   :  { %500 = vst [vmem:[%s909_s6 + $0xb0] sm:$0xff] %v411_v62  ;;  %495 = vst [vmem:[%s909_s6 + $0x88] sm:$0xff] %v467_v63 }

// kernel: sentence_vae_forward.6
= control target key start
LH: loop header
LB: loop body
LE: loop exit
PB: predicated region body
PF: predicated region fallthrough
CT: control target
= control target key end

     0   :  { %v2462_v3 = vmov 0.0|0.0   ;;  %v2463_v4 = vmov 0.0   ;;  %vm2464_vm0 = vmmov 0   ;;  %v2465_v9 = vmov 0   ;;  %s3144_s3 = inlined_call_operand.vmem [shape: f32[128,384], index: 3, kind: input, shape index: {}]   ;;  %s3145_s1 = inlined_call_operand.vmem [shape: s32[8,1], index: 1, kind: input, shape index: {}]   ;;  %s3146_s2 = inlined_call_operand.vmem [shape: f32[8,128], index: 2, kind: input, shape index: {}]   ;;  %s3147_s4 = inlined_call_operand.vmem [shape: f32[1,384], index: 4, kind: input, shape index: {}]   ;;  %s3148_s0 = inlined_call_operand.vmem [shape: f32[8,8,384], index: 0, kind: input, shape index: {}]   ;;  %s3149_s5 = inlined_call_operand.vmem [shape: f32[8,128], index: 5, kind: output, shape index: {}]  }
   0x1   :  { %v21_v0 = vld [vmem:[%s3144_s3 + $0x8] sm:$0xff]  ;;  %v24_v1 = vld [vmem:[%s3144_s3 + $0x20] sm:$0xff]  ;;  %1960 = vmatprep.subr.bf16.mxu1 %v2462_v3  ;;  %154 = vmatprep.mubr.f32.mxu0 %v2463_v4  ;;  %v23_v6 = vld [vmem:[%s3144_s3 + $0x18] sm:$0xff] }
   0x2   :  { %v20_v2 = vld [vmem:[%s3144_s3] sm:$0xff]  ;;  %v2507_v5 = vpack.c.bf16 %v24_v1, %v21_v0  ;;  %v27_v7 = vld [vmem:[%s3144_s3 + $0x38] sm:$0xff]  ;;  %v30_v8 = vld [vmem:[%s3144_s3 + $0x50] sm:$0xff]  ;;  %1680 = vmatprep.mubr.msk.f32.mxu1 %vm2464_vm0, %v2463_v4  ;;  %2380 = vset.pattern.permute.xlu0 %v2465_v9 }
   0x3   :  { %v2521_v10 = vpack.c.bf16 %v23_v6, %v20_v2  ;;  %v2523_v11 = vpack.c.bf16 %v30_v8, %v27_v7  ;;  %v26_v12 = vld [vmem:[%s3144_s3 + $0x30] sm:$0xff]  ;;  %v29_v13 = vld [vmem:[%s3144_s3 + $0x48] sm:$0xff]  ;;  %2381 = vset.pattern.permute.xlu1 %v2465_v9  ;;  %v36_v15 = vld [vmem:[%s3144_s3 + $0x80] sm:$0xff] }
   0x4   :  { %v33_v14 = vld [vmem:[%s3144_s3 + $0x68] sm:$0xff]  ;;  %1929 = vmatprep.subr.bf16.mxu0 %v2507_v5  ;;  %v2540_v16 = vpack.c.bf16 %v29_v13, %v26_v12  ;;  %v32_v18 = vld [vmem:[%s3144_s3 + $0x60] sm:$0xff]  ;;  %v35_v19 = vld [vmem:[%s3144_s3 + $0x78] sm:$0xff] }
   0x5   :  { %1931 = vmatpush1.bf16.msra.mxu0 %v2521_v10  ;;  %v2543_v17 = vpack.c.bf16 %v36_v15, %v33_v14  ;;  %v39_v20 = vld [vmem:[%s3144_s3 + $0x98] sm:$0xff]  ;;  %v42_v21 = vld [vmem:[%s3144_s3 + $0xb0] sm:$0xff]  ;;  %v2558_v22 = vpack.c.bf16 %v35_v19, %v32_v18  ;;  %v41_v25 = vld [vmem:[%s3144_s3 + $0xa8] sm:$0xff] }
   0x6   :  { %1933 = vmatprep.subr.bf16.mxu0 %v2523_v11  ;;  %v2561_v23 = vpack.c.bf16 %v42_v21, %v39_v20  ;;  %v38_v24 = vld [vmem:[%s3144_s3 + $0x90] sm:$0xff]  ;;  %v45_v26 = vld [vmem:[%s3144_s3 + $0xc8] sm:$0xff]  ;;  %v48_v27 = vld [vmem:[%s3144_s3 + $0xe0] sm:$0xff] }
   0x7   :  { %v22_v28 = vld [vmem:[%s3144_s3 + $0x10] sm:$0xff]  ;;  %v25_v29 = vld [vmem:[%s3144_s3 + $0x28] sm:$0xff]  ;;  %v28_v31 = vld [vmem:[%s3144_s3 + $0x40] sm:$0xff]  ;;  %v2587_v32 = vpack.c.bf16 %v41_v25, %v38_v24  ;;  %v2593_v34 = vpack.c.bf16 %v48_v27, %v45_v26  ;;  %v75_v27 = vlaneseq }
   0x8   :  { %v2581_v30 = vpack.c.bf16 %v25_v29, %v22_v28  ;;  %v31_v33 = vld [vmem:[%s3144_s3 + $0x58] sm:$0xff]  ;;  %v44_v35 = vld [vmem:[%s3144_s3 + $0xc0] sm:$0xff]  ;;  %v54_v39 = vld [vmem:[%s3144_s3 + $0x110] sm:$0xff] }
   0x9   :  { %1935 = vmatpush1.bf16.msra.mxu0 %v2540_v16  ;;  %v47_v36 = vld [vmem:[%s3144_s3 + $0xd8] sm:$0xff]  ;;  %v2605_v38 = vpack.c.bf16 %v31_v33, %v28_v31  ;;  %v34_v40 = vld [vmem:[%s3144_s3 + $0x70] sm:$0xff]  ;;  %v37_v41 = vld [vmem:[%s3144_s3 + $0x88] sm:$0xff]  ;;  %v76_v28 = vshrl.u32 %v75_v27, 7 }
   0xa   :  { %1937 = vmatprep.subr.bf16.mxu0 %v2543_v17  ;;  %v51_v37 = vld [vmem:[%s3144_s3 + $0xf8] sm:$0xff]  ;;  %1962 = vmatpush3.bf16.msra.mxu1 %v2581_v30  ;;  %v2618_v42 = vpack.c.bf16 %v47_v36, %v44_v35  ;;  %v2623_v43 = vld [vmem:[%s3145_s1] sm:$0xff]  ;;  %v50_v45 = vld [vmem:[%s3144_s3 + $0xf0] sm:$0xff]  ;;  %v2638_v48 = vpack.c.bf16 %v37_v41, %v34_v40 }
   0xb   :  { %1963 = vmatprep.subr.bf16.mxu1 %v2462_v3  ;;  %v2626_v44 = vpack.c.bf16 %v54_v39, %v51_v37  ;;  %v53_v46 = vld [vmem:[%s3144_s3 + $0x108] sm:$0xff]  ;;  %vm252_vm1 = vcmp.gt.s32.totalorder %v2623_v43, 0  ;;  %vm425_vm2 = vcmp.gt.s32.totalorder %v2623_v43, 1  ;;  %v60_v49 = vld [vmem:[%s3144_s3 + $0x140] sm:$0xff]  ;;  %v43_v51 = vld [vmem:[%s3144_s3 + $0xb8] sm:$0xff]  ;;  %vm944_vm3 = vcmp.gt.s32.totalorder %v2623_v43, 4 }
   0xc   :  { %v57_v47 = vld [vmem:[%s3144_s3 + $0x128] sm:$0xff]  ;;  %v40_v50 = vld [vmem:[%s3144_s3 + $0xa0] sm:$0xff]  ;;  %v253_v52 = vsel %vm252_vm1, 1, %v2465_v9  ;;  %v2654_v53 = vpack.c.bf16 %v53_v46, %v50_v45  ;;  %v426_v54 = vsel %vm425_vm2, 1, %v2465_v9  ;;  %v59_v57 = vld [vmem:[%s3144_s3 + $0x138] sm:$0xff]  ;;  %v945_v0 = vsel %vm944_vm3, 1, %v2465_v9 }
   0xd   :  { %1939 = vmatpush1.bf16.msra.mxu0 %v2558_v22  ;;  %255 = vperm.xlu0 %2380, %v253_v52   ;;  %v2658_v55 = vpack.c.bf16 %v60_v49, %v57_v47  ;;  %v56_v56 = vld [vmem:[%s3144_s3 + $0x120] sm:$0xff]  ;;  %v63_v58 = vld [vmem:[%s3144_s3 + $0x158] sm:$0xff]  ;;  %v2670_v59 = vpack.c.bf16 %v43_v51, %v40_v50  ;;  %v66_v60 = vld [vmem:[%s3144_s3 + $0x170] sm:$0xff]  ;;  %vm1290_vm4 = vcmp.gt.s32.totalorder %v2623_v43, 6  ;;  %v77_v29 = vsub.s32 0, %v76_v28 }
   0xe   :  { %1941 = vmatprep.subr.bf16.mxu0 %v2561_v23  ;;  %1965 = vmatpush3.bf16.msra.mxu1 %v2605_v38  ;;  %v46_v61 = vld [vmem:[%s3144_s3 + $0xd0] sm:$0xff]  ;;  %v49_v62 = vld [vmem:[%s3144_s3 + $0xe8] sm:$0xff]  ;;  %v2684_v63 = vpack.c.bf16 %v59_v57, %v56_v56  ;;  %v2688_v1 = vpack.c.bf16 %v66_v60, %v63_v58  ;;  %v52_v8 = vld [vmem:[%s3144_s3 + $0x100] sm:$0xff]  ;;  %v1291_v14 = vsel %vm1290_vm4, 1, %v2465_v9  ;;  %v81_v33 = vsub.s32 1, %v76_v28 }
   0xf   :  { %1966 = vmatprep.subr.bf16.mxu1 %v2462_v3  ;;  %v62_v2 = vld [vmem:[%s3144_s3 + $0x150] sm:$0xff]  ;;  %v65_v6 = vld [vmem:[%s3144_s3 + $0x168] sm:$0xff]  ;;  %v2697_v7 = vpack.c.bf16 %v49_v62, %v46_v61  ;;  %v55_v12 = vld [vmem:[%s3144_s3 + $0x118] sm:$0xff]  ;;  %v85_v58 = vsub.s32 2, %v76_v28  ;;  %vm598_vm6 = vcmp.gt.s32.totalorder %v2623_v43, 2  ;;  %vm771_vm7 = vcmp.gt.s32.totalorder %v2623_v43, 3 }
  0x10   :  { %v2708_v13 = vpack.c.bf16 %v65_v6, %v62_v2  ;;  %v2713_v15 = vpack.c.bf16 %v55_v12, %v52_v8  ;;  %v58_v18 = vld [vmem:[%s3144_s3 + $0x130] sm:$0xff]  ;;  %v61_v19 = vld [vmem:[%s3144_s3 + $0x148] sm:$0xff]  ;;  %v2726_v20 = vld [vmem:[%s3146_s2] sm:$0xff]  ;;  %vm1117_vm8 = vcmp.gt.s32.totalorder %v2623_v43, 5  ;;  %vm1463_vm9 = vcmp.gt.s32.totalorder %v2623_v43, 7 }
  0x11   :  { %1943 = vmatpush1.bf16.msra.mxu0 %v2587_v32  ;;  %428 = vperm.xlu0 %2380, %v426_v54   ;;  %v2729_v21 = vpack.c.bf16 %v61_v19, %v58_v18  ;;  %v64_v24 = vld [vmem:[%s3144_s3 + $0x160] sm:$0xff]  ;;  %v67_v25 = vld [vmem:[%s3144_s3 + $0x178] sm:$0xff]  ;;  %v72_v47 = vld [vmem:[%s3148_s0 + $0x8] sm:$0xff] }
  0x12   :  { %1945 = vmatprep.subr.bf16.mxu0 %v2593_v34  ;;  %1968 = vmatpush3.bf16.msra.mxu1 %v2638_v48  ;;  %v2743_v26 = vpack.c.bf16 %v67_v25, %v64_v24  ;;  %v68_v31 = vld [vmem:[%s3147_s4] sm:$0x7]  ;;  %v73_v6 = vld [vmem:[%s3148_s0 + $0x10] sm:$0xff] }
  0x13   :  { %1969 = vmatprep.subr.bf16.mxu1 %v2462_v3  ;;  %v2785_v35 = vrot.slane %v68_v31, %v77_v29  ;;  %v2787_v36 = vrot.slane %v68_v31, %v81_v33  ;;  %v71_v37 = vld [vmem:[%s3148_s0] sm:$0xff]  ;;  %v2797_v60 = vrot.slane %v68_v31, %v85_v58  ;;  %v772_v31 = vsel %vm771_vm7, 1, %v2465_v9 }
  0x14   :  { %v1118_v33 = vsel %vm1117_vm8, 1, %v2465_v9  ;;  %v1478_v43 = vld [vmem:[%s3148_s0 + $0x20] sm:$0xff] }
  0x15   :  { %1947 = vmatpush1.bf16.msra.mxu0 %v2618_v42  ;;  %947 = vperm.xlu0 %2380, %v945_v0  }
  0x16   :  { %1949 = vmatprep.subr.bf16.mxu0 %v2626_v44  ;;  %1971 = vmatpush3.bf16.msra.mxu1 %v2670_v59 }
  0x17   :  { %1972 = vmatprep.subr.bf16.mxu1 %v2462_v3 }
  0x19   :  { %1951 = vmatpush1.bf16.msra.mxu0 %v2654_v53  ;;  %1293 = vperm.xlu0 %2380, %v1291_v14  }
  0x1a   :  { %1953 = vmatprep.subr.bf16.mxu0 %v2658_v55  ;;  %1974 = vmatpush3.bf16.msra.mxu1 %v2697_v7 }
  0x1b   :  { %1975 = vmatprep.subr.bf16.mxu1 %v2462_v3 }
  0x1d   :  { %1955 = vmatpush1.bf16.msra.mxu0 %v2684_v63 }
  0x1e   :  { %1957 = vmatprep.subr.bf16.mxu0 %v2688_v1  ;;  %1977 = vmatpush3.bf16.msra.mxu1 %v2713_v15 }
  0x1f   :  { %1978 = vmatprep.subr.bf16.mxu1 %v2462_v3 }
  0x21   :  { %1959 = vmatpush1.bf16.msra.mxu0 %v2708_v13 }
  0x22   :  { %1985 = vmatprep.subr.bf16.mxu0 %v2507_v5  ;;  %1980 = vmatpush3.bf16.msra.mxu1 %v2729_v21 }
  0x23   :  { %1981 = vmatprep.subr.bf16.mxu1 %v2462_v3 }
  0x24   :  { %155 = vmatmul.mubr.f32.vlgmr.msra.gmra.mrb[0].mxu0 %v2726_v20 }
  0x25   :  { %1987 = vmatpush1.bf16.msra.mxu0 %v2521_v10  ;;  %327 = vmatprep.mubr.f32.mxu0 %v2463_v4 }
  0x26   :  { %1989 = vmatprep.subr.bf16.mxu0 %v2523_v11  ;;  %1983 = vmatpush3.bf16.msra.mxu1 %v2743_v26 }
  0x27   :  { %2016 = vmatprep.subr.bf16.mxu1 %v2462_v3 }
  0x29   :  { %1991 = vmatpush1.bf16.msra.mxu0 %v2540_v16  ;;  %1681 = vmatmul.mubr.f32.vlgmr.msra.gmra.mrb[0].mxu1 %v2726_v20 }
  0x2a   :  { %1993 = vmatprep.subr.bf16.mxu0 %v2543_v17  ;;  %2018 = vmatpush3.bf16.msra.mxu1 %v2581_v30 }
  0x2b   :  { %2019 = vmatprep.subr.bf16.mxu1 %v2462_v3  ;;  %1715 = vmatprep.mubr.msk.f32.mxu1 %vm2464_vm0, %v2463_v4 }
  0x2d   :  { %1995 = vmatpush1.bf16.msra.mxu0 %v2558_v22 }
  0x2e   :  { %1997 = vmatprep.subr.bf16.mxu0 %v2561_v23  ;;  %2021 = vmatpush3.bf16.msra.mxu1 %v2605_v38 }
  0x2f   :  { %2022 = vmatprep.subr.bf16.mxu1 %v2462_v3 }
  0x31   :  { %1999 = vmatpush1.bf16.msra.mxu0 %v2587_v32 }
  0x32   :  { %2001 = vmatprep.subr.bf16.mxu0 %v2593_v34  ;;  %2024 = vmatpush3.bf16.msra.mxu1 %v2638_v48 }
  0x33   :  { %2025 = vmatprep.subr.bf16.mxu1 %v2462_v3 }
  0x35   :  { %2003 = vmatpush1.bf16.msra.mxu0 %v2618_v42 }
  0x36   :  { %2005 = vmatprep.subr.bf16.mxu0 %v2626_v44  ;;  %2027 = vmatpush3.bf16.msra.mxu1 %v2670_v59 }
  0x37   :  { %2028 = vmatprep.subr.bf16.mxu1 %v2462_v3 }
  0x39   :  { %2007 = vmatpush1.bf16.msra.mxu0 %v2654_v53 }
  0x3a   :  { %2009 = vmatprep.subr.bf16.mxu0 %v2658_v55  ;;  %2030 = vmatpush3.bf16.msra.mxu1 %v2697_v7 }
  0x3b   :  { %2031 = vmatprep.subr.bf16.mxu1 %v2462_v3 }
  0x3d   :  { %2011 = vmatpush1.bf16.msra.mxu0 %v2684_v63 }
  0x3e   :  { %2013 = vmatprep.subr.bf16.mxu0 %v2688_v1  ;;  %2033 = vmatpush3.bf16.msra.mxu1 %v2713_v15 }
  0x3f   :  { %2034 = vmatprep.subr.bf16.mxu1 %v2462_v3 }
  0x41   :  { %2015 = vmatpush1.bf16.msra.mxu0 %v2708_v13 }
  0x42   :  { %2041 = vmatprep.subr.bf16.mxu0 %v2507_v5  ;;  %2036 = vmatpush3.bf16.msra.mxu1 %v2729_v21 }
  0x43   :  { %2037 = vmatprep.subr.bf16.mxu1 %v2462_v3 }
  0x46   :  { %2039 = vmatpush3.bf16.msra.mxu1 %v2743_v26 }
  0x47   :  { %2072 = vmatprep.subr.bf16.mxu1 %v2462_v3 }
  0x8c   :  { %v256_v24 = vpop.permute.xlu0 %255 }
  0x8d   :  { %vm257_vm5 = vcmp.eq.s32.totalorder %v256_v24, 1 }
  0x90   :  { %v429_v24 = vpop.permute.xlu0 %428 }
  0x91   :  { %vm430_vm10 = vcmp.eq.s32.totalorder %v429_v24, 1 }
  0xf7   :  { %v156_v39 = vpop.f32.mrb[0].mxu0 }
  0xf8   :  { %v157_v40 = vadd.f32 %v156_v39, %v2785_v35  ;;  %v158_v41 = vpop.f32.mrb[1].mxu0  ;;  %v1477_v39 = vld [vmem:[%s3148_s0 + $0x18] sm:$0xff] }
  0xf9   :  { %v159_v45 = vadd.f32 %v158_v41, %v2787_v36 }
  0xfa   :  { %v231_v46 = vadd.f32 %v157_v40, %v71_v37  ;;  %v1464_v37 = vsel %vm1463_vm9, 1, %v2465_v9 }
  0xfb   :  { %v238_v50 = vadd.f32 %v159_v45, %v72_v47 }
  0xfc   :  { %v1475_v49 = vmul.f32 -1.442695, %v231_v46  ;;  %v227_v51 = vpop.f32.mrb[0].mxu1 }
  0xfd   :  { %v1476_v52 = vmul.f32 -1.442695, %v238_v50  ;;  %v1682_v54 = vpop.f32.mrb[1].mxu1  ;;  %v228_v0 = vadd.f32 %v227_v51, %v2797_v60 }
  0xfe   :  { %2382 = vpow2.f32 %v1475_v49 }
  0xff   :  { %2384 = vpow2.f32 %v1476_v52 }
 0x108   :  { %v2383_v56 = vpop.eup %2382 }
 0x109   :  { %v235_v57 = vadd.f32 1.0, %v2383_v56  ;;  %v2385_v61 = vpop.eup %2384 }
 0x10a   :  { %v242_v62 = vadd.f32 1.0, %v2385_v61 }
 0x10b   :  { %2386 = vrcp.f32 %v235_v57 }
 0x10c   :  { %2388 = vrcp.f32 %v242_v62 }
 0x115   :  { %v2387_v2 = vpop.eup %2386 }
 0x116   :  { %v245_v8 = vmul.f32 %v2387_v2, %v228_v0  ;;  %v2389_v14 = vpop.eup %2388  ;;  %v1479_v0 = vld [vmem:[%s3148_s0 + $0x28] sm:$0xff] }
 0x117   :  { %v248_v18 = vsub.f32 1.0, %v2389_v14  ;;  %v250_v27 = vmul.f32 %v2389_v14, %v2726_v20 }
 0x118   :  { %v246_v12 = vadd.f32 %v245_v8, %v73_v6 }
 0x11a   :  { %2390 = vtanh.f32 %v246_v12 }
 0x124   :  { %v2391_v19 = vpop.eup %2390 }
 0x125   :  { %v249_v25 = vmul.f32 %v2391_v19, %v248_v18 }
 0x127   :  { %v251_v28 = vadd.f32 %v250_v27, %v249_v25 }
 0x129   :  { %v2805_v29 = vsel %vm257_vm5, %v251_v28, %v2726_v20  ;;  %v599_v20 = vsel %vm598_vm6, 1, %v2465_v9  ;;  %v1482_v28 = vld [vmem:[%s3148_s0 + $0x30] sm:$0xff] }
 0x12a   :  { %328 = vmatmul.mubr.f32.vlgmr.msra.gmra.mrb[2].mxu0 %v2805_v29  ;;  %1716 = vmatmul.mubr.f32.vlgmr.msra.gmra.mrb[2].mxu1 %v2805_v29 }
 0x12b   :  { %2043 = vmatpush1.bf16.msra.mxu0 %v2521_v10  ;;  %2074 = vmatpush3.bf16.msra.mxu1 %v2581_v30 }
 0x12c   :  { %2045 = vmatprep.subr.bf16.mxu0 %v2523_v11  ;;  %2075 = vmatprep.subr.bf16.mxu1 %v2462_v3 }
 0x12d   :  { %500 = vmatprep.mubr.f32.mxu0 %v2463_v4  ;;  %1750 = vmatprep.mubr.msk.f32.mxu1 %vm2464_vm0, %v2463_v4 }
 0x12e   :  { %601 = vperm.xlu1 %2381, %v599_v20  }
 0x12f   :  { %2047 = vmatpush1.bf16.msra.mxu0 %v2540_v16  ;;  %2077 = vmatpush3.bf16.msra.mxu1 %v2605_v38 }
 0x130   :  { %2049 = vmatprep.subr.bf16.mxu0 %v2543_v17  ;;  %2078 = vmatprep.subr.bf16.mxu1 %v2462_v3 }
 0x132   :  { %774 = vperm.xlu1 %2381, %v772_v31  }
 0x133   :  { %2051 = vmatpush1.bf16.msra.mxu0 %v2558_v22  ;;  %2080 = vmatpush3.bf16.msra.mxu1 %v2638_v48 }
 0x134   :  { %2053 = vmatprep.subr.bf16.mxu0 %v2561_v23  ;;  %2081 = vmatprep.subr.bf16.mxu1 %v2462_v3 }
 0x136   :  { %1120 = vperm.xlu1 %2381, %v1118_v33  }
 0x137   :  { %2055 = vmatpush1.bf16.msra.mxu0 %v2587_v32  ;;  %2083 = vmatpush3.bf16.msra.mxu1 %v2670_v59 }
 0x138   :  { %2057 = vmatprep.subr.bf16.mxu0 %v2593_v34  ;;  %2084 = vmatprep.subr.bf16.mxu1 %v2462_v3 }
 0x13a   :  { %1466 = vperm.xlu1 %2381, %v1464_v37  }
 0x13b   :  { %2059 = vmatpush1.bf16.msra.mxu0 %v2618_v42  ;;  %2086 = vmatpush3.bf16.msra.mxu1 %v2697_v7 }
 0x13c   :  { %2061 = vmatprep.subr.bf16.mxu0 %v2626_v44  ;;  %2087 = vmatprep.subr.bf16.mxu1 %v2462_v3 }
 0x13f   :  { %2063 = vmatpush1.bf16.msra.mxu0 %v2654_v53  ;;  %2089 = vmatpush3.bf16.msra.mxu1 %v2713_v15 }
 0x140   :  { %2065 = vmatprep.subr.bf16.mxu0 %v2658_v55  ;;  %2090 = vmatprep.subr.bf16.mxu1 %v2462_v3 }
 0x143   :  { %2067 = vmatpush1.bf16.msra.mxu0 %v2684_v63  ;;  %2092 = vmatpush3.bf16.msra.mxu1 %v2729_v21 }
 0x144   :  { %2069 = vmatprep.subr.bf16.mxu0 %v2688_v1  ;;  %2093 = vmatprep.subr.bf16.mxu1 %v2462_v3 }
 0x147   :  { %2071 = vmatpush1.bf16.msra.mxu0 %v2708_v13  ;;  %2095 = vmatpush3.bf16.msra.mxu1 %v2743_v26 }
 0x148   :  { %2097 = vmatprep.subr.bf16.mxu0 %v2507_v5  ;;  %2128 = vmatprep.subr.bf16.mxu1 %v2462_v3 }
 0x1fd   :  { %v329_v40 = vpop.f32.mrb[2].mxu0  ;;  %v400_v41 = vpop.f32.mrb[2].mxu1 }
 0x1fe   :  { %v330_v45 = vadd.f32 %v329_v40, %v2785_v35  ;;  %v331_v46 = vpop.f32.mrb[3].mxu0  ;;  %v1717_v47 = vpop.f32.mrb[3].mxu1  ;;  %v401_v61 = vadd.f32 %v400_v41, %v2797_v60  ;;  %v1483_v41 = vld [vmem:[%s3148_s0 + $0x38] sm:$0xff] }
 0x1ff   :  { %v332_v49 = vadd.f32 %v331_v46, %v2787_v36 }
 0x200   :  { %v404_v50 = vadd.f32 %v1477_v39, %v330_v45 }
 0x201   :  { %v411_v9 = vadd.f32 %v1478_v43, %v332_v49 }
 0x202   :  { %v1480_v51 = vmul.f32 -1.442695, %v404_v50 }
 0x203   :  { %v1481_v52 = vmul.f32 -1.442695, %v411_v9 }
 0x204   :  { %2392 = vpow2.f32 %v1480_v51 }
 0x205   :  { %2394 = vpow2.f32 %v1481_v52 }
 0x20e   :  { %v2393_v54 = vpop.eup %2392 }
 0x20f   :  { %v408_v56 = vadd.f32 1.0, %v2393_v54  ;;  %v2395_v57 = vpop.eup %2394  ;;  %v1484_v54 = vld [vmem:[%s3148_s0 + $0x40] sm:$0xff] }
 0x210   :  { %v415_v58 = vadd.f32 1.0, %v2395_v57 }
 0x211   :  { %2396 = vrcp.f32 %v408_v56 }
 0x212   :  { %2398 = vrcp.f32 %v415_v58 }
 0x21b   :  { %v2397_v62 = vpop.eup %2396 }
 0x21c   :  { %v418_v2 = vmul.f32 %v2397_v62, %v401_v61  ;;  %v2399_v8 = vpop.eup %2398 }
 0x21d   :  { %v421_v12 = vsub.f32 1.0, %v2399_v8  ;;  %v423_v19 = vmul.f32 %v2399_v8, %v2805_v29 }
 0x21e   :  { %v419_v6 = vadd.f32 %v1479_v0, %v418_v2  ;;  %v602_v0 = vpop.permute.xlu1 %601 }
 0x21f   :  { %vm603_vm11 = vcmp.eq.s32.totalorder %v602_v0, 1 }
 0x220   :  { %2400 = vtanh.f32 %v419_v6 }
 0x22a   :  { %v2401_v14 = vpop.eup %2400 }
 0x22b   :  { %v422_v18 = vmul.f32 %v2401_v14, %v421_v12  ;;  %v1487_v14 = vld [vmem:[%s3148_s0 + $0x48] sm:$0xff] }
 0x22d   :  { %v424_v25 = vadd.f32 %v423_v19, %v422_v18 }
 0x22f   :  { %v2866_v27 = vsel %vm430_vm10, %v424_v25, %v2805_v29 }
 0x230   :  { %501 = vmatmul.mubr.f32.vlgmr.msra.gmra.mrb[4].mxu0 %v2866_v27  ;;  %1751 = vmatmul.mubr.f32.vlgmr.msra.gmra.mrb[4].mxu1 %v2866_v27 }
 0x231   :  { %2099 = vmatpush1.bf16.msra.mxu0 %v2521_v10  ;;  %2130 = vmatpush3.bf16.msra.mxu1 %v2581_v30 }
 0x232   :  { %2101 = vmatprep.subr.bf16.mxu0 %v2523_v11  ;;  %2131 = vmatprep.subr.bf16.mxu1 %v2462_v3 }
 0x233   :  { %673 = vmatprep.mubr.f32.mxu0 %v2463_v4  ;;  %1785 = vmatprep.mubr.msk.f32.mxu1 %vm2464_vm0, %v2463_v4 }
 0x235   :  { %2103 = vmatpush1.bf16.msra.mxu0 %v2540_v16  ;;  %2133 = vmatpush3.bf16.msra.mxu1 %v2605_v38 }
 0x236   :  { %2105 = vmatprep.subr.bf16.mxu0 %v2543_v17  ;;  %2134 = vmatprep.subr.bf16.mxu1 %v2462_v3 }
 0x239   :  { %2107 = vmatpush1.bf16.msra.mxu0 %v2558_v22  ;;  %2136 = vmatpush3.bf16.msra.mxu1 %v2638_v48 }
 0x23a   :  { %2109 = vmatprep.subr.bf16.mxu0 %v2561_v23  ;;  %2137 = vmatprep.subr.bf16.mxu1 %v2462_v3 }
 0x23d   :  { %2111 = vmatpush1.bf16.msra.mxu0 %v2587_v32  ;;  %2139 = vmatpush3.bf16.msra.mxu1 %v2670_v59 }
 0x23e   :  { %2113 = vmatprep.subr.bf16.mxu0 %v2593_v34  ;;  %2140 = vmatprep.subr.bf16.mxu1 %v2462_v3 }
 0x241   :  { %2115 = vmatpush1.bf16.msra.mxu0 %v2618_v42  ;;  %2142 = vmatpush3.bf16.msra.mxu1 %v2697_v7 }
 0x242   :  { %2117 = vmatprep.subr.bf16.mxu0 %v2626_v44  ;;  %2143 = vmatprep.subr.bf16.mxu1 %v2462_v3 }
 0x245   :  { %2119 = vmatpush1.bf16.msra.mxu0 %v2654_v53  ;;  %2145 = vmatpush3.bf16.msra.mxu1 %v2713_v15 }
 0x246   :  { %2121 = vmatprep.subr.bf16.mxu0 %v2658_v55  ;;  %2146 = vmatprep.subr.bf16.mxu1 %v2462_v3 }
 0x249   :  { %2123 = vmatpush1.bf16.msra.mxu0 %v2684_v63  ;;  %2148 = vmatpush3.bf16.msra.mxu1 %v2729_v21 }
 0x24a   :  { %2125 = vmatprep.subr.bf16.mxu0 %v2688_v1  ;;  %2149 = vmatprep.subr.bf16.mxu1 %v2462_v3 }
 0x24d   :  { %2127 = vmatpush1.bf16.msra.mxu0 %v2708_v13  ;;  %2151 = vmatpush3.bf16.msra.mxu1 %v2743_v26 }
 0x24e   :  { %2153 = vmatprep.subr.bf16.mxu0 %v2507_v5  ;;  %2184 = vmatprep.subr.bf16.mxu1 %v2462_v3 }
 0x303   :  { %v502_v29 = vpop.f32.mrb[4].mxu0  ;;  %v573_v20 = vpop.f32.mrb[4].mxu1 }
 0x304   :  { %v503_v31 = vadd.f32 %v502_v29, %v2785_v35  ;;  %v504_v33 = vpop.f32.mrb[5].mxu0  ;;  %v1752_v37 = vpop.f32.mrb[5].mxu1  ;;  %v574_v9 = vadd.f32 %v573_v20, %v2797_v60  ;;  %v1488_v20 = vld [vmem:[%s3148_s0 + $0x50] sm:$0xff] }
 0x305   :  { %v505_v39 = vadd.f32 %v504_v33, %v2787_v36 }
 0x306   :  { %v577_v40 = vadd.f32 %v1482_v28, %v503_v31 }
 0x307   :  { %v584_v46 = vadd.f32 %v1483_v41, %v505_v39 }
 0x308   :  { %v1485_v45 = vmul.f32 -1.442695, %v577_v40 }
 0x309   :  { %v1486_v47 = vmul.f32 -1.442695, %v584_v46 }
 0x30a   :  { %2402 = vpow2.f32 %v1485_v45 }
 0x30b   :  { %2404 = vpow2.f32 %v1486_v47 }
 0x314   :  { %v2403_v49 = vpop.eup %2402 }
 0x315   :  { %v581_v50 = vadd.f32 1.0, %v2403_v49  ;;  %v2405_v43 = vpop.eup %2404  ;;  %v1489_v49 = vld [vmem:[%s3148_s0 + $0x58] sm:$0xff] }
 0x316   :  { %v588_v51 = vadd.f32 1.0, %v2405_v43 }
 0x317   :  { %2406 = vrcp.f32 %v581_v50 }
 0x318   :  { %2408 = vrcp.f32 %v588_v51 }
 0x321   :  { %v2407_v52 = vpop.eup %2406 }
 0x322   :  { %v591_v56 = vmul.f32 %v2407_v52, %v574_v9  ;;  %v2409_v58 = vpop.eup %2408 }
 0x323   :  { %v594_v61 = vsub.f32 1.0, %v2409_v58  ;;  %v596_v6 = vmul.f32 %v2409_v58, %v2866_v27 }
 0x324   :  { %v592_v57 = vadd.f32 %v1484_v54, %v591_v56 }
 0x326   :  { %2410 = vtanh.f32 %v592_v57  ;;  %v775_v57 = vpop.permute.xlu1 %774 }
 0x327   :  { %vm776_vm12 = vcmp.eq.s32.totalorder %v775_v57, 1 }
 0x330   :  { %v2411_v62 = vpop.eup %2410 }
 0x331   :  { %v595_v2 = vmul.f32 %v2411_v62, %v594_v61  ;;  %v1492_v62 = vld [vmem:[%s3148_s0 + $0x60] sm:$0xff] }
 0x333   :  { %v597_v8 = vadd.f32 %v596_v6, %v595_v2 }
 0x335   :  { %v2919_v12 = vsel %vm603_vm11, %v597_v8, %v2866_v27 }
 0x336   :  { %674 = vmatmul.mubr.f32.vlgmr.msra.gmra.mrb[6].mxu0 %v2919_v12  ;;  %1786 = vmatmul.mubr.f32.vlgmr.msra.gmra.mrb[6].mxu1 %v2919_v12 }
 0x337   :  { %2155 = vmatpush1.bf16.msra.mxu0 %v2521_v10  ;;  %2186 = vmatpush3.bf16.msra.mxu1 %v2581_v30 }
 0x338   :  { %2157 = vmatprep.subr.bf16.mxu0 %v2523_v11  ;;  %2187 = vmatprep.subr.bf16.mxu1 %v2462_v3 }
 0x339   :  { %846 = vmatprep.mubr.f32.mxu0 %v2463_v4  ;;  %1820 = vmatprep.mubr.msk.f32.mxu1 %vm2464_vm0, %v2463_v4 }
 0x33b   :  { %2159 = vmatpush1.bf16.msra.mxu0 %v2540_v16  ;;  %2189 = vmatpush3.bf16.msra.mxu1 %v2605_v38 }
 0x33c   :  { %2161 = vmatprep.subr.bf16.mxu0 %v2543_v17  ;;  %2190 = vmatprep.subr.bf16.mxu1 %v2462_v3 }
 0x33f   :  { %2163 = vmatpush1.bf16.msra.mxu0 %v2558_v22  ;;  %2192 = vmatpush3.bf16.msra.mxu1 %v2638_v48 }
 0x340   :  { %2165 = vmatprep.subr.bf16.mxu0 %v2561_v23  ;;  %2193 = vmatprep.subr.bf16.mxu1 %v2462_v3 }
 0x343   :  { %2167 = vmatpush1.bf16.msra.mxu0 %v2587_v32  ;;  %2195 = vmatpush3.bf16.msra.mxu1 %v2670_v59 }
 0x344   :  { %2169 = vmatprep.subr.bf16.mxu0 %v2593_v34  ;;  %2196 = vmatprep.subr.bf16.mxu1 %v2462_v3 }
 0x347   :  { %2171 = vmatpush1.bf16.msra.mxu0 %v2618_v42  ;;  %2198 = vmatpush3.bf16.msra.mxu1 %v2697_v7 }
 0x348   :  { %2173 = vmatprep.subr.bf16.mxu0 %v2626_v44  ;;  %2199 = vmatprep.subr.bf16.mxu1 %v2462_v3 }
 0x34b   :  { %2175 = vmatpush1.bf16.msra.mxu0 %v2654_v53  ;;  %2201 = vmatpush3.bf16.msra.mxu1 %v2713_v15 }
 0x34c   :  { %2177 = vmatprep.subr.bf16.mxu0 %v2658_v55  ;;  %2202 = vmatprep.subr.bf16.mxu1 %v2462_v3 }
 0x34f   :  { %2179 = vmatpush1.bf16.msra.mxu0 %v2684_v63  ;;  %2204 = vmatpush3.bf16.msra.mxu1 %v2729_v21 }
 0x350   :  { %2181 = vmatprep.subr.bf16.mxu0 %v2688_v1  ;;  %2205 = vmatprep.subr.bf16.mxu1 %v2462_v3 }
 0x353   :  { %2183 = vmatpush1.bf16.msra.mxu0 %v2708_v13  ;;  %2207 = vmatpush3.bf16.msra.mxu1 %v2743_v26 }
 0x354   :  { %2209 = vmatprep.subr.bf16.mxu0 %v2507_v5  ;;  %2240 = vmatprep.subr.bf16.mxu1 %v2462_v3 }
 0x409   :  { %v675_v18 = vpop.f32.mrb[6].mxu0  ;;  %v746_v19 = vpop.f32.mrb[6].mxu1 }
 0x40a   :  { %v676_v24 = vadd.f32 %v675_v18, %v2785_v35  ;;  %v677_v25 = vpop.f32.mrb[7].mxu0  ;;  %v1787_v27 = vpop.f32.mrb[7].mxu1  ;;  %v747_v46 = vadd.f32 %v746_v19, %v2797_v60  ;;  %v1493_v19 = vld [vmem:[%s3148_s0 + $0x68] sm:$0xff] }
 0x40b   :  { %v678_v28 = vadd.f32 %v677_v25, %v2787_v36 }
 0x40c   :  { %v750_v29 = vadd.f32 %v1487_v14, %v676_v24 }
 0x40d   :  { %v757_v33 = vadd.f32 %v1488_v20, %v678_v28 }
 0x40e   :  { %v1490_v31 = vmul.f32 -1.442695, %v750_v29 }
 0x40f   :  { %v1491_v37 = vmul.f32 -1.442695, %v757_v33 }
 0x410   :  { %2412 = vpow2.f32 %v1490_v31 }
 0x411   :  { %2414 = vpow2.f32 %v1491_v37 }
 0x41a   :  { %v2413_v39 = vpop.eup %2412 }
 0x41b   :  { %v754_v40 = vadd.f32 1.0, %v2413_v39  ;;  %v2415_v41 = vpop.eup %2414  ;;  %v1494_v39 = vld [vmem:[%s3148_s0 + $0x70] sm:$0xff] }
 0x41c   :  { %v761_v45 = vadd.f32 1.0, %v2415_v41 }
 0x41d   :  { %2416 = vrcp.f32 %v754_v40 }
 0x41e   :  { %2418 = vrcp.f32 %v761_v45 }
 0x427   :  { %v2417_v47 = vpop.eup %2416 }
 0x428   :  { %v764_v50 = vmul.f32 %v2417_v47, %v747_v46  ;;  %v2419_v51 = vpop.eup %2418 }
 0x429   :  { %v767_v9 = vsub.f32 1.0, %v2419_v51  ;;  %v769_v56 = vmul.f32 %v2419_v51, %v2919_v12 }
 0x42a   :  { %v765_v43 = vadd.f32 %v1489_v49, %v764_v50 }
 0x42c   :  { %2420 = vtanh.f32 %v765_v43  ;;  %v948_v43 = vpop.permute.xlu0 %947 }
 0x42d   :  { %vm949_vm13 = vcmp.eq.s32.totalorder %v948_v43, 1  ;;  %v1507_v43 = vld [vmem:[%s3148_s0 + $0xa8] sm:$0xff] }
 0x436   :  { %v2421_v52 = vpop.eup %2420 }
 0x437   :  { %v768_v54 = vmul.f32 %v2421_v52, %v767_v9  ;;  %v1497_v52 = vld [vmem:[%s3148_s0 + $0x78] sm:$0xff] }
 0x439   :  { %v770_v58 = vadd.f32 %v769_v56, %v768_v54 }
 0x43b   :  { %v2972_v61 = vsel %vm776_vm12, %v770_v58, %v2919_v12 }
 0x43c   :  { %847 = vmatmul.mubr.f32.vlgmr.msra.gmra.mrb[8].mxu0 %v2972_v61  ;;  %1821 = vmatmul.mubr.f32.vlgmr.msra.gmra.mrb[8].mxu1 %v2972_v61 }
 0x43d   :  { %2211 = vmatpush1.bf16.msra.mxu0 %v2521_v10  ;;  %2242 = vmatpush3.bf16.msra.mxu1 %v2581_v30 }
 0x43e   :  { %2213 = vmatprep.subr.bf16.mxu0 %v2523_v11  ;;  %2243 = vmatprep.subr.bf16.mxu1 %v2462_v3 }
 0x43f   :  { %1019 = vmatprep.mubr.f32.mxu0 %v2463_v4  ;;  %1855 = vmatprep.mubr.msk.f32.mxu1 %vm2464_vm0, %v2463_v4 }
 0x441   :  { %2215 = vmatpush1.bf16.msra.mxu0 %v2540_v16  ;;  %2245 = vmatpush3.bf16.msra.mxu1 %v2605_v38 }
 0x442   :  { %2217 = vmatprep.subr.bf16.mxu0 %v2543_v17  ;;  %2246 = vmatprep.subr.bf16.mxu1 %v2462_v3 }
 0x445   :  { %2219 = vmatpush1.bf16.msra.mxu0 %v2558_v22  ;;  %2248 = vmatpush3.bf16.msra.mxu1 %v2638_v48 }
 0x446   :  { %2221 = vmatprep.subr.bf16.mxu0 %v2561_v23  ;;  %2249 = vmatprep.subr.bf16.mxu1 %v2462_v3 }
 0x449   :  { %2223 = vmatpush1.bf16.msra.mxu0 %v2587_v32  ;;  %2251 = vmatpush3.bf16.msra.mxu1 %v2670_v59 }
 0x44a   :  { %2225 = vmatprep.subr.bf16.mxu0 %v2593_v34  ;;  %2252 = vmatprep.subr.bf16.mxu1 %v2462_v3 }
 0x44d   :  { %2227 = vmatpush1.bf16.msra.mxu0 %v2618_v42  ;;  %2254 = vmatpush3.bf16.msra.mxu1 %v2697_v7 }
 0x44e   :  { %2229 = vmatprep.subr.bf16.mxu0 %v2626_v44  ;;  %2255 = vmatprep.subr.bf16.mxu1 %v2462_v3 }
 0x451   :  { %2231 = vmatpush1.bf16.msra.mxu0 %v2654_v53  ;;  %2257 = vmatpush3.bf16.msra.mxu1 %v2713_v15 }
 0x452   :  { %2233 = vmatprep.subr.bf16.mxu0 %v2658_v55  ;;  %2258 = vmatprep.subr.bf16.mxu1 %v2462_v3 }
 0x455   :  { %2235 = vmatpush1.bf16.msra.mxu0 %v2684_v63  ;;  %2260 = vmatpush3.bf16.msra.mxu1 %v2729_v21 }
 0x456   :  { %2237 = vmatprep.subr.bf16.mxu0 %v2688_v1  ;;  %2261 = vmatprep.subr.bf16.mxu1 %v2462_v3 }
 0x459   :  { %2239 = vmatpush1.bf16.msra.mxu0 %v2708_v13  ;;  %2263 = vmatpush3.bf16.msra.mxu1 %v2743_v26 }
 0x45a   :  { %2265 = vmatprep.subr.bf16.mxu0 %v2507_v5  ;;  %2296 = vmatprep.subr.bf16.mxu1 %v2462_v3 }
 0x50f   :  { %v848_v0 = vpop.f32.mrb[8].mxu0  ;;  %v919_v2 = vpop.f32.mrb[8].mxu1 }
 0x510   :  { %v849_v6 = vadd.f32 %v848_v0, %v2785_v35  ;;  %v850_v8 = vpop.f32.mrb[9].mxu0  ;;  %v1822_v12 = vpop.f32.mrb[9].mxu1  ;;  %v920_v33 = vadd.f32 %v919_v2, %v2797_v60  ;;  %v1498_v2 = vld [vmem:[%s3148_s0 + $0x80] sm:$0xff] }
 0x511   :  { %v851_v14 = vadd.f32 %v850_v8, %v2787_v36 }
 0x512   :  { %v923_v18 = vadd.f32 %v1492_v62, %v849_v6 }
 0x513   :  { %v930_v25 = vadd.f32 %v1493_v19, %v851_v14 }
 0x514   :  { %v1495_v24 = vmul.f32 -1.442695, %v923_v18 }
 0x515   :  { %v1496_v27 = vmul.f32 -1.442695, %v930_v25 }
 0x516   :  { %2422 = vpow2.f32 %v1495_v24 }
 0x517   :  { %2424 = vpow2.f32 %v1496_v27  ;;  %v1499_v27 = vld [vmem:[%s3148_s0 + $0x88] sm:$0xff] }
 0x520   :  { %v2423_v28 = vpop.eup %2422 }
 0x521   :  { %v927_v29 = vadd.f32 1.0, %v2423_v28  ;;  %v2425_v20 = vpop.eup %2424 }
 0x522   :  { %v934_v31 = vadd.f32 1.0, %v2425_v20 }
 0x523   :  { %2426 = vrcp.f32 %v927_v29 }
 0x524   :  { %2428 = vrcp.f32 %v934_v31 }
 0x52d   :  { %v2427_v37 = vpop.eup %2426 }
 0x52e   :  { %v937_v40 = vmul.f32 %v2427_v37, %v920_v33  ;;  %v2429_v45 = vpop.eup %2428 }
 0x52f   :  { %v940_v46 = vsub.f32 1.0, %v2429_v45  ;;  %v942_v50 = vmul.f32 %v2429_v45, %v2972_v61 }
 0x530   :  { %v938_v41 = vadd.f32 %v1494_v39, %v937_v40  ;;  %v1121_v40 = vpop.permute.xlu1 %1120 }
 0x531   :  { %vm1122_vm14 = vcmp.eq.s32.totalorder %v1121_v40, 1 }
 0x532   :  { %2430 = vtanh.f32 %v938_v41 }
 0x53c   :  { %v2431_v47 = vpop.eup %2430 }
 0x53d   :  { %v941_v49 = vmul.f32 %v2431_v47, %v940_v46 }
 0x53f   :  { %v943_v51 = vadd.f32 %v942_v50, %v941_v49 }
 0x541   :  { %v3025_v9 = vsel %vm949_vm13, %v943_v51, %v2972_v61 }
 0x542   :  { %1020 = vmatmul.mubr.f32.vlgmr.msra.gmra.mrb[10].mxu0 %v3025_v9  ;;  %1856 = vmatmul.mubr.f32.vlgmr.msra.gmra.mrb[10].mxu1 %v3025_v9 }
 0x543   :  { %2267 = vmatpush1.bf16.msra.mxu0 %v2521_v10  ;;  %2298 = vmatpush3.bf16.msra.mxu1 %v2581_v30 }
 0x544   :  { %2269 = vmatprep.subr.bf16.mxu0 %v2523_v11  ;;  %2299 = vmatprep.subr.bf16.mxu1 %v2462_v3 }
 0x545   :  { %1192 = vmatprep.mubr.f32.mxu0 %v2463_v4  ;;  %1890 = vmatprep.mubr.msk.f32.mxu1 %vm2464_vm0, %v2463_v4 }
 0x547   :  { %2271 = vmatpush1.bf16.msra.mxu0 %v2540_v16  ;;  %2301 = vmatpush3.bf16.msra.mxu1 %v2605_v38 }
 0x548   :  { %2273 = vmatprep.subr.bf16.mxu0 %v2543_v17  ;;  %2302 = vmatprep.subr.bf16.mxu1 %v2462_v3 }
 0x54b   :  { %2275 = vmatpush1.bf16.msra.mxu0 %v2558_v22  ;;  %2304 = vmatpush3.bf16.msra.mxu1 %v2638_v48 }
 0x54c   :  { %2277 = vmatprep.subr.bf16.mxu0 %v2561_v23  ;;  %2305 = vmatprep.subr.bf16.mxu1 %v2462_v3 }
 0x54f   :  { %2279 = vmatpush1.bf16.msra.mxu0 %v2587_v32  ;;  %2307 = vmatpush3.bf16.msra.mxu1 %v2670_v59 }
 0x550   :  { %2281 = vmatprep.subr.bf16.mxu0 %v2593_v34  ;;  %2308 = vmatprep.subr.bf16.mxu1 %v2462_v3 }
 0x553   :  { %2283 = vmatpush1.bf16.msra.mxu0 %v2618_v42  ;;  %2310 = vmatpush3.bf16.msra.mxu1 %v2697_v7 }
 0x554   :  { %2285 = vmatprep.subr.bf16.mxu0 %v2626_v44  ;;  %2311 = vmatprep.subr.bf16.mxu1 %v2462_v3 }
 0x557   :  { %2287 = vmatpush1.bf16.msra.mxu0 %v2654_v53  ;;  %2313 = vmatpush3.bf16.msra.mxu1 %v2713_v15 }
 0x558   :  { %2289 = vmatprep.subr.bf16.mxu0 %v2658_v55  ;;  %2314 = vmatprep.subr.bf16.mxu1 %v2462_v3 }
 0x55b   :  { %2291 = vmatpush1.bf16.msra.mxu0 %v2684_v63  ;;  %2316 = vmatpush3.bf16.msra.mxu1 %v2729_v21 }
 0x55c   :  { %2293 = vmatprep.subr.bf16.mxu0 %v2688_v1  ;;  %2317 = vmatprep.subr.bf16.mxu1 %v2462_v3 }
 0x55f   :  { %2295 = vmatpush1.bf16.msra.mxu0 %v2708_v13  ;;  %2319 = vmatpush3.bf16.msra.mxu1 %v2743_v26 }
 0x560   :  { %2321 = vmatprep.subr.bf16.mxu0 %v2507_v5  ;;  %2352 = vmatprep.subr.bf16.mxu1 %v2462_v3 }
 0x615   :  { %v1021_v54 = vpop.f32.mrb[10].mxu0  ;;  %v1092_v56 = vpop.f32.mrb[10].mxu1 }
 0x616   :  { %v1022_v57 = vadd.f32 %v1021_v54, %v2785_v35  ;;  %v1023_v58 = vpop.f32.mrb[11].mxu0  ;;  %v1857_v61 = vpop.f32.mrb[11].mxu1  ;;  %v1093_v24 = vadd.f32 %v1092_v56, %v2797_v60 }
 0x617   :  { %v1024_v62 = vadd.f32 %v1023_v58, %v2787_v36  ;;  %v1508_v61 = vld [vmem:[%s3148_s0 + $0xb0] sm:$0xff] }
 0x618   :  { %v1096_v0 = vadd.f32 %v1497_v52, %v1022_v57 }
 0x619   :  { %v1103_v6 = vadd.f32 %v1498_v2, %v1024_v62 }
 0x61a   :  { %v1500_v5 = vmul.f32 -1.442695, %v1096_v0 }
 0x61b   :  { %v1501_v8 = vmul.f32 -1.442695, %v1103_v6 }
 0x61c   :  { %2432 = vpow2.f32 %v1500_v5 }
 0x61d   :  { %2434 = vpow2.f32 %v1501_v8 }
 0x626   :  { %v2433_v12 = vpop.eup %2432 }
 0x627   :  { %v1100_v14 = vadd.f32 1.0, %v2433_v12  ;;  %v2435_v18 = vpop.eup %2434 }
 0x628   :  { %v1107_v19 = vadd.f32 1.0, %v2435_v18 }
 0x629   :  { %2436 = vrcp.f32 %v1100_v14 }
 0x62a   :  { %2438 = vrcp.f32 %v1107_v19 }
 0x633   :  { %v2437_v25 = vpop.eup %2436 }
 0x634   :  { %v1110_v28 = vmul.f32 %v2437_v25, %v1093_v24  ;;  %v2439_v20 = vpop.eup %2438 }
 0x635   :  { %v1113_v31 = vsub.f32 1.0, %v2439_v20  ;;  %v1115_v39 = vmul.f32 %v2439_v20, %v3025_v9 }
 0x636   :  { %v1111_v29 = vadd.f32 %v1499_v27, %v1110_v28  ;;  %v1467_v28 = vpop.permute.xlu1 %1466 }
 0x638   :  { %2440 = vtanh.f32 %v1111_v29 }
 0x642   :  { %v2441_v33 = vpop.eup %2440 }
 0x643   :  { %v1114_v37 = vmul.f32 %v2441_v33, %v1113_v31 }
 0x645   :  { %v1116_v41 = vadd.f32 %v1115_v39, %v1114_v37 }
 0x647   :  { %v3078_v45 = vsel %vm1122_vm14, %v1116_v41, %v3025_v9 }
 0x648   :  { %1193 = vmatmul.mubr.f32.vlgmr.msra.gmra.mrb[12].mxu0 %v3078_v45  ;;  %1891 = vmatmul.mubr.f32.vlgmr.msra.gmra.mrb[12].mxu1 %v3078_v45 }
 0x649   :  { %2323 = vmatpush1.bf16.msra.mxu0 %v2521_v10  ;;  %2354 = vmatpush3.bf16.msra.mxu1 %v2581_v30 }
 0x64a   :  { %2325 = vmatprep.subr.bf16.mxu0 %v2523_v11  ;;  %2355 = vmatprep.subr.bf16.mxu1 %v2462_v3 }
 0x64b   :  { %1365 = vmatprep.mubr.f32.mxu0 %v2463_v4  ;;  %1925 = vmatprep.mubr.msk.f32.mxu1 %vm2464_vm0, %v2463_v4  ;;  %v1502_v4 = vld [vmem:[%s3148_s0 + $0x90] sm:$0xff]  ;;  %vm1468_vm0 = vcmp.eq.s32.totalorder %v1467_v28, 1 }
 0x64d   :  { %2327 = vmatpush1.bf16.msra.mxu0 %v2540_v16  ;;  %2357 = vmatpush3.bf16.msra.mxu1 %v2605_v38 }
 0x64e   :  { %2329 = vmatprep.subr.bf16.mxu0 %v2543_v17  ;;  %2358 = vmatprep.subr.bf16.mxu1 %v2462_v3 }
 0x651   :  { %2331 = vmatpush1.bf16.msra.mxu0 %v2558_v22  ;;  %2360 = vmatpush3.bf16.msra.mxu1 %v2638_v48 }
 0x652   :  { %2333 = vmatprep.subr.bf16.mxu0 %v2561_v23  ;;  %2361 = vmatprep.subr.bf16.mxu1 %v2462_v3 }
 0x655   :  { %2335 = vmatpush1.bf16.msra.mxu0 %v2587_v32  ;;  %2363 = vmatpush3.bf16.msra.mxu1 %v2670_v59 }
 0x656   :  { %2337 = vmatprep.subr.bf16.mxu0 %v2593_v34  ;;  %2364 = vmatprep.subr.bf16.mxu1 %v2462_v3 }
 0x659   :  { %2339 = vmatpush1.bf16.msra.mxu0 %v2618_v42  ;;  %2366 = vmatpush3.bf16.msra.mxu1 %v2697_v7 }
 0x65a   :  { %2341 = vmatprep.subr.bf16.mxu0 %v2626_v44  ;;  %2367 = vmatprep.subr.bf16.mxu1 %v2462_v3 }
 0x65d   :  { %2343 = vmatpush1.bf16.msra.mxu0 %v2654_v53  ;;  %2369 = vmatpush3.bf16.msra.mxu1 %v2713_v15 }
 0x65e   :  { %2345 = vmatprep.subr.bf16.mxu0 %v2658_v55  ;;  %2370 = vmatprep.subr.bf16.mxu1 %v2462_v3 }
 0x661   :  { %2347 = vmatpush1.bf16.msra.mxu0 %v2684_v63  ;;  %2372 = vmatpush3.bf16.msra.mxu1 %v2729_v21  ;;  %v1504_v63 = vld [vmem:[%s3148_s0 + $0xa0] sm:$0xff] }
 0x662   :  { %2349 = vmatprep.subr.bf16.mxu0 %v2688_v1  ;;  %2373 = vmatprep.subr.bf16.mxu1 %v2462_v3  ;;  %v1503_v3 = vld [vmem:[%s3148_s0 + $0x98] sm:$0xff] }
 0x665   :  { %2351 = vmatpush1.bf16.msra.mxu0 %v2708_v13  ;;  %2375 = vmatpush3.bf16.msra.mxu1 %v2743_v26  ;;  %v1294_v26 = vpop.permute.xlu0 %1293 }
 0x666   :  { %vm1295_vm15 = vcmp.eq.s32.totalorder %v1294_v26, 1 }
 0x71b   :  { %v1194_v10 = vpop.f32.mrb[12].mxu0  ;;  %v1265_v11 = vpop.f32.mrb[12].mxu1 }
 0x71c   :  { %v1195_v16 = vadd.f32 %v1194_v10, %v2785_v35  ;;  %v1196_v17 = vpop.f32.mrb[13].mxu0  ;;  %v1892_v22 = vpop.f32.mrb[13].mxu1  ;;  %v1266_v55 = vadd.f32 %v1265_v11, %v2797_v60 }
 0x71d   :  { %v1197_v23 = vadd.f32 %v1196_v17, %v2787_v36 }
 0x71e   :  { %v1269_v30 = vadd.f32 %v1502_v4, %v1195_v16 }
 0x71f   :  { %v1276_v34 = vadd.f32 %v1503_v3, %v1197_v23 }
 0x720   :  { %v1505_v32 = vmul.f32 -1.442695, %v1269_v30 }
 0x721   :  { %v1506_v38 = vmul.f32 -1.442695, %v1276_v34 }
 0x722   :  { %2442 = vpow2.f32 %v1505_v32 }
 0x723   :  { %2444 = vpow2.f32 %v1506_v38 }
 0x72c   :  { %v2443_v42 = vpop.eup %2442 }
 0x72d   :  { %v1273_v44 = vadd.f32 1.0, %v2443_v42  ;;  %v2445_v48 = vpop.eup %2444 }
 0x72e   :  { %v1280_v53 = vadd.f32 1.0, %v2445_v48 }
 0x72f   :  { %2446 = vrcp.f32 %v1273_v44 }
 0x730   :  { %2448 = vrcp.f32 %v1280_v53 }
 0x739   :  { %v2447_v59 = vpop.eup %2446 }
 0x73a   :  { %v1283_v1 = vmul.f32 %v2447_v59, %v1266_v55  ;;  %v2449_v13 = vpop.eup %2448 }
 0x73b   :  { %v1286_v15 = vsub.f32 1.0, %v2449_v13  ;;  %v1288_v47 = vmul.f32 %v2449_v13, %v3078_v45 }
 0x73c   :  { %v1284_v7 = vadd.f32 %v1504_v63, %v1283_v1 }
 0x73e   :  { %2450 = vtanh.f32 %v1284_v7 }
 0x748   :  { %v2451_v21 = vpop.eup %2450 }
 0x749   :  { %v1287_v46 = vmul.f32 %v2451_v21, %v1286_v15 }
 0x74b   :  { %v1289_v49 = vadd.f32 %v1288_v47, %v1287_v46 }
 0x74d   :  { %v1296_v50 = vsel %vm1295_vm15, %v1289_v49, %v3078_v45 }
 0x74e   :  { %1366 = vmatmul.mubr.f32.vlgmr.msra.gmra.mrb[14].mxu0 %v1296_v50  ;;  %1926 = vmatmul.mubr.f32.vlgmr.msra.gmra.mrb[14].mxu1 %v1296_v50 }
 0x821   :  { %v1367_v51 = vpop.f32.mrb[14].mxu0  ;;  %v1438_v9 = vpop.f32.mrb[14].mxu1 }
 0x822   :  { %v1368_v52 = vadd.f32 %v1367_v51, %v2785_v35  ;;  %v1369_v54 = vpop.f32.mrb[15].mxu0  ;;  %v1927_v56 = vpop.f32.mrb[15].mxu1  ;;  %v1439_v35 = vadd.f32 %v1438_v9, %v2797_v60 }
 0x823   :  { %v1370_v57 = vadd.f32 %v1369_v54, %v2787_v36  ;;  %v1509_v36 = vld [vmem:[%s3148_s0 + $0xb8] sm:$0xff] }
 0x824   :  { %v1442_v58 = vadd.f32 %v1507_v43, %v1368_v52 }
 0x825   :  { %v1449_v0 = vadd.f32 %v1508_v61, %v1370_v57 }
 0x826   :  { %v1510_v62 = vmul.f32 -1.442695, %v1442_v58 }
 0x827   :  { %v1511_v2 = vmul.f32 -1.442695, %v1449_v0 }
 0x828   :  { %2452 = vpow2.f32 %v1510_v62 }
 0x829   :  { %2454 = vpow2.f32 %v1511_v2 }
 0x832   :  { %v2453_v5 = vpop.eup %2452 }
 0x833   :  { %v1446_v6 = vadd.f32 1.0, %v2453_v5  ;;  %v2455_v8 = vpop.eup %2454 }
 0x834   :  { %v1453_v12 = vadd.f32 1.0, %v2455_v8 }
 0x835   :  { %2456 = vrcp.f32 %v1446_v6 }
 0x836   :  { %2458 = vrcp.f32 %v1453_v12 }
 0x83f   :  { %v2457_v14 = vpop.eup %2456 }
 0x840   :  { %v1456_v18 = vmul.f32 %v2457_v14, %v1439_v35  ;;  %v2459_v24 = vpop.eup %2458 }
 0x841   :  { %v1459_v25 = vsub.f32 1.0, %v2459_v24  ;;  %v1461_v20 = vmul.f32 %v2459_v24, %v1296_v50 }
 0x842   :  { %v1457_v19 = vadd.f32 %v1509_v36, %v1456_v18 }
 0x844   :  { %2460 = vtanh.f32 %v1457_v19 }
 0x84e   :  { %v2461_v27 = vpop.eup %2460 }
 0x84f   :  { %v1460_v29 = vmul.f32 %v2461_v27, %v1459_v25 }
 0x851   :  { %v1462_v31 = vadd.f32 %v1461_v20, %v1460_v29 }
 0x853   :  { %v1469_v33 = vsel %vm1468_vm0, %v1462_v31, %v1296_v50 }
 0x854   :  { %1470 = vst [vmem:[%s3149_s5] sm:$0xff] %v1469_v33 }

// kernel: sentence_vae_forward.8
= control target key start
LH: loop header
LB: loop body
LE: loop exit
PB: predicated region body
PF: predicated region fallthrough
CT: control target
= control target key end

     0   :  { %v2534_v7 = vmov 0.0|0.0   ;;  %v2535_v8 = vmov 0.0   ;;  %vm2536_vm0 = vmmov 0   ;;  %v2537_v14 = vmov 0   ;;  %s3255_s0 = inlined_call_operand.vmem [shape: f32[8,8,384], index: 0, kind: input, shape index: {}]   ;;  %s3256_s1 = inlined_call_operand.vmem [shape: s32[8,1], index: 1, kind: input, shape index: {}]   ;;  %s3257_s2 = inlined_call_operand.vmem [shape: f32[8,128], index: 2, kind: input, shape index: {}]   ;;  %s3258_s3 = inlined_call_operand.vmem [shape: f32[128,384], index: 3, kind: input, shape index: {}]   ;;  %s3259_s4 = inlined_call_operand.vmem [shape: f32[1,384], index: 4, kind: input, shape index: {}]   ;;  %s3260_s5 = inlined_call_operand.hbm [shape: f32[8,128], index: 5, kind: output, shape index: {0}]   ;;  %s3261_s6 = inlined_call_operand.vmem [shape: f32[8,8,128], index: 6, kind: output, shape index: {1}]  }
   0x1   :  { %v24_v0 = vld [vmem:[%s3258_s3 + $0x8] sm:$0xff]  ;;  %v27_v1 = vld [vmem:[%s3258_s3 + $0x20] sm:$0xff]  ;;  %v26_v4 = vld [vmem:[%s3258_s3 + $0x18] sm:$0xff]  ;;  %2007 = vmatprep.subr.bf16.mxu1 %v2534_v7  ;;  %157 = vmatprep.mubr.f32.mxu0 %v2535_v8 }
   0x2   :  { %v23_v2 = vld [vmem:[%s3258_s3] sm:$0xff]  ;;  %v2583_v3 = vpack.c.bf16 %v27_v1, %v24_v0  ;;  %v30_v5 = vld [vmem:[%s3258_s3 + $0x38] sm:$0xff]  ;;  %v33_v6 = vld [vmem:[%s3258_s3 + $0x50] sm:$0xff]  ;;  %1727 = vmatprep.mubr.msk.f32.mxu1 %vm2536_vm0, %v2535_v8  ;;  %2428 = vset.pattern.permute.xlu0 %v2537_v14 }
   0x3   :  { %v2596_v9 = vpack.c.bf16 %v26_v4, %v23_v2  ;;  %v2598_v10 = vpack.c.bf16 %v33_v6, %v30_v5  ;;  %v29_v11 = vld [vmem:[%s3258_s3 + $0x30] sm:$0xff]  ;;  %v32_v12 = vld [vmem:[%s3258_s3 + $0x48] sm:$0xff]  ;;  %v39_v15 = vld [vmem:[%s3258_s3 + $0x80] sm:$0xff]  ;;  %2429 = vset.pattern.permute.xlu1 %v2537_v14 }
   0x4   :  { %v36_v13 = vld [vmem:[%s3258_s3 + $0x68] sm:$0xff]  ;;  %1976 = vmatprep.subr.bf16.mxu0 %v2583_v3  ;;  %v2618_v16 = vpack.c.bf16 %v32_v12, %v29_v11  ;;  %v35_v18 = vld [vmem:[%s3258_s3 + $0x60] sm:$0xff]  ;;  %v38_v19 = vld [vmem:[%s3258_s3 + $0x78] sm:$0xff] }
   0x5   :  { %1978 = vmatpush1.bf16.msra.mxu0 %v2596_v9  ;;  %v2621_v17 = vpack.c.bf16 %v39_v15, %v36_v13  ;;  %v42_v20 = vld [vmem:[%s3258_s3 + $0x98] sm:$0xff]  ;;  %v45_v21 = vld [vmem:[%s3258_s3 + $0xb0] sm:$0xff]  ;;  %v2636_v22 = vpack.c.bf16 %v38_v19, %v35_v18  ;;  %v44_v25 = vld [vmem:[%s3258_s3 + $0xa8] sm:$0xff] }
   0x6   :  { %1980 = vmatprep.subr.bf16.mxu0 %v2598_v10  ;;  %v2639_v23 = vpack.c.bf16 %v45_v21, %v42_v20  ;;  %v41_v24 = vld [vmem:[%s3258_s3 + $0x90] sm:$0xff]  ;;  %v48_v26 = vld [vmem:[%s3258_s3 + $0xc8] sm:$0xff]  ;;  %v51_v27 = vld [vmem:[%s3258_s3 + $0xe0] sm:$0xff] }
   0x7   :  { %v25_v28 = vld [vmem:[%s3258_s3 + $0x10] sm:$0xff]  ;;  %v28_v29 = vld [vmem:[%s3258_s3 + $0x28] sm:$0xff]  ;;  %v31_v31 = vld [vmem:[%s3258_s3 + $0x40] sm:$0xff]  ;;  %v2665_v32 = vpack.c.bf16 %v44_v25, %v41_v24  ;;  %v2671_v34 = vpack.c.bf16 %v51_v27, %v48_v26 }
   0x8   :  { %v2659_v30 = vpack.c.bf16 %v28_v29, %v25_v28  ;;  %v34_v33 = vld [vmem:[%s3258_s3 + $0x58] sm:$0xff]  ;;  %v47_v35 = vld [vmem:[%s3258_s3 + $0xc0] sm:$0xff]  ;;  %v57_v39 = vld [vmem:[%s3258_s3 + $0x110] sm:$0xff] }
   0x9   :  { %1982 = vmatpush1.bf16.msra.mxu0 %v2618_v16  ;;  %v50_v36 = vld [vmem:[%s3258_s3 + $0xd8] sm:$0xff]  ;;  %v2683_v38 = vpack.c.bf16 %v34_v33, %v31_v31  ;;  %v37_v40 = vld [vmem:[%s3258_s3 + $0x70] sm:$0xff]  ;;  %v40_v41 = vld [vmem:[%s3258_s3 + $0x88] sm:$0xff] }
   0xa   :  { %1984 = vmatprep.subr.bf16.mxu0 %v2621_v17  ;;  %v54_v37 = vld [vmem:[%s3258_s3 + $0xf8] sm:$0xff]  ;;  %2009 = vmatpush3.bf16.msra.mxu1 %v2659_v30  ;;  %v2696_v42 = vpack.c.bf16 %v50_v36, %v47_v35  ;;  %v53_v43 = vld [vmem:[%s3258_s3 + $0xf0] sm:$0xff]  ;;  %v2704_v44 = vld [vmem:[%s3256_s1] sm:$0xff]  ;;  %v2716_v48 = vpack.c.bf16 %v40_v41, %v37_v40 }
   0xb   :  { %2010 = vmatprep.subr.bf16.mxu1 %v2534_v7  ;;  %v2707_v45 = vpack.c.bf16 %v57_v39, %v54_v37  ;;  %v56_v46 = vld [vmem:[%s3258_s3 + $0x108] sm:$0xff]  ;;  %vm255_vm1 = vcmp.gt.s32.totalorder %v2704_v44, 0  ;;  %vm430_vm2 = vcmp.gt.s32.totalorder %v2704_v44, 1 }
   0xc   :  { %v60_v47 = vld [vmem:[%s3258_s3 + $0x128] sm:$0xff] }
   0xd   :  { %1986 = vmatpush1.bf16.msra.mxu0 %v2636_v22 }
   0xe   :  { %1988 = vmatprep.subr.bf16.mxu0 %v2639_v23  ;;  %2012 = vmatpush3.bf16.msra.mxu1 %v2683_v38 }
  0x11   :  { %1990 = vmatpush1.bf16.msra.mxu0 %v2665_v32 }
  0x12   :  { %1992 = vmatprep.subr.bf16.mxu0 %v2671_v34 }
  0x13   :  { %12 = vsyncpa [#allocation3], 0  ;;  %v63_v49 = vld [vmem:[%s3258_s3 + $0x140] sm:$0xff]  ;;  %2013 = vmatprep.subr.bf16.mxu1 %v2534_v7  ;;  %v46_v51 = vld [vmem:[%s3258_s3 + $0xb8] sm:$0xff]  ;;  %v256_v52 = vsel %vm255_vm1, 1, %v2537_v14  ;;  %v2732_v53 = vpack.c.bf16 %v56_v46, %v53_v43  ;;  %v431_v54 = vsel %vm430_vm2, 1, %v2537_v14  ;;  %v78_v27 = vlaneseq }
  0x14   :  { %v43_v50 = vld [vmem:[%s3258_s3 + $0xa0] sm:$0xff]  ;;  %258 = vperm.xlu0 %2428, %v256_v52   ;;  %v2736_v55 = vpack.c.bf16 %v63_v49, %v60_v47  ;;  %v62_v57 = vld [vmem:[%s3258_s3 + $0x138] sm:$0xff]  ;;  %2015 = vmatpush3.bf16.msra.mxu1 %v2716_v48  ;;  %vm958_vm3 = vcmp.gt.s32.totalorder %v2704_v44, 4  ;;  %v69_v60 = vld [vmem:[%s3258_s3 + $0x170] sm:$0xff]  ;;  %vm1310_vm4 = vcmp.gt.s32.totalorder %v2704_v44, 6  ;;  %vm606_vm6 = vcmp.gt.s32.totalorder %v2704_v44, 2 }
  0x15   :  { %1994 = vmatpush1.bf16.msra.mxu0 %v2696_v42  ;;  %v59_v56 = vld [vmem:[%s3258_s3 + $0x120] sm:$0xff]  ;;  %v66_v58 = vld [vmem:[%s3258_s3 + $0x158] sm:$0xff]  ;;  %v2748_v59 = vpack.c.bf16 %v46_v51, %v43_v50  ;;  %2016 = vmatprep.subr.bf16.mxu1 %v2534_v7  ;;  %v49_v61 = vld [vmem:[%s3258_s3 + $0xd0] sm:$0xff]  ;;  %v959_v0 = vsel %vm958_vm3, 1, %v2537_v14  ;;  %v1311_v13 = vsel %vm1310_vm4, 1, %v2537_v14  ;;  %v79_v28 = vshrl.u32 %v78_v27, 7 }
  0x16   :  { %1996 = vmatprep.subr.bf16.mxu0 %v2707_v45  ;;  %v52_v62 = vld [vmem:[%s3258_s3 + $0xe8] sm:$0xff]  ;;  %v2762_v63 = vpack.c.bf16 %v62_v57, %v59_v56  ;;  %v2766_v1 = vpack.c.bf16 %v69_v60, %v66_v58  ;;  %v65_v2 = vld [vmem:[%s3258_s3 + $0x150] sm:$0xff]  ;;  %v55_v6 = vld [vmem:[%s3258_s3 + $0x100] sm:$0xff]  ;;  %vm782_vm7 = vcmp.gt.s32.totalorder %v2704_v44, 3  ;;  %vm1134_vm8 = vcmp.gt.s32.totalorder %v2704_v44, 5  ;;  %s2538_s28 = smov [#allocation2]  }
  0x17   :  { %v68_v4 = vld [vmem:[%s3258_s3 + $0x168] sm:$0xff]  ;;  %v2775_v5 = vpack.c.bf16 %v52_v62, %v49_v61  ;;  %v58_v11 = vld [vmem:[%s3258_s3 + $0x118] sm:$0xff]  ;;  %v61_v18 = vld [vmem:[%s3258_s3 + $0x130] sm:$0xff]  ;;  %v80_v29 = vsub.s32 0, %v79_v28  ;;  %v84_v33 = vsub.s32 1, %v79_v28  ;;  %v88_v58 = vsub.s32 2, %v79_v28 }
  0x18   :  { %433 = vperm.xlu0 %2428, %v431_v54   ;;  %2018 = vmatpush3.bf16.msra.mxu1 %v2748_v59  ;;  %v2786_v12 = vpack.c.bf16 %v68_v4, %v65_v2  ;;  %v2791_v15 = vpack.c.bf16 %v58_v11, %v55_v6  ;;  %v64_v19 = vld [vmem:[%s3258_s3 + $0x148] sm:$0xff]  ;;  %v2804_v20 = vld [vmem:[%s3257_s2] sm:$0xff]  ;;  %v70_v25 = vld [vmem:[%s3258_s3 + $0x178] sm:$0xff]  ;;  %vm1486_vm9 = vcmp.gt.s32.totalorder %v2704_v44, 7  ;;  %s1503_s29 = sshll.u32 %s2538_s28, 4  ;;  %s1504_s29 = int_to_ptr.vmem [resolvable:$true] %s1503_s29 }
  0x19   :  { %1998 = vmatpush1.bf16.msra.mxu0 %v2732_v53  ;;  %2019 = vmatprep.subr.bf16.mxu1 %v2534_v7  ;;  %v2807_v21 = vpack.c.bf16 %v64_v19, %v61_v18  ;;  %v67_v24 = vld [vmem:[%s3258_s3 + $0x160] sm:$0xff]  ;;  %v75_v47 = vld [vmem:[%s3255_s0 + $0x8] sm:$0xff]  ;;  %v76_v4 = vld [vmem:[%s3255_s0 + $0x10] sm:$0xff]  ;;  %p2515_p1 = scmp.lt.s32.totalorder %s1504_s29, %s1504_s29 }
  0x1a   :  { %2000 = vmatprep.subr.bf16.mxu0 %v2736_v55  ;;  %v2821_v26 = vpack.c.bf16 %v70_v25, %v67_v24  ;;  %v71_v31 = vld [vmem:[%s3259_s4] sm:$0x7] }
  0x1b   :  { %v2863_v35 = vrot.slane %v71_v31, %v80_v29  ;;  %v2865_v36 = vrot.slane %v71_v31, %v84_v33  ;;  %v74_v37 = vld [vmem:[%s3255_s0] sm:$0xff]  ;;  %v2875_v60 = vrot.slane %v71_v31, %v88_v58  ;;  %v783_v33 = vsel %vm782_vm7, 1, %v2537_v14 }
  0x1c   :  { %961 = vperm.xlu0 %2428, %v959_v0   ;;  %2021 = vmatpush3.bf16.msra.mxu1 %v2775_v5  ;;  %v1518_v44 = vld [vmem:[%s3255_s0 + $0x20] sm:$0xff] }
  0x1d   :  { %2002 = vmatpush1.bf16.msra.mxu0 %v2762_v63  ;;  %2022 = vmatprep.subr.bf16.mxu1 %v2534_v7 }
  0x1e   :  { %2004 = vmatprep.subr.bf16.mxu0 %v2766_v1 }
  0x20   :  { %1313 = vperm.xlu0 %2428, %v1311_v13   ;;  %2024 = vmatpush3.bf16.msra.mxu1 %v2791_v15 }
  0x21   :  { %2006 = vmatpush1.bf16.msra.mxu0 %v2786_v12  ;;  %2025 = vmatprep.subr.bf16.mxu1 %v2534_v7 }
  0x22   :  { %2032 = vmatprep.subr.bf16.mxu0 %v2583_v3 }
  0x24   :  { %158 = vmatmul.mubr.f32.vlgmr.msra.gmra.mrb[0].mxu0 %v2804_v20  ;;  %2027 = vmatpush3.bf16.msra.mxu1 %v2807_v21 }
  0x25   :  { %2034 = vmatpush1.bf16.msra.mxu0 %v2596_v9  ;;  %332 = vmatprep.mubr.f32.mxu0 %v2535_v8 }
  0x26   :  { %2036 = vmatprep.subr.bf16.mxu0 %v2598_v10  ;;  %2028 = vmatprep.subr.bf16.mxu1 %v2534_v7 }
  0x28   :  { %2030 = vmatpush3.bf16.msra.mxu1 %v2821_v26 }
  0x29   :  { %2038 = vmatpush1.bf16.msra.mxu0 %v2618_v16  ;;  %2063 = vmatprep.subr.bf16.mxu1 %v2534_v7 }
  0x2a   :  { %2040 = vmatprep.subr.bf16.mxu0 %v2621_v17 }
  0x2b   :  { %1728 = vmatmul.mubr.f32.vlgmr.msra.gmra.mrb[0].mxu1 %v2804_v20 }
  0x2c   :  { %2065 = vmatpush3.bf16.msra.mxu1 %v2659_v30  ;;  %1762 = vmatprep.mubr.msk.f32.mxu1 %vm2536_vm0, %v2535_v8 }
  0x2d   :  { %2042 = vmatpush1.bf16.msra.mxu0 %v2636_v22  ;;  %2066 = vmatprep.subr.bf16.mxu1 %v2534_v7 }
  0x2e   :  { %2044 = vmatprep.subr.bf16.mxu0 %v2639_v23 }
  0x30   :  { %2068 = vmatpush3.bf16.msra.mxu1 %v2683_v38 }
  0x31   :  { %2046 = vmatpush1.bf16.msra.mxu0 %v2665_v32  ;;  %2069 = vmatprep.subr.bf16.mxu1 %v2534_v7 }
  0x32   :  { %2048 = vmatprep.subr.bf16.mxu0 %v2671_v34 }
  0x34   :  { %2071 = vmatpush3.bf16.msra.mxu1 %v2716_v48 }
  0x35   :  { %2050 = vmatpush1.bf16.msra.mxu0 %v2696_v42  ;;  %2072 = vmatprep.subr.bf16.mxu1 %v2534_v7 }
  0x36   :  { %2052 = vmatprep.subr.bf16.mxu0 %v2707_v45 }
  0x38   :  { %2074 = vmatpush3.bf16.msra.mxu1 %v2748_v59 }
  0x39   :  { %2054 = vmatpush1.bf16.msra.mxu0 %v2732_v53  ;;  %2075 = vmatprep.subr.bf16.mxu1 %v2534_v7 }
  0x3a   :  { %2056 = vmatprep.subr.bf16.mxu0 %v2736_v55 }
  0x3c   :  { %2077 = vmatpush3.bf16.msra.mxu1 %v2775_v5 }
  0x3d   :  { %2058 = vmatpush1.bf16.msra.mxu0 %v2762_v63  ;;  %2078 = vmatprep.subr.bf16.mxu1 %v2534_v7 }
  0x3e   :  { %2060 = vmatprep.subr.bf16.mxu0 %v2766_v1 }
  0x40   :  { %2080 = vmatpush3.bf16.msra.mxu1 %v2791_v15 }
  0x41   :  { %2062 = vmatpush1.bf16.msra.mxu0 %v2786_v12  ;;  %2081 = vmatprep.subr.bf16.mxu1 %v2534_v7 }
  0x42   :  { %2088 = vmatprep.subr.bf16.mxu0 %v2583_v3 }
  0x44   :  { %2083 = vmatpush3.bf16.msra.mxu1 %v2807_v21 }
  0x45   :  { %2084 = vmatprep.subr.bf16.mxu1 %v2534_v7 }
  0x48   :  { %2086 = vmatpush3.bf16.msra.mxu1 %v2821_v26 }
  0x49   :  { %2119 = vmatprep.subr.bf16.mxu1 %v2534_v7 }
  0x93   :  { %v259_v24 = vpop.permute.xlu0 %258 }
  0x94   :  { %vm260_vm5 = vcmp.eq.s32.totalorder %v259_v24, 1 }
  0xf7   :  { %v159_v39 = vpop.f32.mrb[0].mxu0 }
  0xf8   :  { %v160_v40 = vadd.f32 %v159_v39, %v2863_v35  ;;  %v161_v41 = vpop.f32.mrb[1].mxu0  ;;  %v1487_v39 = vsel %vm1486_vm9, 1, %v2537_v14 }
  0xf9   :  { %v162_v43 = vadd.f32 %v161_v41, %v2865_v36 }
  0xfa   :  { %v234_v46 = vadd.f32 %v160_v40, %v74_v37  ;;  %v1135_v37 = vsel %vm1134_vm8, 1, %v2537_v14  ;;  %v1517_v40 = vld [vmem:[%s3255_s0 + $0x18] sm:$0xff] }
  0xfb   :  { %v241_v50 = vadd.f32 %v162_v43, %v75_v47 }
  0xfc   :  { %v1515_v49 = vmul.f32 -1.442695, %v234_v46 }
  0xfd   :  { %v1516_v52 = vmul.f32 -1.442695, %v241_v50 }
  0xfe   :  { %2430 = vpow2.f32 %v1515_v49  ;;  %v230_v51 = vpop.f32.mrb[0].mxu1 }
  0xff   :  { %v1729_v54 = vpop.f32.mrb[1].mxu1  ;;  %2432 = vpow2.f32 %v1516_v52  ;;  %v231_v0 = vadd.f32 %v230_v51, %v2875_v60 }
 0x108   :  { %v2431_v56 = vpop.eup %2430 }
 0x109   :  { %v238_v57 = vadd.f32 1.0, %v2431_v56  ;;  %v2433_v61 = vpop.eup %2432 }
 0x10a   :  { %v245_v62 = vadd.f32 1.0, %v2433_v61 }
 0x10b   :  { %2434 = vrcp.f32 %v238_v57 }
 0x10c   :  { %2436 = vrcp.f32 %v245_v62 }
 0x115   :  { %v2435_v2 = vpop.eup %2434 }
 0x116   :  { %v248_v6 = vmul.f32 %v2435_v2, %v231_v0  ;;  %v2437_v13 = vpop.eup %2436  ;;  %v1519_v2 = vld [vmem:[%s3255_s0 + $0x28] sm:$0xff] }
 0x117   :  { %v251_v18 = vsub.f32 1.0, %v2437_v13  ;;  %v253_v27 = vmul.f32 %v2437_v13, %v2804_v20 }
 0x118   :  { %v249_v11 = vadd.f32 %v248_v6, %v76_v4 }
 0x11a   :  { %2438 = vtanh.f32 %v249_v11 }
 0x124   :  { %v2439_v19 = vpop.eup %2438 }
 0x125   :  { %v252_v25 = vmul.f32 %v2439_v19, %v251_v18 }
 0x127   :  { %v254_v28 = vadd.f32 %v253_v27, %v252_v25  ;;  %v434_v25 = vpop.permute.xlu0 %433 }
 0x128   :  { %vm435_vm10 = vcmp.eq.s32.totalorder %v434_v25, 1 }
 0x129   :  { %v261_v29 = vsel %vm260_vm5, %v254_v28, 0.0  ;;  %v2883_v31 = vsel %vm260_vm5, %v254_v28, %v2804_v20  ;;  %v607_v20 = vsel %vm606_vm6, 1, %v2537_v14 }
 0x12a   :  { %262 = vst [vmem:[%s3261_s6] sm:$0xff] %v261_v29  ;;  %333 = vmatmul.mubr.f32.vlgmr.msra.gmra.mrb[2].mxu0 %v2883_v31  ;;  %1763 = vmatmul.mubr.f32.vlgmr.msra.gmra.mrb[2].mxu1 %v2883_v31 }
 0x12b   :  { %2090 = vmatpush1.bf16.msra.mxu0 %v2596_v9  ;;  %2121 = vmatpush3.bf16.msra.mxu1 %v2659_v30 }
 0x12c   :  { %2092 = vmatprep.subr.bf16.mxu0 %v2598_v10  ;;  %2122 = vmatprep.subr.bf16.mxu1 %v2534_v7 }
 0x12d   :  { %508 = vmatprep.mubr.f32.mxu0 %v2535_v8  ;;  %1797 = vmatprep.mubr.msk.f32.mxu1 %vm2536_vm0, %v2535_v8 }
 0x12e   :  { %609 = vperm.xlu1 %2429, %v607_v20  }
 0x12f   :  { %2094 = vmatpush1.bf16.msra.mxu0 %v2618_v16  ;;  %2124 = vmatpush3.bf16.msra.mxu1 %v2683_v38 }
 0x130   :  { %2096 = vmatprep.subr.bf16.mxu0 %v2621_v17  ;;  %2125 = vmatprep.subr.bf16.mxu1 %v2534_v7 }
 0x132   :  { %785 = vperm.xlu1 %2429, %v783_v33  }
 0x133   :  { %2098 = vmatpush1.bf16.msra.mxu0 %v2636_v22  ;;  %2127 = vmatpush3.bf16.msra.mxu1 %v2716_v48 }
 0x134   :  { %2100 = vmatprep.subr.bf16.mxu0 %v2639_v23  ;;  %2128 = vmatprep.subr.bf16.mxu1 %v2534_v7 }
 0x136   :  { %1137 = vperm.xlu1 %2429, %v1135_v37  }
 0x137   :  { %2102 = vmatpush1.bf16.msra.mxu0 %v2665_v32  ;;  %2130 = vmatpush3.bf16.msra.mxu1 %v2748_v59 }
 0x138   :  { %2104 = vmatprep.subr.bf16.mxu0 %v2671_v34  ;;  %2131 = vmatprep.subr.bf16.mxu1 %v2534_v7 }
 0x13a   :  { %1489 = vperm.xlu1 %2429, %v1487_v39  }
 0x13b   :  { %2106 = vmatpush1.bf16.msra.mxu0 %v2696_v42  ;;  %2133 = vmatpush3.bf16.msra.mxu1 %v2775_v5 }
 0x13c   :  { %2108 = vmatprep.subr.bf16.mxu0 %v2707_v45  ;;  %2134 = vmatprep.subr.bf16.mxu1 %v2534_v7 }
 0x13f   :  { %2110 = vmatpush1.bf16.msra.mxu0 %v2732_v53  ;;  %2136 = vmatpush3.bf16.msra.mxu1 %v2791_v15 }
 0x140   :  { %2112 = vmatprep.subr.bf16.mxu0 %v2736_v55  ;;  %2137 = vmatprep.subr.bf16.mxu1 %v2534_v7 }
 0x143   :  { %2114 = vmatpush1.bf16.msra.mxu0 %v2762_v63  ;;  %2139 = vmatpush3.bf16.msra.mxu1 %v2807_v21 }
 0x144   :  { %2116 = vmatprep.subr.bf16.mxu0 %v2766_v1  ;;  %2140 = vmatprep.subr.bf16.mxu1 %v2534_v7 }
 0x147   :  { %2118 = vmatpush1.bf16.msra.mxu0 %v2786_v12  ;;  %2142 = vmatpush3.bf16.msra.mxu1 %v2821_v26 }
 0x148   :  { %2144 = vmatprep.subr.bf16.mxu0 %v2583_v3  ;;  %2175 = vmatprep.subr.bf16.mxu1 %v2534_v7 }
 0x1fd   :  { %v334_v41 = vpop.f32.mrb[2].mxu0  ;;  %v405_v43 = vpop.f32.mrb[2].mxu1 }
 0x1fe   :  { %v335_v46 = vadd.f32 %v334_v41, %v2863_v35  ;;  %v336_v47 = vpop.f32.mrb[3].mxu0  ;;  %v1764_v49 = vpop.f32.mrb[3].mxu1  ;;  %v406_v62 = vadd.f32 %v405_v43, %v2875_v60 }
 0x1ff   :  { %v337_v50 = vadd.f32 %v336_v47, %v2865_v36 }
 0x200   :  { %v409_v51 = vadd.f32 %v1517_v40, %v335_v46  ;;  %v1524_v46 = vld [vmem:[%s3255_s0 + $0x38] sm:$0xff] }
 0x201   :  { %v416_v14 = vadd.f32 %v1518_v44, %v337_v50 }
 0x202   :  { %v1520_v52 = vmul.f32 -1.442695, %v409_v51 }
 0x203   :  { %v1521_v54 = vmul.f32 -1.442695, %v416_v14 }
 0x204   :  { %2440 = vpow2.f32 %v1520_v52 }
 0x205   :  { %2442 = vpow2.f32 %v1521_v54 }
 0x20e   :  { %v2441_v56 = vpop.eup %2440 }
 0x20f   :  { %v413_v57 = vadd.f32 1.0, %v2441_v56  ;;  %v2443_v58 = vpop.eup %2442 }
 0x210   :  { %v420_v61 = vadd.f32 1.0, %v2443_v58 }
 0x211   :  { %2444 = vrcp.f32 %v413_v57  ;;  %v1525_v57 = vld [vmem:[%s3255_s0 + $0x40] sm:$0xff] }
 0x212   :  { %2446 = vrcp.f32 %v420_v61 }
 0x21b   :  { %v2445_v0 = vpop.eup %2444 }
 0x21c   :  { %v423_v4 = vmul.f32 %v2445_v0, %v406_v62  ;;  %v2447_v11 = vpop.eup %2446 }
 0x21d   :  { %v426_v13 = vsub.f32 1.0, %v2447_v11  ;;  %v428_v24 = vmul.f32 %v2447_v11, %v2883_v31 }
 0x21e   :  { %v424_v6 = vadd.f32 %v1519_v2, %v423_v4  ;;  %v610_v4 = vpop.permute.xlu1 %609 }
 0x21f   :  { %vm611_vm11 = vcmp.eq.s32.totalorder %v610_v4, 1 }
 0x220   :  { %2448 = vtanh.f32 %v424_v6 }
 0x22a   :  { %v2449_v18 = vpop.eup %2448 }
 0x22b   :  { %v427_v19 = vmul.f32 %v2449_v18, %v426_v13 }
 0x22d   :  { %v429_v27 = vadd.f32 %v428_v24, %v427_v19  ;;  %v1529_v24 = vld [vmem:[%s3255_s0 + $0x48] sm:$0xff] }
 0x22f   :  { %v436_v28 = vsel %vm435_vm10, %v429_v27, 0.0  ;;  %v2947_v29 = vsel %vm435_vm10, %v429_v27, %v2883_v31  ;;  %v1523_v31 = vld [vmem:[%s3255_s0 + $0x30] sm:$0xff] }
 0x230   :  { %1522 = vst [vmem:[%s3261_s6 + $0x8] sm:$0xff] %v436_v28  ;;  %509 = vmatmul.mubr.f32.vlgmr.msra.gmra.mrb[4].mxu0 %v2947_v29  ;;  %1798 = vmatmul.mubr.f32.vlgmr.msra.gmra.mrb[4].mxu1 %v2947_v29 }
 0x231   :  { %2146 = vmatpush1.bf16.msra.mxu0 %v2596_v9  ;;  %2177 = vmatpush3.bf16.msra.mxu1 %v2659_v30 }
 0x232   :  { %2148 = vmatprep.subr.bf16.mxu0 %v2598_v10  ;;  %2178 = vmatprep.subr.bf16.mxu1 %v2534_v7 }
 0x233   :  { %684 = vmatprep.mubr.f32.mxu0 %v2535_v8  ;;  %1832 = vmatprep.mubr.msk.f32.mxu1 %vm2536_vm0, %v2535_v8 }
 0x235   :  { %2150 = vmatpush1.bf16.msra.mxu0 %v2618_v16  ;;  %2180 = vmatpush3.bf16.msra.mxu1 %v2683_v38 }
 0x236   :  { %2152 = vmatprep.subr.bf16.mxu0 %v2621_v17  ;;  %2181 = vmatprep.subr.bf16.mxu1 %v2534_v7 }
 0x239   :  { %2154 = vmatpush1.bf16.msra.mxu0 %v2636_v22  ;;  %2183 = vmatpush3.bf16.msra.mxu1 %v2716_v48 }
 0x23a   :  { %2156 = vmatprep.subr.bf16.mxu0 %v2639_v23  ;;  %2184 = vmatprep.subr.bf16.mxu1 %v2534_v7 }
 0x23d   :  { %2158 = vmatpush1.bf16.msra.mxu0 %v2665_v32  ;;  %2186 = vmatpush3.bf16.msra.mxu1 %v2748_v59 }
 0x23e   :  { %2160 = vmatprep.subr.bf16.mxu0 %v2671_v34  ;;  %2187 = vmatprep.subr.bf16.mxu1 %v2534_v7 }
 0x241   :  { %2162 = vmatpush1.bf16.msra.mxu0 %v2696_v42  ;;  %2189 = vmatpush3.bf16.msra.mxu1 %v2775_v5 }
 0x242   :  { %2164 = vmatprep.subr.bf16.mxu0 %v2707_v45  ;;  %2190 = vmatprep.subr.bf16.mxu1 %v2534_v7 }
 0x245   :  { %2166 = vmatpush1.bf16.msra.mxu0 %v2732_v53  ;;  %2192 = vmatpush3.bf16.msra.mxu1 %v2791_v15 }
 0x246   :  { %2168 = vmatprep.subr.bf16.mxu0 %v2736_v55  ;;  %2193 = vmatprep.subr.bf16.mxu1 %v2534_v7 }
 0x249   :  { %2170 = vmatpush1.bf16.msra.mxu0 %v2762_v63  ;;  %2195 = vmatpush3.bf16.msra.mxu1 %v2807_v21 }
 0x24a   :  { %2172 = vmatprep.subr.bf16.mxu0 %v2766_v1  ;;  %2196 = vmatprep.subr.bf16.mxu1 %v2534_v7 }
 0x24d   :  { %2174 = vmatpush1.bf16.msra.mxu0 %v2786_v12  ;;  %2198 = vmatpush3.bf16.msra.mxu1 %v2821_v26 }
 0x24e   :  { %2200 = vmatprep.subr.bf16.mxu0 %v2583_v3  ;;  %2231 = vmatprep.subr.bf16.mxu1 %v2534_v7 }
 0x303   :  { %v510_v20 = vpop.f32.mrb[4].mxu0  ;;  %v581_v33 = vpop.f32.mrb[4].mxu1 }
 0x304   :  { %v511_v37 = vadd.f32 %v510_v20, %v2863_v35  ;;  %v512_v39 = vpop.f32.mrb[5].mxu0  ;;  %v1799_v40 = vpop.f32.mrb[5].mxu1  ;;  %v582_v54 = vadd.f32 %v581_v33, %v2875_v60 }
 0x305   :  { %v513_v41 = vadd.f32 %v512_v39, %v2865_v36 }
 0x306   :  { %v585_v43 = vadd.f32 %v1523_v31, %v511_v37  ;;  %v1530_v37 = vld [vmem:[%s3255_s0 + $0x50] sm:$0xff] }
 0x307   :  { %v592_v49 = vadd.f32 %v1524_v46, %v513_v41 }
 0x308   :  { %v1526_v47 = vmul.f32 -1.442695, %v585_v43 }
 0x309   :  { %v1527_v50 = vmul.f32 -1.442695, %v592_v49 }
 0x30a   :  { %2450 = vpow2.f32 %v1526_v47 }
 0x30b   :  { %2452 = vpow2.f32 %v1527_v50 }
 0x314   :  { %v2451_v51 = vpop.eup %2450 }
 0x315   :  { %v589_v44 = vadd.f32 1.0, %v2451_v51  ;;  %v2453_v52 = vpop.eup %2452 }
 0x316   :  { %v596_v14 = vadd.f32 1.0, %v2453_v52 }
 0x317   :  { %2454 = vrcp.f32 %v589_v44  ;;  %v1531_v44 = vld [vmem:[%s3255_s0 + $0x58] sm:$0xff] }
 0x318   :  { %2456 = vrcp.f32 %v596_v14 }
 0x321   :  { %v2455_v56 = vpop.eup %2454 }
 0x322   :  { %v599_v58 = vmul.f32 %v2455_v56, %v582_v54  ;;  %v2457_v62 = vpop.eup %2456 }
 0x323   :  { %v602_v0 = vsub.f32 1.0, %v2457_v62  ;;  %v604_v11 = vmul.f32 %v2457_v62, %v2947_v29  ;;  %v786_v62 = vpop.permute.xlu1 %785 }
 0x324   :  { %v600_v61 = vadd.f32 %v1525_v57, %v599_v58  ;;  %vm787_vm12 = vcmp.eq.s32.totalorder %v786_v62, 1 }
 0x326   :  { %2458 = vtanh.f32 %v600_v61 }
 0x330   :  { %v2459_v2 = vpop.eup %2458 }
 0x331   :  { %v603_v6 = vmul.f32 %v2459_v2, %v602_v0 }
 0x333   :  { %v605_v13 = vadd.f32 %v604_v11, %v603_v6  ;;  %v1535_v6 = vld [vmem:[%s3255_s0 + $0x60] sm:$0xff] }
 0x335   :  { %v612_v18 = vsel %vm611_vm11, %v605_v13, 0.0  ;;  %v3003_v19 = vsel %vm611_vm11, %v605_v13, %v2947_v29 }
 0x336   :  { %1528 = vst [vmem:[%s3261_s6 + $0x10] sm:$0xff] %v612_v18  ;;  %685 = vmatmul.mubr.f32.vlgmr.msra.gmra.mrb[6].mxu0 %v3003_v19  ;;  %1833 = vmatmul.mubr.f32.vlgmr.msra.gmra.mrb[6].mxu1 %v3003_v19 }
 0x337   :  { %2202 = vmatpush1.bf16.msra.mxu0 %v2596_v9  ;;  %2233 = vmatpush3.bf16.msra.mxu1 %v2659_v30 }
 0x338   :  { %2204 = vmatprep.subr.bf16.mxu0 %v2598_v10  ;;  %2234 = vmatprep.subr.bf16.mxu1 %v2534_v7 }
 0x339   :  { %860 = vmatprep.mubr.f32.mxu0 %v2535_v8  ;;  %1867 = vmatprep.mubr.msk.f32.mxu1 %vm2536_vm0, %v2535_v8 }
 0x33b   :  { %2206 = vmatpush1.bf16.msra.mxu0 %v2618_v16  ;;  %2236 = vmatpush3.bf16.msra.mxu1 %v2683_v38 }
 0x33c   :  { %2208 = vmatprep.subr.bf16.mxu0 %v2621_v17  ;;  %2237 = vmatprep.subr.bf16.mxu1 %v2534_v7 }
 0x33f   :  { %2210 = vmatpush1.bf16.msra.mxu0 %v2636_v22  ;;  %2239 = vmatpush3.bf16.msra.mxu1 %v2716_v48 }
 0x340   :  { %2212 = vmatprep.subr.bf16.mxu0 %v2639_v23  ;;  %2240 = vmatprep.subr.bf16.mxu1 %v2534_v7 }
 0x343   :  { %2214 = vmatpush1.bf16.msra.mxu0 %v2665_v32  ;;  %2242 = vmatpush3.bf16.msra.mxu1 %v2748_v59 }
 0x344   :  { %2216 = vmatprep.subr.bf16.mxu0 %v2671_v34  ;;  %2243 = vmatprep.subr.bf16.mxu1 %v2534_v7 }
 0x347   :  { %2218 = vmatpush1.bf16.msra.mxu0 %v2696_v42  ;;  %2245 = vmatpush3.bf16.msra.mxu1 %v2775_v5 }
 0x348   :  { %2220 = vmatprep.subr.bf16.mxu0 %v2707_v45  ;;  %2246 = vmatprep.subr.bf16.mxu1 %v2534_v7 }
 0x34b   :  { %2222 = vmatpush1.bf16.msra.mxu0 %v2732_v53  ;;  %2248 = vmatpush3.bf16.msra.mxu1 %v2791_v15 }
 0x34c   :  { %2224 = vmatprep.subr.bf16.mxu0 %v2736_v55  ;;  %2249 = vmatprep.subr.bf16.mxu1 %v2534_v7 }
 0x34f   :  { %2226 = vmatpush1.bf16.msra.mxu0 %v2762_v63  ;;  %2251 = vmatpush3.bf16.msra.mxu1 %v2807_v21 }
 0x350   :  { %2228 = vmatprep.subr.bf16.mxu0 %v2766_v1  ;;  %2252 = vmatprep.subr.bf16.mxu1 %v2534_v7 }
 0x353   :  { %2230 = vmatpush1.bf16.msra.mxu0 %v2786_v12  ;;  %2254 = vmatpush3.bf16.msra.mxu1 %v2821_v26 }
 0x354   :  { %2256 = vmatprep.subr.bf16.mxu0 %v2583_v3  ;;  %2287 = vmatprep.subr.bf16.mxu1 %v2534_v7 }
 0x409   :  { %v686_v25 = vpop.f32.mrb[6].mxu0  ;;  %v757_v27 = vpop.f32.mrb[6].mxu1 }
 0x40a   :  { %v687_v28 = vadd.f32 %v686_v25, %v2863_v35  ;;  %v688_v29 = vpop.f32.mrb[7].mxu0  ;;  %v1834_v31 = vpop.f32.mrb[7].mxu1  ;;  %v758_v50 = vadd.f32 %v757_v27, %v2875_v60 }
 0x40b   :  { %v689_v20 = vadd.f32 %v688_v29, %v2865_v36 }
 0x40c   :  { %v761_v33 = vadd.f32 %v1529_v24, %v687_v28  ;;  %v1536_v28 = vld [vmem:[%s3255_s0 + $0x68] sm:$0xff] }
 0x40d   :  { %v768_v40 = vadd.f32 %v1530_v37, %v689_v20 }
 0x40e   :  { %v1532_v39 = vmul.f32 -1.442695, %v761_v33 }
 0x40f   :  { %v1533_v41 = vmul.f32 -1.442695, %v768_v40 }
 0x410   :  { %2460 = vpow2.f32 %v1532_v39 }
 0x411   :  { %2462 = vpow2.f32 %v1533_v41 }
 0x41a   :  { %v2461_v43 = vpop.eup %2460 }
 0x41b   :  { %v765_v46 = vadd.f32 1.0, %v2461_v43  ;;  %v2463_v47 = vpop.eup %2462 }
 0x41c   :  { %v772_v49 = vadd.f32 1.0, %v2463_v47 }
 0x41d   :  { %2464 = vrcp.f32 %v765_v46  ;;  %v1537_v46 = vld [vmem:[%s3255_s0 + $0x70] sm:$0xff] }
 0x41e   :  { %2466 = vrcp.f32 %v772_v49 }
 0x427   :  { %v2465_v51 = vpop.eup %2464 }
 0x428   :  { %v775_v52 = vmul.f32 %v2465_v51, %v758_v50  ;;  %v2467_v54 = vpop.eup %2466 }
 0x429   :  { %v778_v56 = vsub.f32 1.0, %v2467_v54  ;;  %v780_v61 = vmul.f32 %v2467_v54, %v3003_v19  ;;  %v962_v54 = vpop.permute.xlu0 %961 }
 0x42a   :  { %v776_v14 = vadd.f32 %v1531_v44, %v775_v52  ;;  %vm963_vm13 = vcmp.eq.s32.totalorder %v962_v54, 1 }
 0x42c   :  { %2468 = vtanh.f32 %v776_v14 }
 0x436   :  { %v2469_v57 = vpop.eup %2468 }
 0x437   :  { %v779_v58 = vmul.f32 %v2469_v57, %v778_v56 }
 0x439   :  { %v781_v0 = vadd.f32 %v780_v61, %v779_v58  ;;  %v1541_v61 = vld [vmem:[%s3255_s0 + $0x78] sm:$0xff] }
 0x43b   :  { %v788_v2 = vsel %vm787_vm12, %v781_v0, 0.0  ;;  %v3059_v4 = vsel %vm787_vm12, %v781_v0, %v3003_v19 }
 0x43c   :  { %1534 = vst [vmem:[%s3261_s6 + $0x18] sm:$0xff] %v788_v2  ;;  %861 = vmatmul.mubr.f32.vlgmr.msra.gmra.mrb[8].mxu0 %v3059_v4  ;;  %1868 = vmatmul.mubr.f32.vlgmr.msra.gmra.mrb[8].mxu1 %v3059_v4 }
 0x43d   :  { %2258 = vmatpush1.bf16.msra.mxu0 %v2596_v9  ;;  %2289 = vmatpush3.bf16.msra.mxu1 %v2659_v30 }
 0x43e   :  { %2260 = vmatprep.subr.bf16.mxu0 %v2598_v10  ;;  %2290 = vmatprep.subr.bf16.mxu1 %v2534_v7 }
 0x43f   :  { %1036 = vmatprep.mubr.f32.mxu0 %v2535_v8  ;;  %1902 = vmatprep.mubr.msk.f32.mxu1 %vm2536_vm0, %v2535_v8 }
 0x441   :  { %2262 = vmatpush1.bf16.msra.mxu0 %v2618_v16  ;;  %2292 = vmatpush3.bf16.msra.mxu1 %v2683_v38 }
 0x442   :  { %2264 = vmatprep.subr.bf16.mxu0 %v2621_v17  ;;  %2293 = vmatprep.subr.bf16.mxu1 %v2534_v7 }
 0x445   :  { %2266 = vmatpush1.bf16.msra.mxu0 %v2636_v22  ;;  %2295 = vmatpush3.bf16.msra.mxu1 %v2716_v48 }
 0x446   :  { %2268 = vmatprep.subr.bf16.mxu0 %v2639_v23  ;;  %2296 = vmatprep.subr.bf16.mxu1 %v2534_v7 }
 0x449   :  { %2270 = vmatpush1.bf16.msra.mxu0 %v2665_v32  ;;  %2298 = vmatpush3.bf16.msra.mxu1 %v2748_v59 }
 0x44a   :  { %2272 = vmatprep.subr.bf16.mxu0 %v2671_v34  ;;  %2299 = vmatprep.subr.bf16.mxu1 %v2534_v7 }
 0x44d   :  { %2274 = vmatpush1.bf16.msra.mxu0 %v2696_v42  ;;  %2301 = vmatpush3.bf16.msra.mxu1 %v2775_v5 }
 0x44e   :  { %2276 = vmatprep.subr.bf16.mxu0 %v2707_v45  ;;  %2302 = vmatprep.subr.bf16.mxu1 %v2534_v7 }
 0x451   :  { %2278 = vmatpush1.bf16.msra.mxu0 %v2732_v53  ;;  %2304 = vmatpush3.bf16.msra.mxu1 %v2791_v15 }
 0x452   :  { %2280 = vmatprep.subr.bf16.mxu0 %v2736_v55  ;;  %2305 = vmatprep.subr.bf16.mxu1 %v2534_v7 }
 0x455   :  { %2282 = vmatpush1.bf16.msra.mxu0 %v2762_v63  ;;  %2307 = vmatpush3.bf16.msra.mxu1 %v2807_v21 }
 0x456   :  { %2284 = vmatprep.subr.bf16.mxu0 %v2766_v1  ;;  %2308 = vmatprep.subr.bf16.mxu1 %v2534_v7 }
 0x459   :  { %2286 = vmatpush1.bf16.msra.mxu0 %v2786_v12  ;;  %2310 = vmatpush3.bf16.msra.mxu1 %v2821_v26 }
 0x45a   :  { %2312 = vmatprep.subr.bf16.mxu0 %v2583_v3  ;;  %2343 = vmatprep.subr.bf16.mxu1 %v2534_v7 }
 0x50f   :  { %v862_v11 = vpop.f32.mrb[8].mxu0  ;;  %v933_v13 = vpop.f32.mrb[8].mxu1 }
 0x510   :  { %v863_v18 = vadd.f32 %v862_v11, %v2863_v35  ;;  %v864_v19 = vpop.f32.mrb[9].mxu0  ;;  %v1869_v24 = vpop.f32.mrb[9].mxu1  ;;  %v934_v41 = vadd.f32 %v933_v13, %v2875_v60 }
 0x511   :  { %v865_v25 = vadd.f32 %v864_v19, %v2865_v36 }
 0x512   :  { %v937_v27 = vadd.f32 %v1535_v6, %v863_v18  ;;  %v1542_v18 = vld [vmem:[%s3255_s0 + $0x80] sm:$0xff] }
 0x513   :  { %v944_v31 = vadd.f32 %v1536_v28, %v865_v25 }
 0x514   :  { %v1538_v29 = vmul.f32 -1.442695, %v937_v27 }
 0x515   :  { %v1539_v20 = vmul.f32 -1.442695, %v944_v31 }
 0x516   :  { %2470 = vpow2.f32 %v1538_v29 }
 0x517   :  { %2472 = vpow2.f32 %v1539_v20 }
 0x520   :  { %v2471_v33 = vpop.eup %2470 }
 0x521   :  { %v941_v37 = vadd.f32 1.0, %v2471_v33  ;;  %v2473_v39 = vpop.eup %2472  ;;  %v1543_v33 = vld [vmem:[%s3255_s0 + $0x88] sm:$0xff] }
 0x522   :  { %v948_v40 = vadd.f32 1.0, %v2473_v39 }
 0x523   :  { %2474 = vrcp.f32 %v941_v37 }
 0x524   :  { %2476 = vrcp.f32 %v948_v40 }
 0x52d   :  { %v2475_v43 = vpop.eup %2474 }
 0x52e   :  { %v951_v47 = vmul.f32 %v2475_v43, %v934_v41  ;;  %v2477_v50 = vpop.eup %2476 }
 0x52f   :  { %v954_v51 = vsub.f32 1.0, %v2477_v50  ;;  %v956_v14 = vmul.f32 %v2477_v50, %v3059_v4 }
 0x530   :  { %v952_v49 = vadd.f32 %v1537_v46, %v951_v47 }
 0x532   :  { %2478 = vtanh.f32 %v952_v49  ;;  %v1138_v49 = vpop.permute.xlu1 %1137 }
 0x533   :  { %vm1139_vm14 = vcmp.eq.s32.totalorder %v1138_v49, 1 }
 0x53c   :  { %v2479_v44 = vpop.eup %2478 }
 0x53d   :  { %v955_v52 = vmul.f32 %v2479_v44, %v954_v51 }
 0x53f   :  { %v957_v56 = vadd.f32 %v956_v14, %v955_v52 }
 0x541   :  { %v964_v57 = vsel %vm963_vm13, %v957_v56, 0.0  ;;  %v3115_v58 = vsel %vm963_vm13, %v957_v56, %v3059_v4 }
 0x542   :  { %1540 = vst [vmem:[%s3261_s6 + $0x20] sm:$0xff] %v964_v57  ;;  %1037 = vmatmul.mubr.f32.vlgmr.msra.gmra.mrb[10].mxu0 %v3115_v58  ;;  %1903 = vmatmul.mubr.f32.vlgmr.msra.gmra.mrb[10].mxu1 %v3115_v58 }
 0x543   :  { %2314 = vmatpush1.bf16.msra.mxu0 %v2596_v9  ;;  %2345 = vmatpush3.bf16.msra.mxu1 %v2659_v30 }
 0x544   :  { %2316 = vmatprep.subr.bf16.mxu0 %v2598_v10  ;;  %2346 = vmatprep.subr.bf16.mxu1 %v2534_v7 }
 0x545   :  { %1212 = vmatprep.mubr.f32.mxu0 %v2535_v8  ;;  %1937 = vmatprep.mubr.msk.f32.mxu1 %vm2536_vm0, %v2535_v8 }
 0x547   :  { %2318 = vmatpush1.bf16.msra.mxu0 %v2618_v16  ;;  %2348 = vmatpush3.bf16.msra.mxu1 %v2683_v38 }
 0x548   :  { %2320 = vmatprep.subr.bf16.mxu0 %v2621_v17  ;;  %2349 = vmatprep.subr.bf16.mxu1 %v2534_v7 }
 0x54b   :  { %2322 = vmatpush1.bf16.msra.mxu0 %v2636_v22  ;;  %2351 = vmatpush3.bf16.msra.mxu1 %v2716_v48 }
 0x54c   :  { %2324 = vmatprep.subr.bf16.mxu0 %v2639_v23  ;;  %2352 = vmatprep.subr.bf16.mxu1 %v2534_v7 }
 0x54f   :  { %2326 = vmatpush1.bf16.msra.mxu0 %v2665_v32  ;;  %2354 = vmatpush3.bf16.msra.mxu1 %v2748_v59 }
 0x550   :  { %2328 = vmatprep.subr.bf16.mxu0 %v2671_v34  ;;  %2355 = vmatprep.subr.bf16.mxu1 %v2534_v7 }
 0x553   :  { %2330 = vmatpush1.bf16.msra.mxu0 %v2696_v42  ;;  %2357 = vmatpush3.bf16.msra.mxu1 %v2775_v5 }
 0x554   :  { %2332 = vmatprep.subr.bf16.mxu0 %v2707_v45  ;;  %2358 = vmatprep.subr.bf16.mxu1 %v2534_v7 }
 0x557   :  { %2334 = vmatpush1.bf16.msra.mxu0 %v2732_v53  ;;  %2360 = vmatpush3.bf16.msra.mxu1 %v2791_v15 }
 0x558   :  { %2336 = vmatprep.subr.bf16.mxu0 %v2736_v55  ;;  %2361 = vmatprep.subr.bf16.mxu1 %v2534_v7 }
 0x55b   :  { %2338 = vmatpush1.bf16.msra.mxu0 %v2762_v63  ;;  %2363 = vmatpush3.bf16.msra.mxu1 %v2807_v21 }
 0x55c   :  { %2340 = vmatprep.subr.bf16.mxu0 %v2766_v1  ;;  %2364 = vmatprep.subr.bf16.mxu1 %v2534_v7 }
 0x55f   :  { %2342 = vmatpush1.bf16.msra.mxu0 %v2786_v12  ;;  %2366 = vmatpush3.bf16.msra.mxu1 %v2821_v26 }
 0x560   :  { %2368 = vmatprep.subr.bf16.mxu0 %v2583_v3  ;;  %2399 = vmatprep.subr.bf16.mxu1 %v2534_v7 }
 0x615   :  { %v1038_v62 = vpop.f32.mrb[10].mxu0  ;;  %v1109_v0 = vpop.f32.mrb[10].mxu1 }
 0x616   :  { %v1039_v2 = vadd.f32 %v1038_v62, %v2863_v35  ;;  %v1040_v4 = vpop.f32.mrb[11].mxu0  ;;  %v1904_v6 = vpop.f32.mrb[11].mxu1  ;;  %v1110_v31 = vadd.f32 %v1109_v0, %v2875_v60 }
 0x617   :  { %v1041_v11 = vadd.f32 %v1040_v4, %v2865_v36 }
 0x618   :  { %v1113_v13 = vadd.f32 %v1541_v61, %v1039_v2 }
 0x619   :  { %v1120_v19 = vadd.f32 %v1542_v18, %v1041_v11 }
 0x61a   :  { %v1544_v3 = vmul.f32 -1.442695, %v1113_v13  ;;  %v1554_v13 = vld [vmem:[%s3255_s0 + $0xb0] sm:$0xff] }
 0x61b   :  { %v1545_v24 = vmul.f32 -1.442695, %v1120_v19 }
 0x61c   :  { %2480 = vpow2.f32 %v1544_v3 }
 0x61d   :  { %2482 = vpow2.f32 %v1545_v24 }
 0x626   :  { %v2481_v25 = vpop.eup %2480 }
 0x627   :  { %v1117_v27 = vadd.f32 1.0, %v2481_v25  ;;  %v2483_v28 = vpop.eup %2482 }
 0x628   :  { %v1124_v29 = vadd.f32 1.0, %v2483_v28 }
 0x629   :  { %2484 = vrcp.f32 %v1117_v27 }
 0x62a   :  { %2486 = vrcp.f32 %v1124_v29 }
 0x633   :  { %v2485_v20 = vpop.eup %2484 }
 0x634   :  { %v1127_v37 = vmul.f32 %v2485_v20, %v1110_v31  ;;  %v2487_v40 = vpop.eup %2486 }
 0x635   :  { %v1130_v41 = vsub.f32 1.0, %v2487_v40  ;;  %v1132_v47 = vmul.f32 %v2487_v40, %v3115_v58  ;;  %v1490_v40 = vpop.permute.xlu1 %1489 }
 0x636   :  { %v1128_v39 = vadd.f32 %v1543_v33, %v1127_v37 }
 0x638   :  { %2488 = vtanh.f32 %v1128_v39 }
 0x642   :  { %v2489_v43 = vpop.eup %2488 }
 0x643   :  { %v1131_v46 = vmul.f32 %v2489_v43, %v1130_v41 }
 0x645   :  { %v1133_v50 = vadd.f32 %v1132_v47, %v1131_v46 }
 0x647   :  { %v1140_v51 = vsel %vm1139_vm14, %v1133_v50, 0.0  ;;  %v3171_v44 = vsel %vm1139_vm14, %v1133_v50, %v3115_v58  ;;  %v1553_v58 = vld [vmem:[%s3255_s0 + $0xa8] sm:$0xff] }
 0x648   :  { %1546 = vst [vmem:[%s3261_s6 + $0x28] sm:$0xff] %v1140_v51  ;;  %1213 = vmatmul.mubr.f32.vlgmr.msra.gmra.mrb[12].mxu0 %v3171_v44  ;;  %1938 = vmatmul.mubr.f32.vlgmr.msra.gmra.mrb[12].mxu1 %v3171_v44 }
 0x649   :  { %2370 = vmatpush1.bf16.msra.mxu0 %v2596_v9  ;;  %2401 = vmatpush3.bf16.msra.mxu1 %v2659_v30 }
 0x64a   :  { %2372 = vmatprep.subr.bf16.mxu0 %v2598_v10  ;;  %2402 = vmatprep.subr.bf16.mxu1 %v2534_v7 }
 0x64b   :  { %1388 = vmatprep.mubr.f32.mxu0 %v2535_v8  ;;  %1972 = vmatprep.mubr.msk.f32.mxu1 %vm2536_vm0, %v2535_v8  ;;  %v1547_v8 = vld [vmem:[%s3255_s0 + $0x90] sm:$0xff]  ;;  %vm1491_vm0 = vcmp.eq.s32.totalorder %v1490_v40, 1 }
 0x64d   :  { %2374 = vmatpush1.bf16.msra.mxu0 %v2618_v16  ;;  %2404 = vmatpush3.bf16.msra.mxu1 %v2683_v38 }
 0x64e   :  { %2376 = vmatprep.subr.bf16.mxu0 %v2621_v17  ;;  %2405 = vmatprep.subr.bf16.mxu1 %v2534_v7 }
 0x651   :  { %2378 = vmatpush1.bf16.msra.mxu0 %v2636_v22  ;;  %2407 = vmatpush3.bf16.msra.mxu1 %v2716_v48 }
 0x652   :  { %2380 = vmatprep.subr.bf16.mxu0 %v2639_v23  ;;  %2408 = vmatprep.subr.bf16.mxu1 %v2534_v7 }
 0x655   :  { %2382 = vmatpush1.bf16.msra.mxu0 %v2665_v32  ;;  %2410 = vmatpush3.bf16.msra.mxu1 %v2748_v59 }
 0x656   :  { %2384 = vmatprep.subr.bf16.mxu0 %v2671_v34  ;;  %2411 = vmatprep.subr.bf16.mxu1 %v2534_v7 }
 0x659   :  { %2386 = vmatpush1.bf16.msra.mxu0 %v2696_v42  ;;  %2413 = vmatpush3.bf16.msra.mxu1 %v2775_v5 }
 0x65a   :  { %2388 = vmatprep.subr.bf16.mxu0 %v2707_v45  ;;  %2414 = vmatprep.subr.bf16.mxu1 %v2534_v7 }
 0x65d   :  { %2390 = vmatpush1.bf16.msra.mxu0 %v2732_v53  ;;  %2416 = vmatpush3.bf16.msra.mxu1 %v2791_v15 }
 0x65e   :  { %2392 = vmatprep.subr.bf16.mxu0 %v2736_v55  ;;  %2417 = vmatprep.subr.bf16.mxu1 %v2534_v7 }
 0x661   :  { %2394 = vmatpush1.bf16.msra.mxu0 %v2762_v63  ;;  %2419 = vmatpush3.bf16.msra.mxu1 %v2807_v21  ;;  %v1549_v63 = vld [vmem:[%s3255_s0 + $0xa0] sm:$0xff] }
 0x662   :  { %2396 = vmatprep.subr.bf16.mxu0 %v2766_v1  ;;  %2420 = vmatprep.subr.bf16.mxu1 %v2534_v7  ;;  %v1548_v7 = vld [vmem:[%s3255_s0 + $0x98] sm:$0xff] }
 0x665   :  { %2398 = vmatpush1.bf16.msra.mxu0 %v2786_v12  ;;  %2422 = vmatpush3.bf16.msra.mxu1 %v2821_v26  ;;  %v1314_v26 = vpop.permute.xlu0 %1313 }
 0x666   :  { %vm1315_vm15 = vcmp.eq.s32.totalorder %v1314_v26, 1 }
 0x71b   :  { %v1214_v9 = vpop.f32.mrb[12].mxu0  ;;  %v1285_v10 = vpop.f32.mrb[12].mxu1 }
 0x71c   :  { %v1215_v16 = vadd.f32 %v1214_v9, %v2863_v35  ;;  %v1216_v17 = vpop.f32.mrb[13].mxu0  ;;  %v1939_v22 = vpop.f32.mrb[13].mxu1  ;;  %v1286_v55 = vadd.f32 %v1285_v10, %v2875_v60 }
 0x71d   :  { %v1217_v23 = vadd.f32 %v1216_v17, %v2865_v36 }
 0x71e   :  { %v1289_v30 = vadd.f32 %v1547_v8, %v1215_v16 }
 0x71f   :  { %v1296_v34 = vadd.f32 %v1548_v7, %v1217_v23 }
 0x720   :  { %v1550_v32 = vmul.f32 -1.442695, %v1289_v30 }
 0x721   :  { %v1551_v38 = vmul.f32 -1.442695, %v1296_v34 }
 0x722   :  { %2490 = vpow2.f32 %v1550_v32 }
 0x723   :  { %2492 = vpow2.f32 %v1551_v38 }
 0x72c   :  { %v2491_v42 = vpop.eup %2490 }
 0x72d   :  { %v1293_v45 = vadd.f32 1.0, %v2491_v42  ;;  %v2493_v48 = vpop.eup %2492 }
 0x72e   :  { %v1300_v53 = vadd.f32 1.0, %v2493_v48 }
 0x72f   :  { %2494 = vrcp.f32 %v1293_v45 }
 0x730   :  { %2496 = vrcp.f32 %v1300_v53 }
 0x739   :  { %v2495_v59 = vpop.eup %2494 }
 0x73a   :  { %v1303_v1 = vmul.f32 %v2495_v59, %v1286_v55  ;;  %v2497_v12 = vpop.eup %2496 }
 0x73b   :  { %v1306_v15 = vsub.f32 1.0, %v2497_v12  ;;  %v1308_v14 = vmul.f32 %v2497_v12, %v3171_v44 }
 0x73c   :  { %v1304_v5 = vadd.f32 %v1549_v63, %v1303_v1 }
 0x73e   :  { %2498 = vtanh.f32 %v1304_v5 }
 0x748   :  { %v2499_v21 = vpop.eup %2498 }
 0x749   :  { %v1307_v52 = vmul.f32 %v2499_v21, %v1306_v15 }
 0x74b   :  { %v1309_v54 = vadd.f32 %v1308_v14, %v1307_v52 }
 0x74d   :  { %v1316_v56 = vsel %vm1315_vm15, %v1309_v54, 0.0  ;;  %v1319_v57 = vsel %vm1315_vm15, %v1309_v54, %v3171_v44 }
 0x74e   :  { %1552 = vst [vmem:[%s3261_s6 + $0x30] sm:$0xff] %v1316_v56  ;;  %1389 = vmatmul.mubr.f32.vlgmr.msra.gmra.mrb[14].mxu0 %v1319_v57  ;;  %1973 = vmatmul.mubr.f32.vlgmr.msra.gmra.mrb[14].mxu1 %v1319_v57 }
 0x821   :  { %v1390_v61 = vpop.f32.mrb[14].mxu0  ;;  %v1461_v62 = vpop.f32.mrb[14].mxu1 }
 0x822   :  { %v1391_v0 = vadd.f32 %v1390_v61, %v2863_v35  ;;  %v1392_v2 = vpop.f32.mrb[15].mxu0  ;;  %v1974_v4 = vpop.f32.mrb[15].mxu1  ;;  %v1462_v35 = vadd.f32 %v1461_v62, %v2875_v60 }
 0x823   :  { %v1393_v6 = vadd.f32 %v1392_v2, %v2865_v36  ;;  %v1555_v36 = vld [vmem:[%s3255_s0 + $0xb8] sm:$0xff]  ;;  %s2510_s0 = scalar_lea.vmem %s1504_s29, 128 }
 0x824   :  { %v1465_v11 = vadd.f32 %v1553_v58, %v1391_v0  ;;  %p2511_p0 = scmp.ne.s32.totalorder %s1504_s29, %s2510_s0  ;;  %p2516_p2 = scmp.lt.s32.totalorder %s2510_s0, %s2510_s0 }
 0x825   :  { %v1472_v3 = vadd.f32 %v1554_v13, %v1393_v6 }
 0x826   :  { %v1556_v18 = vmul.f32 -1.442695, %v1465_v11  ;;  %p2517_p3 = por %p2516_p2, %p2515_p1 }
 0x827   :  { %v1557_v19 = vmul.f32 -1.442695, %v1472_v3 }
 0x828   :  { %2500 = vpow2.f32 %v1556_v18  ;;  %p2518_p4 = pnand %p2517_p3, %p2511_p0 }
 0x829   :  { %2502 = vpow2.f32 %v1557_v19 }
 0x832   :  { %v2501_v24 = vpop.eup %2500 }
 0x833   :  { %v1469_v25 = vadd.f32 1.0, %v2501_v24  ;;  %v2503_v27 = vpop.eup %2502 }
 0x834   :  { %v1476_v28 = vadd.f32 1.0, %v2503_v27 }
 0x835   :  { %2504 = vrcp.f32 %v1469_v25 }
 0x836   :  { %2506 = vrcp.f32 %v1476_v28 }
 0x83f   :  { %v2505_v29 = vpop.eup %2504 }
 0x840   :  { %v1479_v31 = vmul.f32 %v2505_v29, %v1462_v35  ;;  %v2507_v33 = vpop.eup %2506 }
 0x841   :  { %v1482_v37 = vsub.f32 1.0, %v2507_v33  ;;  %v1484_v43 = vmul.f32 %v2507_v33, %v1319_v57 }
 0x842   :  { %v1480_v20 = vadd.f32 %v1555_v36, %v1479_v31 }
 0x844   :  { %2508 = vtanh.f32 %v1480_v20 }
 0x84e   :  { %v2509_v39 = vpop.eup %2508 }
 0x84f   :  { %v1483_v41 = vmul.f32 %v2509_v39, %v1482_v37 }
 0x851   :  { %v1485_v46 = vadd.f32 %v1484_v43, %v1483_v41 }
 0x853   :  { %v1492_v60 = vsel %vm1491_vm0, %v1485_v46, 0.0  ;;  %v1495_v47 = vsel %vm1491_vm0, %v1485_v46, %v1319_v57 }
 0x854   :  { %1558 = vst [vmem:[%s3261_s6 + $0x38] sm:$0xff] %v1492_v60  ;;  %1496 = vst [vmem:[#allocation2] sm:$0xff] %v1495_v47 }
 0x855   :  { %2521 = shalt.err (!%p2518_p4)
}
 0x856   :  { %s2522_s10 = scalar_lea.hbm %s3260_s5, 128 }
 0x857   :  { %p2523_p5 = scmp.ne.s32.totalorder %s3260_s5, %s2522_s10  ;;  %p2526_p6 = scmp.lt.u32.totalorder %s2522_s10, %s3260_s5 }
 0x859   :  { %p2528_p7 = pnand %p2526_p6, %p2523_p5 }
 0x85b   :  { %2531 = shalt.err (!%p2528_p7)
}
 0x85c   :  { %1506 = dma.vmem_to_hbm [thread:$0]  %s1504_s29, 128, %s3260_s5, [#allocation3]  }
 0x85d   :  { %2532 = dma.done.wait [#allocation3], 128  }
 0x85e   :  { %2533 = vsyncadd [#allocation3], 4294967168 }
 0x85f   :  { %1514 = vsyncpa [#allocation3], 1 }

// kernel: sentence_vae_forward.9
= control target key start
LH: loop header
LB: loop body
LE: loop exit
PB: predicated region body
PF: predicated region fallthrough
CT: control target
= control target key end

     0   :  { %v537_v2 = vmov 0   ;;  %s756_s0 = inlined_call_operand.vmem [shape: bf16[64,128], index: 0, kind: input, shape index: {}]   ;;  %s757_s1 = inlined_call_operand.vmem [shape: bf16[128,256], index: 1, kind: input, shape index: {}]   ;;  %s758_s2 = inlined_call_operand.vmem [shape: f32[1,256], index: 2, kind: input, shape index: {}]   ;;  %s759_s3 = inlined_call_operand.hbm [shape: f32[64,256], index: 3, kind: output, shape index: {}]  }
   0x1   :  { %v437_v0 = vld [vmem:[%s757_s1 + $0x4] ss:$8 sps:$4 sm:$0xff]   ;;  %v439_v1 = vld [vmem:[%s757_s1] ss:$8 sps:$4 sm:$0xff]   ;;  %188 = vmatprep.mubr.bf16.mxu0 %v537_v2  ;;  %208 = vmatprep.mubr.bf16.mxu1 %v537_v2  ;;  %v440_v3 = vld [vmem:[%s757_s1 + $0x14] ss:$8 sps:$4 sm:$0xff]  }
   0x2   :  { %156 = vmatprep.subr.bf16.mxu0 %v437_v0  ;;  %417 = vmatprep.subr.bf16.mxu1 %v437_v0  ;;  %v442_v4 = vld [vmem:[%s757_s1 + $0x10] ss:$8 sps:$4 sm:$0xff]   ;;  %v443_v5 = vld [vmem:[%s757_s1 + $0x24] ss:$8 sps:$4 sm:$0xff]   ;;  %v445_v6 = vld [vmem:[%s757_s1 + $0x20] ss:$8 sps:$4 sm:$0xff]  }
   0x3   :  { %157 = vmatpush1.bf16.msra.mxu0 %v439_v1  ;;  %425 = vmatpush1.bf16.msra.mxu1 %v439_v1  ;;  %v446_v7 = vld [vmem:[%s757_s1 + $0x34] ss:$8 sps:$4 sm:$0xff]   ;;  %v448_v8 = vld [vmem:[%s757_s1 + $0x30] ss:$8 sps:$4 sm:$0xff]   ;;  %v449_v9 = vld [vmem:[%s757_s1 + $0x44] ss:$8 sps:$4 sm:$0xff]  }
   0x4   :  { %158 = vmatprep.subr.bf16.mxu0 %v440_v3  ;;  %418 = vmatprep.subr.bf16.mxu1 %v440_v3  ;;  %v451_v10 = vld [vmem:[%s757_s1 + $0x40] ss:$8 sps:$4 sm:$0xff]  }
   0x7   :  { %159 = vmatpush1.bf16.msra.mxu0 %v442_v4  ;;  %426 = vmatpush1.bf16.msra.mxu1 %v442_v4 }
   0x8   :  { %160 = vmatprep.subr.bf16.mxu0 %v443_v5  ;;  %419 = vmatprep.subr.bf16.mxu1 %v443_v5 }
   0xb   :  { %161 = vmatpush1.bf16.msra.mxu0 %v445_v6  ;;  %427 = vmatpush1.bf16.msra.mxu1 %v445_v6 }
   0xc   :  { %162 = vmatprep.subr.bf16.mxu0 %v446_v7  ;;  %420 = vmatprep.subr.bf16.mxu1 %v446_v7 }
   0xf   :  { %163 = vmatpush1.bf16.msra.mxu0 %v448_v8  ;;  %428 = vmatpush1.bf16.msra.mxu1 %v448_v8 }
  0x10   :  { %8 = vsyncpa [#allocation3], 0  ;;  %164 = vmatprep.subr.bf16.mxu0 %v449_v9  ;;  %421 = vmatprep.subr.bf16.mxu1 %v449_v9  ;;  %v452_v11 = vld [vmem:[%s757_s1 + $0x54] ss:$8 sps:$4 sm:$0xff]   ;;  %v454_v12 = vld [vmem:[%s757_s1 + $0x50] ss:$8 sps:$4 sm:$0xff]   ;;  %v42_v21 = vlaneseq }
  0x11   :  { %v455_v13 = vld [vmem:[%s757_s1 + $0x64] ss:$8 sps:$4 sm:$0xff]   ;;  %v457_v14 = vld [vmem:[%s757_s1 + $0x60] ss:$8 sps:$4 sm:$0xff]   ;;  %v458_v15 = vld [vmem:[%s757_s1 + $0x74] ss:$8 sps:$4 sm:$0xff]  }
  0x12   :  { %v460_v16 = vld [vmem:[%s757_s1 + $0x70] ss:$8 sps:$4 sm:$0xff]   ;;  %v461_v17 = vld [vmem:[%s756_s0] sm:$0xff]   ;;  %v463_v19 = vld [vmem:[%s756_s0 + $0x8] sm:$0xff]   ;;  %v43_v22 = vshrl.u32 %v42_v21, 7 }
  0x13   :  { %165 = vmatpush1.bf16.msra.mxu0 %v451_v10  ;;  %429 = vmatpush1.bf16.msra.mxu1 %v451_v10  ;;  %v462_v18 = vld [vmem:[%s756_s0 + $0x10] sm:$0xff]   ;;  %v464_v20 = vld [vmem:[%s756_s0 + $0x18] sm:$0xff]   ;;  %v40_v24 = vld [vmem:[%s758_s2] sm:$0x3]  ;;  %s538_s0 = smov [#allocation2]  }
  0x14   :  { %166 = vmatprep.subr.bf16.mxu0 %v452_v11  ;;  %422 = vmatprep.subr.bf16.mxu1 %v452_v11  ;;  %v44_v23 = vsub.s32 0, %v43_v22  ;;  %v48_v25 = vsub.s32 1, %v43_v22  ;;  %s386_s2 = sshll.u32 %s538_s0, 4  ;;  %s387_s2 = int_to_ptr.vmem [resolvable:$true] %s386_s2 }
  0x15   :  { %s513_s26 = scalar_lea.vmem %s387_s2, 2048  ;;  %p518_p1 = scmp.lt.s32.totalorder %s387_s2, %s387_s2 }
  0x16   :  { %v45_v26 = vrot.slane %v40_v24, %v44_v23  ;;  %v49_v27 = vrot.slane %v40_v24, %v48_v25  ;;  %p514_p0 = scmp.ne.s32.totalorder %s387_s2, %s513_s26  ;;  %p519_p2 = scmp.lt.s32.totalorder %s513_s26, %s513_s26 }
  0x17   :  { %167 = vmatpush1.bf16.msra.mxu0 %v454_v12  ;;  %430 = vmatpush1.bf16.msra.mxu1 %v454_v12 }
  0x18   :  { %168 = vmatprep.subr.bf16.mxu0 %v455_v13  ;;  %423 = vmatprep.subr.bf16.mxu1 %v455_v13  ;;  %p520_p3 = por %p519_p2, %p518_p1 }
  0x1a   :  { %p521_p4 = pnand %p520_p3, %p514_p0 }
  0x1b   :  { %169 = vmatpush1.bf16.msra.mxu0 %v457_v14  ;;  %431 = vmatpush1.bf16.msra.mxu1 %v457_v14 }
  0x1c   :  { %170 = vmatprep.subr.bf16.mxu0 %v458_v15  ;;  %424 = vmatprep.subr.bf16.mxu1 %v458_v15 }
  0x1f   :  { %171 = vmatpush1.bf16.msra.mxu0 %v460_v16  ;;  %432 = vmatpush1.bf16.msra.mxu1 %v460_v16 }
  0x22   :  { %189 = vmatmul.mubr.bf16.vlgmr.msra.gmra.mrb[0].mxu0 %v461_v17  ;;  %209 = vmatmul.mubr.bf16.vlgmr.msra.gmra.mrb[0].mxu1 %v462_v18 }
  0x23   :  { %198 = vmatprep.mubr.bf16.mxu0 %v537_v2  ;;  %218 = vmatprep.mubr.bf16.mxu1 %v537_v2 }
  0x2a   :  { %199 = vmatmul.mubr.bf16.gmra.mrb[4].mxu0 %v463_v19  ;;  %219 = vmatmul.mubr.bf16.gmra.mrb[4].mxu1 %v464_v20 }
  0xf5   :  { %v190_v28 = vpop.f32.mrb[0].mxu0  ;;  %v210_v29 = vpop.f32.mrb[0].mxu1 }
  0xf6   :  { %v624_v30 = vadd.f32 %v190_v28, %v45_v26  ;;  %v192_v31 = vpop.f32.mrb[1].mxu0  ;;  %v212_v32 = vpop.f32.mrb[1].mxu1  ;;  %v626_v33 = vadd.f32 %v210_v29, %v45_v26 }
  0xf7   :  { %v628_v34 = vadd.f32 %v192_v31, %v49_v27  ;;  %v630_v35 = vadd.f32 %v212_v32, %v49_v27  ;;  %v194_v36 = vpop.f32.mrb[2].mxu0  ;;  %v214_v37 = vpop.f32.mrb[2].mxu1 }
  0xf8   :  { %v632_v38 = vadd.f32 %v214_v37, %v45_v26  ;;  %v196_v39 = vpop.f32.mrb[3].mxu0  ;;  %v216_v40 = vpop.f32.mrb[3].mxu1  ;;  %v642_v45 = vadd.f32 %v194_v36, %v45_v26 }
  0xf9   :  { %v634_v41 = vadd.f32 %v216_v40, %v49_v27  ;;  %v229_v42 = vmax.f32 %v624_v30, %v628_v34  ;;  %v241_v44 = vmax.f32 %v626_v33, %v630_v35  ;;  %v644_v46 = vadd.f32 %v196_v39, %v49_v27 }
  0xfb   :  { %230 = vmax.xlane.f32.xlu0 %v229_v42  ;;  %v244_v43 = vmax.f32 %v632_v38, %v634_v41  ;;  %v232_v62 = vmax.f32 %v642_v45, %v644_v46 }
  0xfd   :  { %245 = vmax.xlane.f32.xlu1 %v244_v43  ;;  %v200_v47 = vpop.f32.mrb[4].mxu0  ;;  %v220_v48 = vpop.f32.mrb[4].mxu1 }
  0xfe   :  { %v646_v49 = vadd.f32 %v200_v47, %v45_v26  ;;  %v202_v50 = vpop.f32.mrb[5].mxu0  ;;  %v222_v51 = vpop.f32.mrb[5].mxu1  ;;  %v650_v54 = vadd.f32 %v220_v48, %v45_v26 }
  0xff   :  { %v648_v52 = vadd.f32 %v202_v50, %v49_v27  ;;  %242 = vmax.xlane.f32.xlu0 %v241_v44  ;;  %v204_v53 = vpop.f32.mrb[6].mxu0  ;;  %v652_v55 = vadd.f32 %v222_v51, %v49_v27  ;;  %v224_v56 = vpop.f32.mrb[6].mxu1 }
 0x100   :  { %v654_v57 = vadd.f32 %v204_v53, %v45_v26  ;;  %v206_v58 = vpop.f32.mrb[7].mxu0  ;;  %v226_v59 = vpop.f32.mrb[7].mxu1  ;;  %v662_v63 = vadd.f32 %v224_v56, %v45_v26 }
 0x101   :  { %v656_v60 = vadd.f32 %v206_v58, %v49_v27  ;;  %v235_v61 = vmax.f32 %v646_v49, %v648_v52  ;;  %v664_v0 = vadd.f32 %v226_v59, %v49_v27  ;;  %v247_v2 = vmax.f32 %v650_v54, %v652_v55 }
 0x103   :  { %236 = vmax.xlane.f32.xlu1 %v235_v61  ;;  %233 = vmax.xlane.f32.xlu0 %v232_v62  ;;  %v238_v1 = vmax.f32 %v654_v57, %v656_v60  ;;  %v250_v3 = vmax.f32 %v662_v63, %v664_v0 }
 0x107   :  { %239 = vmax.xlane.f32.xlu1 %v238_v1  ;;  %248 = vmax.xlane.f32.xlu0 %v247_v2 }
 0x10b   :  { %251 = vmax.xlane.f32.xlu1 %v250_v3 }
 0x188   :  { %v672_v4 = vpop.xlane.xlu0 %230 }
 0x189   :  { %v253_v5 = vsub.f32 %v624_v30, %v672_v4  ;;  %v254_v6 = vsub.f32 %v628_v34, %v672_v4 }
 0x18a   :  { %v678_v9 = vpop.xlane.xlu1 %245 }
 0x18b   :  { %v269_v7 = vmul.f32 1.442695, %v253_v5  ;;  %v271_v8 = vmul.f32 1.442695, %v254_v6  ;;  %v263_v14 = vsub.f32 %v632_v38, %v678_v9  ;;  %v264_v21 = vsub.f32 %v634_v41, %v678_v9 }
 0x18c   :  { %v680_v10 = vpop.xlane.xlu0 %242 }
 0x18d   :  { %465 = vpow2.f32 %v269_v7  ;;  %v261_v11 = vsub.f32 %v626_v33, %v680_v10  ;;  %v262_v12 = vsub.f32 %v630_v35, %v680_v10  ;;  %v289_v29 = vmul.f32 1.442695, %v263_v14 }
 0x18e   :  { %467 = vpow2.f32 %v271_v8  ;;  %v291_v36 = vmul.f32 1.442695, %v264_v21 }
 0x18f   :  { %v285_v13 = vmul.f32 1.442695, %v261_v11  ;;  %v287_v15 = vmul.f32 1.442695, %v262_v12 }
 0x190   :  { %v688_v16 = vpop.xlane.xlu1 %236  ;;  %v690_v17 = vpop.xlane.xlu0 %233 }
 0x191   :  { %469 = vpow2.f32 %v285_v13  ;;  %v257_v18 = vsub.f32 %v646_v49, %v688_v16  ;;  %v258_v19 = vsub.f32 %v648_v52, %v688_v16  ;;  %v255_v20 = vsub.f32 %v642_v45, %v690_v17 }
 0x192   :  { %471 = vpow2.f32 %v287_v15  ;;  %v256_v22 = vsub.f32 %v644_v46, %v690_v17 }
 0x193   :  { %v277_v23 = vmul.f32 1.442695, %v257_v18  ;;  %v279_v24 = vmul.f32 1.442695, %v258_v19  ;;  %v273_v25 = vmul.f32 1.442695, %v255_v20 }
 0x194   :  { %v275_v26 = vmul.f32 1.442695, %v256_v22  ;;  %v702_v27 = vpop.xlane.xlu1 %239  ;;  %v704_v28 = vpop.xlane.xlu0 %248 }
 0x195   :  { %473 = vpow2.f32 %v277_v23  ;;  %v259_v31 = vsub.f32 %v654_v57, %v702_v27  ;;  %v265_v32 = vsub.f32 %v650_v54, %v704_v28  ;;  %v260_v37 = vsub.f32 %v656_v60, %v702_v27 }
 0x196   :  { %475 = vpow2.f32 %v279_v24  ;;  %v266_v39 = vsub.f32 %v652_v55, %v704_v28 }
 0x197   :  { %v466_v40 = vpop.eup %465  ;;  %477 = vpow2.f32 %v273_v25  ;;  %v293_v42 = vmul.f32 1.442695, %v265_v32  ;;  %v281_v48 = vmul.f32 1.442695, %v259_v31  ;;  %v283_v53 = vmul.f32 1.442695, %v260_v37 }
 0x198   :  { %v468_v43 = vpop.eup %467  ;;  %479 = vpow2.f32 %v275_v26  ;;  %v295_v44 = vmul.f32 1.442695, %v266_v39  ;;  %v714_v47 = vpop.xlane.xlu1 %251 }
 0x199   :  { %481 = vpow2.f32 %v289_v29  ;;  %v267_v50 = vsub.f32 %v662_v63, %v714_v47  ;;  %v301_v51 = vadd.f32 %v468_v43, %v466_v40  ;;  %v268_v56 = vsub.f32 %v664_v0, %v714_v47 }
 0x19a   :  { %483 = vpow2.f32 %v291_v36 }
 0x19b   :  { %v470_v58 = vpop.eup %469  ;;  %485 = vpow2.f32 %v293_v42  ;;  %302 = vadd.xlane.f32.xlu0 %v301_v51  ;;  %v297_v61 = vmul.f32 1.442695, %v267_v50  ;;  %v299_v1 = vmul.f32 1.442695, %v268_v56 }
 0x19c   :  { %v472_v59 = vpop.eup %471  ;;  %487 = vpow2.f32 %v295_v44 }
 0x19d   :  { %489 = vpow2.f32 %v281_v48  ;;  %v313_v62 = vadd.f32 %v472_v59, %v470_v58 }
 0x19e   :  { %491 = vpow2.f32 %v283_v53 }
 0x19f   :  { %v474_v2 = vpop.eup %473  ;;  %314 = vadd.xlane.f32.xlu0 %v313_v62  ;;  %493 = vpow2.f32 %v297_v61 }
 0x1a0   :  { %v476_v3 = vpop.eup %475  ;;  %495 = vpow2.f32 %v299_v1 }
 0x1a1   :  { %v478_v5 = vpop.eup %477  ;;  %v307_v6 = vadd.f32 %v476_v3, %v474_v2 }
 0x1a2   :  { %v480_v7 = vpop.eup %479 }
 0x1a3   :  { %v482_v8 = vpop.eup %481  ;;  %308 = vadd.xlane.f32.xlu0 %v307_v6  ;;  %v304_v11 = vadd.f32 %v480_v7, %v478_v5 }
 0x1a4   :  { %v484_v12 = vpop.eup %483 }
 0x1a5   :  { %v486_v13 = vpop.eup %485  ;;  %305 = vadd.xlane.f32.xlu1 %v304_v11  ;;  %v316_v18 = vadd.f32 %v484_v12, %v482_v8 }
 0x1a6   :  { %v488_v14 = vpop.eup %487 }
 0x1a7   :  { %v490_v15 = vpop.eup %489  ;;  %v319_v19 = vadd.f32 %v488_v14, %v486_v13 }
 0x1a8   :  { %v492_v20 = vpop.eup %491 }
 0x1a9   :  { %317 = vadd.xlane.f32.xlu1 %v316_v18  ;;  %320 = vadd.xlane.f32.xlu0 %v319_v19  ;;  %v494_v21 = vpop.eup %493  ;;  %v310_v22 = vadd.f32 %v492_v20, %v490_v15 }
 0x1aa   :  { %v496_v23 = vpop.eup %495 }
 0x1ab   :  { %v322_v24 = vadd.f32 %v496_v23, %v494_v21 }
 0x1ad   :  { %311 = vadd.xlane.f32.xlu1 %v310_v22 }
 0x1b1   :  { %323 = vadd.xlane.f32.xlu1 %v322_v24 }
 0x228   :  { %v303_v25 = vpop.xlane.xlu0 %302 }
 0x229   :  { %497 = vlog2.f32 %v303_v25 }
 0x22c   :  { %v315_v26 = vpop.xlane.xlu0 %314 }
 0x22d   :  { %499 = vlog2.f32 %v315_v26 }
 0x230   :  { %v309_v29 = vpop.xlane.xlu0 %308 }
 0x231   :  { %501 = vlog2.f32 %v309_v29 }
 0x232   :  { %v306_v31 = vpop.xlane.xlu1 %305 }
 0x233   :  { %v498_v32 = vpop.eup %497  ;;  %503 = vlog2.f32 %v306_v31 }
 0x234   :  { %v326_v36 = vmul.f32 0.6931472, %v498_v32 }
 0x236   :  { %v341_v37 = vadd.f32 %v326_v36, %v672_v4  ;;  %v318_v39 = vpop.xlane.xlu1 %317  ;;  %v321_v40 = vpop.xlane.xlu0 %320 }
 0x237   :  { %v500_v42 = vpop.eup %499  ;;  %505 = vlog2.f32 %v318_v39 }
 0x238   :  { %v349_v43 = vsub.f32 %v624_v30, %v341_v37  ;;  %v350_v44 = vsub.f32 %v628_v34, %v341_v37  ;;  %v334_v48 = vmul.f32 0.6931472, %v500_v42  ;;  %507 = vlog2.f32 %v321_v40 }
 0x23a   :  { %365 = vst [vmem:[#allocation2] sm:$0xff] %v349_v43  ;;  %366 = vst [vmem:[#allocation2 + $0x8] sm:$0xff] %v350_v44  ;;  %v345_v50 = vadd.f32 %v334_v48, %v680_v10  ;;  %v312_v51 = vpop.xlane.xlu1 %311 }
 0x23b   :  { %v502_v53 = vpop.eup %501  ;;  %509 = vlog2.f32 %v312_v51 }
 0x23c   :  { %v357_v56 = vsub.f32 %v626_v33, %v345_v50  ;;  %v358_v4 = vsub.f32 %v630_v35, %v345_v50  ;;  %v330_v58 = vmul.f32 0.6931472, %v502_v53 }
 0x23d   :  { %v504_v59 = vpop.eup %503 }
 0x23e   :  { %373 = vst [vmem:[#allocation2 + $0x40] sm:$0xff] %v357_v56  ;;  %374 = vst [vmem:[#allocation2 + $0x48] sm:$0xff] %v358_v4  ;;  %v328_v30 = vmul.f32 0.6931472, %v504_v59  ;;  %v343_v34 = vadd.f32 %v330_v58, %v688_v16  ;;  %v324_v61 = vpop.xlane.xlu1 %323 }
 0x23f   :  { %511 = vlog2.f32 %v324_v61 }
 0x240   :  { %v342_v62 = vadd.f32 %v328_v30, %v690_v17  ;;  %v353_v10 = vsub.f32 %v646_v49, %v343_v34  ;;  %v354_v1 = vsub.f32 %v648_v52, %v343_v34 }
 0x241   :  { %v506_v2 = vpop.eup %505 }
 0x242   :  { %v508_v3 = vpop.eup %507  ;;  %v351_v33 = vsub.f32 %v642_v45, %v342_v62  ;;  %v352_v35 = vsub.f32 %v644_v46, %v342_v62  ;;  %369 = vst [vmem:[#allocation2 + $0x20] sm:$0xff] %v353_v10  ;;  %370 = vst [vmem:[#allocation2 + $0x28] sm:$0xff] %v354_v1  ;;  %v336_v5 = vmul.f32 0.6931472, %v506_v2 }
 0x243   :  { %v338_v6 = vmul.f32 0.6931472, %v508_v3 }
 0x244   :  { %367 = vst [vmem:[#allocation2 + $0x10] sm:$0xff] %v351_v33  ;;  %368 = vst [vmem:[#allocation2 + $0x18] sm:$0xff] %v352_v35  ;;  %v346_v16 = vadd.f32 %v336_v5, %v678_v9 }
 0x245   :  { %v510_v7 = vpop.eup %509  ;;  %v347_v17 = vadd.f32 %v338_v6, %v704_v28 }
 0x246   :  { %v359_v49 = vsub.f32 %v632_v38, %v346_v16  ;;  %v360_v52 = vsub.f32 %v634_v41, %v346_v16  ;;  %v332_v8 = vmul.f32 0.6931472, %v510_v7 }
 0x247   :  { %v361_v45 = vsub.f32 %v650_v54, %v347_v17  ;;  %v362_v46 = vsub.f32 %v652_v55, %v347_v17 }
 0x248   :  { %375 = vst [vmem:[#allocation2 + $0x50] sm:$0xff] %v359_v49  ;;  %376 = vst [vmem:[#allocation2 + $0x58] sm:$0xff] %v360_v52  ;;  %v344_v11 = vadd.f32 %v332_v8, %v702_v27 }
 0x249   :  { %v512_v12 = vpop.eup %511  ;;  %377 = vst [vmem:[#allocation2 + $0x60] sm:$0xff] %v361_v45  ;;  %378 = vst [vmem:[#allocation2 + $0x68] sm:$0xff] %v362_v46 }
 0x24a   :  { %v355_v9 = vsub.f32 %v654_v57, %v344_v11  ;;  %v356_v28 = vsub.f32 %v656_v60, %v344_v11  ;;  %v340_v13 = vmul.f32 0.6931472, %v512_v12 }
 0x24c   :  { %371 = vst [vmem:[#allocation2 + $0x30] sm:$0xff] %v355_v9  ;;  %372 = vst [vmem:[#allocation2 + $0x38] sm:$0xff] %v356_v28  ;;  %v348_v38 = vadd.f32 %v340_v13, %v714_v47 }
 0x24e   :  { %v363_v41 = vsub.f32 %v662_v63, %v348_v38  ;;  %v364_v54 = vsub.f32 %v664_v0, %v348_v38 }
 0x250   :  { %379 = vst [vmem:[#allocation2 + $0x70] sm:$0xff] %v363_v41  ;;  %380 = vst [vmem:[#allocation2 + $0x78] sm:$0xff] %v364_v54 }
 0x251   :  { %524 = shalt.err (!%p521_p4)
}
 0x252   :  { %s525_s29 = scalar_lea.hbm %s759_s3, 2048 }
 0x253   :  { %p526_p5 = scmp.ne.s32.totalorder %s759_s3, %s525_s29  ;;  %p529_p6 = scmp.lt.u32.totalorder %s525_s29, %s759_s3 }
 0x255   :  { %p531_p7 = pnand %p529_p6, %p526_p5 }
 0x257   :  { %534 = shalt.err (!%p531_p7)
}
 0x258   :  { %s539_s7 = smov 256   ;;  %s540_s8 = smov 16  }
 0x259   :  { %392 = dma.vmem_to_hbm [thread:$0]  %s387_s2, 2048, %s759_s3, [#allocation3], %s539_s7, %s539_s7, %s540_s8  }
 0x25a   :  { %535 = dma.done.wait [#allocation3], 2048  }
 0x25b   :  { %536 = vsyncadd [#allocation3], 4294965248 }
 0x25c   :  { %396 = vsyncpa [#allocation3], 1 }

</bundles_post_ra>
